<compile_context>
chip_gen: v6e
topology: v6e:2x2x1
jax: 0.10.0
libtpu: 0.0.40
codegen_flags: <defaults>
</compile_context>

<pallas_src>
import functools

import numpy as np
import jax
import jax.numpy as jnp
from jax import lax
from jax.experimental import pallas as pl
from jax.experimental.pallas import tpu as pltpu

# ----------------------------- configuration --------------------------------
B = 2
IN_CH = 2
NUM_CLASSES = 5
IMAGE_SIZE = (4, 20)
DIM1 = 16
KERNELS = [(1, 5), (2, 2)]      # kernel == stride -> conv embed == patchify
STRIDES = [(1, 5), (2, 2)]
HEADS = [4, 8]
DEPTH = [1, 1]
DIM2 = (HEADS[1] // HEADS[0]) * DIM1             # 32
DIM_HEAD = DIM1                                  # module passes dim_head=self.dim
SCALE = float(DIM_HEAD) ** -0.5
S1_GRID = (IMAGE_SIZE[0] // STRIDES[0][0], IMAGE_SIZE[1] // STRIDES[0][1])   # (4, 4)
S2_GRID = (S1_GRID[0] // STRIDES[1][0], S1_GRID[1] // STRIDES[1][1])         # (2, 2)
N1 = S1_GRID[0] * S1_GRID[1]                     # 16 stage-1 tokens
N2 = S2_GRID[0] * S2_GRID[1]                     # 4 stage-2 tokens (+1 cls)
PATCH1 = IN_CH * KERNELS[0][0] * KERNELS[0][1]   # 10
LN_EPS = 1e-5
BN_EPS = 1e-5
LOGIT_PAD = 128                                  # lane-dense logits slab
TAPB1 = 16                                       # per-tap sublane block, stage 1 (HW=16)
TAPB2 = 8                                        # per-tap sublane block, stage 2 (HW=4 -> 8)
GATB = 8                                         # per-tap block of stage-2 gather matrix


# ----------------------- init-time constant matrices -------------------------
def _shift_matrix(hw, tapb):
    """(9*tapb, HW) 0/1 matrix; tap block j=(3u+v) holds the (u-1, v-1) shift of
    the row-major spatial tokens with zero padding (depthwise 3x3, pad 1)."""
    H, W = hw
    HW = H * W
    m = np.zeros((9 * tapb, HW), np.float32)
    for u in range(3):
        for v in range(3):
            j = 3 * u + v
            for i in range(HW):
                r, c = divmod(i, W)
                rs, cs = r + u - 1, c + v - 1
                if 0 <= rs < H and 0 <= cs < W:
                    m[j * tapb + i, rs * W + cs] = 1.0
    return m


def _gather_matrix():
    """(kh*kw*GATB, N1) 0/1 matrix for the stage-2 (2,2)/(2,2) conv patchify."""
    kh, kw = KERNELS[1]
    W1 = S1_GRID[1]
    m = np.zeros((kh * kw * GATB, N1), np.float32)
    for u in range(kh):
        for v in range(kw):
            j = u * kw + v
            for r in range(N2):
                ho, wo = divmod(r, S2_GRID[1])
                src = (ho * kh + u) * W1 + (wo * kw + v)
                m[j * GATB + r, src] = 1.0
    return m


def _rep_matrix(heads, n):
    m = np.zeros((heads * n, n), np.float32)
    for h in range(heads):
        m[h * n:(h + 1) * n, :] = np.eye(n, dtype=np.float32)
    return m


def _head_mask(heads, n, C):
    d = C // heads
    m = np.zeros((heads * n, C), np.float32)
    for h in range(heads):
        m[h * n:(h + 1) * n, h * d:(h + 1) * d] = 1.0
    return m


def _seg_sum(heads, n):
    m = np.zeros((heads * n, heads), np.float32)
    for h in range(heads):
        m[h * n:(h + 1) * n, h] = 1.0
    return m


# ------------------------------ in-kernel math -------------------------------
def _erf(x):
    # Abramowitz & Stegun 7.1.26 rational approximation (|err| <= 1.5e-7).
    a1, a2, a3, a4, a5 = 0.254829592, -0.284496736, 1.421413741, -1.453152027, 1.061405429
    p = 0.3275911
    s = jnp.where(x >= 0.0, 1.0, -1.0)
    z = jnp.abs(x)
    t = pl.reciprocal(1.0 + p * z, approx=True)      # EUP slot instead of VPU divide
    poly = ((((a5 * t + a4) * t + a3) * t + a2) * t + a1) * t
    return s * (1.0 - poly * jnp.exp(-z * z))


def _gelu(x):
    # torch F.gelu / nn.GELU(approximate='none'): 0.5*x*(1+erf(x/sqrt(2)))
    return 0.5 * x * (1.0 + _erf(x * 0.7071067811865476))


def _layernorm(x, g, b):
    mean = jnp.mean(x, axis=-1, keepdims=True)
    var = jnp.mean((x - mean) ** 2, axis=-1, keepdims=True)   # biased, like torch
    return (x - mean) * lax.rsqrt(var + LN_EPS) * g + b


# ------------------------------- model pieces --------------------------------
def _conv_attention(y, P, pre, heads, hw, tapb, last_stage):
    """ConvAttention: SepConv2d Q/K/V + batched multi-head softmax attention."""
    H, W = hw
    HW = H * W
    f32 = jnp.float32

    y_sp = y[0:HW, :]            # spatial tokens (cls, if present, is the LAST row)

    # all 9 depthwise-shifted copies of the spatial tokens in ONE MXU matmul
    shifted = jnp.dot(P(pre + "bigs"), y_sp, preferred_element_type=f32)

    def depthwise(which):        # 9 aligned VPU FMAs (BN scale folded into taps)
        prod = shifted * P(pre + "wd_" + which)
        acc = prod[0:HW, :]
        for j in range(1, 9):
            acc = acc + prod[j * tapb:j * tapb + HW, :]
        return acc

    # pointwise 1x1 convs (depthwise bias / BN / attention scale folded at init)
    q = jnp.dot(depthwise("q"), P(pre + "wq"), preferred_element_type=f32) + P(pre + "bq")
    k = jnp.dot(depthwise("k"), P(pre + "wk"), preferred_element_type=f32) + P(pre + "bk")
    v = jnp.dot(depthwise("v"), P(pre + "wv"), preferred_element_type=f32) + P(pre + "bv")

    if last_stage:
        cls = y[HW:HW + 1, :]    # cls token bypasses the SepConv2d projections
        top, bot = P("s2_seltop"), P("s2_selbot")

        def stack(sp, c_):       # row stacking via tiny selector matmuls
            return (jnp.dot(top, sp, preferred_element_type=f32)
                    + jnp.dot(bot, c_, preferred_element_type=f32))

        q = stack(q, cls * SCALE)          # scale folded into every q row
        k = stack(k, cls)
        v = stack(v, cls)

    # ---------- all heads batched into two wide MXU matmuls ------------------
    rep = P(pre + "rep")                    # (heads*n, n) 0/1 replication
    hm = P(pre + "hmask")                   # (heads*n, C) 0/1 head-block mask
    kt = jnp.dot(rep, k, preferred_element_type=f32) * hm
    vt = jnp.dot(rep, v, preferred_element_type=f32) * hm
    s = lax.dot_general(q, kt, (((1,), (1,)), ((), ())),
                        preferred_element_type=f32)          # (n, heads*n)
    s = s - jnp.max(s, axis=-1, keepdims=True)   # row-constant shift == safe per head
    e = jnp.exp(s)
    denom = jnp.dot(e, P(pre + "seg"), preferred_element_type=f32)   # (n, heads)
    inv = pl.reciprocal(denom, approx=True)                          # EUP
    prob = e * jnp.dot(inv, P(pre + "segT"), preferred_element_type=f32)
    o = jnp.dot(prob, vt, preferred_element_type=f32)                # (n, C)

    # output projection (nn.Linear)
    return jnp.dot(o, P(pre + "ow"), preferred_element_type=f32) + P(pre + "ob")


def _block(x, P, pre, heads, hw, tapb, last_stage):
    f32 = jnp.float32
    y = _layernorm(x, P(pre + "ln1_g"), P(pre + "ln1_b"))
    x = x + _conv_attention(y, P, pre, heads, hw, tapb, last_stage)
    y = _layernorm(x, P(pre + "ln2_g"), P(pre + "ln2_b"))
    h = _gelu(jnp.dot(y, P(pre + "ffw1"), preferred_element_type=f32) + P(pre + "ffb1"))
    return x + jnp.dot(h, P(pre + "ffw2"), preferred_element_type=f32) + P(pre + "ffb2")


# ------------------------------- fused kernel --------------------------------
def _fused_forward_kernel(layout, x_ref, p_ref, o_ref):
    f32 = jnp.float32

    def P(name):                 # static (sublane-aligned) slice of the param slab
        off, r, c = layout[name]
        return p_ref[off:off + r, 0:c]

    # ---------------- stage 1: conv embed (wrapper-patchified) + LN ------------
    t = jnp.dot(x_ref[0], P("s1_ew"), preferred_element_type=f32) + P("s1_eb")
    t = _layernorm(t, P("s1_ln_g"), P("s1_ln_b"))
    for d in range(DEPTH[0]):
        t = _block(t, P, f"s1_b{d}_", HEADS[0], S1_GRID, TAPB1, False)

    # ---------- stage 2: (2,2)/(2,2) conv embed as gather/weight matmuls -------
    g = P("s2_gather")
    ew = P("s2_ew")
    t2 = jnp.zeros((N2, DIM2), f32) + P("s2_eb")
    for j in range(KERNELS[1][0] * KERNELS[1][1]):
        gj = jnp.dot(g[j * GATB:j * GATB + N2, :], t, preferred_element_type=f32)
        t2 = t2 + jnp.dot(gj, ew[j * DIM1:(j + 1) * DIM1, :],
                          preferred_element_type=f32)
    t2 = _layernorm(t2, P("s2_ln_g"), P("s2_ln_b"))
    # cls token appended as the LAST row (spatial block stays at sublane 0;
    # attention / LN / FFN are permutation-equivariant, so this is equivalent
    # to the reference which prepends it).
    t2 = (jnp.dot(P("s2_seltop"), t2, preferred_element_type=f32)
          + jnp.dot(P("s2_selbot"), P("cls"), preferred_element_type=f32))

    for d in range(DEPTH[1]):
        t2 = _block(t2, P, f"s2_b{d}_", HEADS[1], S2_GRID, TAPB2, True)

    # ---------------- head: cls -> GELU -> LayerNorm -> Linear -----------------
    hcls = _gelu(t2[N2:N2 + 1, :])
    hcls = _layernorm(hcls, P("h_ln_g"), P("h_ln_b"))
    o_ref[0] = jnp.dot(hcls, P("h_w"), preferred_element_type=f32) + P("h_b")


# -------------------------------- wrapper ------------------------------------
def _patchify_stage1(x_nchw):
    """NCHW -> (B, N1, PATCH1) non-overlapping patches in (kh, kw, Cin) order."""
    kh, kw = KERNELS[0]
    x = jnp.transpose(x_nchw, (0, 2, 3, 1))                 # NHWC
    b, h, w, c = x.shape
    ho, wo = h // kh, w // kw
    x = x.reshape(b, ho, kh, wo, kw, c)
    x = jnp.transpose(x, (0, 1, 3, 2, 4, 5))                # (B, Ho, Wo, kh, kw, C)
    return x.reshape(b, ho * wo, kh * kw * c)


def make_forward(layout, param_rows):
    kernel = functools.partial(_fused_forward_kernel, layout)

    @jax.jit
    def forward(param_buf, x_nchw):
        xpat = _patchify_stage1(x_nchw)                     # (B, 16, 10)
        bsz = xpat.shape[0]
        out = pl.pallas_call(
            kernel,
            grid=(bsz,),
            in_specs=[
                pl.BlockSpec((1, N1, PATCH1), lambda b: (b, 0, 0)),
                pl.BlockSpec((param_rows, 128), lambda b: (0, 0)),   # one param slab
            ],
            out_specs=pl.BlockSpec((1, 1, LOGIT_PAD), lambda b: (b, 0, 0)),
            out_shape=jax.ShapeDtypeStruct((bsz, 1, LOGIT_PAD), jnp.float32),
            compiler_params=pltpu.CompilerParams(
                dimension_semantics=("parallel",)),         # 2 TCs on v7x
        )(xpat, param_buf)
        return out[:, 0, :NUM_CLASSES]

    return forward


# ------------------------------ parameter init -------------------------------
def init_params(seed=0):
    rng = np.random.default_rng(seed)
    bn_s = (1.0 + BN_EPS) ** -0.5      # BatchNorm2d eval with default buffers/affine

    def nrm(shape, s=0.02):
        return (s * rng.standard_normal(shape)).astype(np.float32)

    entries = []

    def add(name, arr):
        arr = np.asarray(arr, np.float32)
        if arr.ndim == 1:
            arr = arr.reshape(1, -1)
        assert arr.ndim == 2 and arr.shape[1] <= 128, name
        entries.append((name, arr))

    def add_ln(prefix, C):
        add(prefix + "_g", 1.0 + nrm((1, C), 0.05))
        add(prefix + "_b", nrm((1, C), 0.05))

    def linear(cin, cout, pad_out=None):
        w = nrm((cout, cin), 0.1).T                 # torch Linear (out,in) -> (in,out)
        b = nrm((1, cout), 0.02)
        if pad_out is not None:
            w = np.pad(w, ((0, 0), (0, pad_out - cout)))
            b = np.pad(b, ((0, 0), (0, pad_out - cout)))
        return w, b

    def conv_embed(cin, cout, kh, kw):
        w = nrm((cout, cin, kh, kw), 0.1)           # torch Conv2d (O, Cin, kh, kw)
        b = nrm((1, cout), 0.02)
        w = np.transpose(w, (2, 3, 1, 0)).reshape(kh * kw * cin, cout)
        return w, b

    def sepconv_folded(C, out_scale):
        # depthwise 3x3 (+bias) -> BN(eval, defaults) -> pointwise 1x1 (+bias);
        # BN scale, depthwise bias and the attention scale are folded at init.
        dw = nrm((C, 1, 3, 3), 0.1)
        dwb = nrm((C,), 0.02)
        pw = nrm((C, C), 0.1)
        pwb = nrm((C,), 0.02)
        taps = np.stack([dw[:, 0, u, v] * bn_s
                         for u in range(3) for v in range(3)], axis=0)     # (9, C)
        w = pw.T * out_scale                                               # (Cin, Cout)
        b = (((dwb * bn_s) @ pw.T) + pwb) * out_scale
        return taps, w, b.reshape(1, C)

    def add_attn(prefix, C, heads, hw, tapb, last_stage):
        H, W = hw
        HW = H * W
        n = HW + 1 if last_stage else HW
        add(prefix + "bigs", _shift_matrix(hw, tapb))
        for which, sc in (("q", SCALE), ("k", 1.0), ("v", 1.0)):
            taps, w, b = sepconv_folded(C, sc)
            wexp = np.zeros((9 * tapb, C), np.float32)
            for j in range(9):
                wexp[j * tapb:j * tapb + HW, :] = taps[j]
            add(prefix + "wd_" + which, wexp)
            add(prefix + "w" + which, w)
            add(prefix + "b" + which, b)
        add(prefix + "rep", _rep_matrix(heads, n))
        add(prefix + "hmask", _head_mask(heads, n, C))
        seg = _seg_sum(heads, n)
        add(prefix + "seg", seg)
        add(prefix + "segT", np.ascontiguousarray(seg.T))
        ow, ob = linear(C, C)
        add(prefix + "ow", ow)
        add(prefix + "ob", ob)

    def add_block(prefix, C, heads, hw, tapb, last_stage, mlp):
        add_ln(prefix + "ln1", C)
        add_attn(prefix, C, heads, hw, tapb, last_stage)
        add_ln(prefix + "ln2", C)
        w1, b1 = linear(C, mlp)
        add(prefix + "ffw1", w1); add(prefix + "ffb1", b1)
        w2, b2 = linear(mlp, C)
        add(prefix + "ffw2", w2); add(prefix + "ffb2", b2)

    # stage 1
    ew, eb = conv_embed(IN_CH, DIM1, *KERNELS[0])
    add("s1_ew", ew); add("s1_eb", eb)
    add_ln("s1_ln", DIM1)
    for d in range(DEPTH[0]):
        add_block(f"s1_b{d}_", DIM1, HEADS[0], S1_GRID, TAPB1, False, DIM1)

    # stage 2 embed + cls
    add("s2_gather", _gather_matrix())
    ew2, eb2 = conv_embed(DIM1, DIM2, *KERNELS[1])
    add("s2_ew", ew2); add("s2_eb", eb2)
    add_ln("s2_ln", DIM2)
    add("cls", rng.standard_normal((1, DIM2)).astype(np.float32))   # torch.randn
    seltop = np.zeros((N2 + 1, N2), np.float32); seltop[:N2, :] = np.eye(N2)
    selbot = np.zeros((N2 + 1, 1), np.float32); selbot[N2, 0] = 1.0
    add("s2_seltop", seltop); add("s2_selbot", selbot)
    for d in range(DEPTH[1]):
        add_block(f"s2_b{d}_", DIM2, HEADS[1], S2_GRID, TAPB2, True, DIM2)

    # head
    add_ln("h_ln", DIM2)
    hw_, hb_ = linear(DIM2, NUM_CLASSES, pad_out=LOGIT_PAD)
    add("h_w", hw_); add("h_b", hb_)

    # pack everything into ONE (rows, 128) f32 slab; every tensor starts at an
    # 8-row-aligned offset so all in-kernel ref slices are sublane aligned.
    layout = {}
    rows = 0
    for name, arr in entries:
        layout[name] = (rows, arr.shape[0], arr.shape[1])
        rows += -(-arr.shape[0] // 8) * 8
    buf = np.zeros((rows, 128), np.float32)
    for name, arr in entries:
        off, r, c = layout[name]
        buf[off:off + r, :c] = arr
    return jnp.asarray(buf), layout


# ----------------------------------- main ------------------------------------
if __name__ == "__main__":
    param_buf, layout = init_params(0)
    fwd = make_forward(layout, param_buf.shape[0])

    x = jax.random.normal(jax.random.PRNGKey(0),
                          (B, IN_CH, IMAGE_SIZE[0], IMAGE_SIZE[1]), jnp.float32)
    out = fwd(param_buf, x)
    out = jax.block_until_ready(out)
    assert out.shape == (B, NUM_CLASSES) and out.dtype == jnp.float32
    assert bool(jnp.all(jnp.isfinite(out)))
    print("KERNEL_OK")
</pallas_src>

<mosaic_0001>
module attributes {stable_mosaic.version = 11 : i64} {
  func.func @_fused_forward_kernel(%arg0: i32, %arg1: memref<1x16x10xf32, #tpu.memory_space<vmem>>, %arg2: memref<1880x128xf32, #tpu.memory_space<vmem>>, %arg3: memref<1x1x128xf32, #tpu.memory_space<vmem>>) attributes {dimension_semantics = [#tpu.dimension_semantics<parallel>], iteration_bounds = array<i64: 2>, scalar_prefetch = 0 : i64, scratch_operands = 0 : i64, tpu.core_type = #tpu.core_type<tc>, window_params = [{transform_indices = @transform_0, window_bounds = array<i64: 1, 16, 10>}, {pipeline_mode = #tpu.pipeline_mode<synchronous>, transform_indices = @transform_1, window_bounds = array<i64: 1880, 128>}, {transform_indices = @transform_2, window_bounds = array<i64: 1, 1, 128>}]} {
    %c0 = arith.constant 0 : index
    %c0_0 = arith.constant 0 : index
    %c0_1 = arith.constant 0 : index
    %0 = vector.load %arg1[%c0, %c0_0, %c0_1] : memref<1x16x10xf32, #tpu.memory_space<vmem>>, vector<1x16x10xf32>
    %1 = vector.shape_cast %0 : vector<1x16x10xf32> to vector<16x10xf32>
    %c0_2 = arith.constant 0 : index
    %c0_3 = arith.constant 0 : index
    %2 = vector.load %arg2[%c0_2, %c0_3] : memref<1880x128xf32, #tpu.memory_space<vmem>>, vector<10x16xf32>
    %cst = arith.constant dense<0.000000e+00> : vector<16x16xf32>
    %3 = tpu.matmul %1, %2, %cst {dimension_numbers = #tpu.dot_dimension_numbers<[1], [0], [0], [1], [0, 0, 1, 1], [], []>} : vector<16x10xf32>, vector<10x16xf32>, vector<16x16xf32> -> vector<16x16xf32>
    %c16 = arith.constant 16 : index
    %c0_4 = arith.constant 0 : index
    %4 = vector.load %arg2[%c16, %c0_4] : memref<1880x128xf32, #tpu.memory_space<vmem>>, vector<1x16xf32>
    %5 = vector.broadcast %4 : vector<1x16xf32> to vector<16x16xf32>
    %6 = arith.addf %3, %5 : vector<16x16xf32>
    %c24 = arith.constant 24 : index
    %c0_5 = arith.constant 0 : index
    %7 = vector.load %arg2[%c24, %c0_5] : memref<1880x128xf32, #tpu.memory_space<vmem>>, vector<1x16xf32>
    %c32 = arith.constant 32 : index
    %c0_6 = arith.constant 0 : index
    %8 = vector.load %arg2[%c32, %c0_6] : memref<1880x128xf32, #tpu.memory_space<vmem>>, vector<1x16xf32>
    %cst_7 = arith.constant dense<0.000000e+00> : vector<16xf32>
    %9 = vector.multi_reduction <add>, %6, %cst_7 [1] : vector<16x16xf32> to vector<16xf32>
    %10 = vector.shape_cast %9 : vector<16xf32> to vector<16x1xf32>
    %cst_8 = arith.constant 1.600000e+01 : f32
    %11 = vector.broadcast %cst_8 : f32 to vector<16x1xf32>
    %12 = arith.divf %10, %11 : vector<16x1xf32>
    %13 = vector.broadcast %12 : vector<16x1xf32> to vector<16x16xf32>
    %14 = arith.subf %6, %13 : vector<16x16xf32>
    %15 = arith.mulf %14, %14 : vector<16x16xf32>
    %cst_9 = arith.constant dense<0.000000e+00> : vector<16xf32>
    %16 = vector.multi_reduction <add>, %15, %cst_9 [1] : vector<16x16xf32> to vector<16xf32>
    %17 = vector.shape_cast %16 : vector<16xf32> to vector<16x1xf32>
    %cst_10 = arith.constant 1.600000e+01 : f32
    %18 = vector.broadcast %cst_10 : f32 to vector<16x1xf32>
    %19 = arith.divf %17, %18 : vector<16x1xf32>
    %20 = vector.broadcast %12 : vector<16x1xf32> to vector<16x16xf32>
    %21 = arith.subf %6, %20 : vector<16x16xf32>
    %cst_11 = arith.constant 9.99999974E-6 : f32
    %22 = vector.broadcast %cst_11 : f32 to vector<16x1xf32>
    %23 = arith.addf %19, %22 : vector<16x1xf32>
    %24 = math.rsqrt %23 : vector<16x1xf32>
    %25 = vector.broadcast %24 : vector<16x1xf32> to vector<16x16xf32>
    %26 = arith.mulf %21, %25 : vector<16x16xf32>
    %27 = vector.broadcast %7 : vector<1x16xf32> to vector<16x16xf32>
    %28 = arith.mulf %26, %27 : vector<16x16xf32>
    %29 = vector.broadcast %8 : vector<1x16xf32> to vector<16x16xf32>
    %30 = arith.addf %28, %29 : vector<16x16xf32>
    %c40 = arith.constant 40 : index
    %c0_12 = arith.constant 0 : index
    %31 = vector.load %arg2[%c40, %c0_12] : memref<1880x128xf32, #tpu.memory_space<vmem>>, vector<1x16xf32>
    %c48 = arith.constant 48 : index
    %c0_13 = arith.constant 0 : index
    %32 = vector.load %arg2[%c48, %c0_13] : memref<1880x128xf32, #tpu.memory_space<vmem>>, vector<1x16xf32>
    %cst_14 = arith.constant dense<0.000000e+00> : vector<16xf32>
    %33 = vector.multi_reduction <add>, %30, %cst_14 [1] : vector<16x16xf32> to vector<16xf32>
    %34 = vector.shape_cast %33 : vector<16xf32> to vector<16x1xf32>
    %cst_15 = arith.constant 1.600000e+01 : f32
    %35 = vector.broadcast %cst_15 : f32 to vector<16x1xf32>
    %36 = arith.divf %34, %35 : vector<16x1xf32>
    %37 = vector.broadcast %36 : vector<16x1xf32> to vector<16x16xf32>
    %38 = arith.subf %30, %37 : vector<16x16xf32>
    %39 = arith.mulf %38, %38 : vector<16x16xf32>
    %cst_16 = arith.constant dense<0.000000e+00> : vector<16xf32>
    %40 = vector.multi_reduction <add>, %39, %cst_16 [1] : vector<16x16xf32> to vector<16xf32>
    %41 = vector.shape_cast %40 : vector<16xf32> to vector<16x1xf32>
    %cst_17 = arith.constant 1.600000e+01 : f32
    %42 = vector.broadcast %cst_17 : f32 to vector<16x1xf32>
    %43 = arith.divf %41, %42 : vector<16x1xf32>
    %44 = vector.broadcast %36 : vector<16x1xf32> to vector<16x16xf32>
    %45 = arith.subf %30, %44 : vector<16x16xf32>
    %cst_18 = arith.constant 9.99999974E-6 : f32
    %46 = vector.broadcast %cst_18 : f32 to vector<16x1xf32>
    %47 = arith.addf %43, %46 : vector<16x1xf32>
    %48 = math.rsqrt %47 : vector<16x1xf32>
    %49 = vector.broadcast %48 : vector<16x1xf32> to vector<16x16xf32>
    %50 = arith.mulf %45, %49 : vector<16x16xf32>
    %51 = vector.broadcast %31 : vector<1x16xf32> to vector<16x16xf32>
    %52 = arith.mulf %50, %51 : vector<16x16xf32>
    %53 = vector.broadcast %32 : vector<1x16xf32> to vector<16x16xf32>
    %54 = arith.addf %52, %53 : vector<16x16xf32>
    %c56 = arith.constant 56 : index
    %c0_19 = arith.constant 0 : index
    %55 = vector.load %arg2[%c56, %c0_19] : memref<1880x128xf32, #tpu.memory_space<vmem>>, vector<144x16xf32>
    %cst_20 = arith.constant dense<0.000000e+00> : vector<144x16xf32>
    %56 = tpu.matmul %55, %54, %cst_20 {dimension_numbers = #tpu.dot_dimension_numbers<[1], [0], [0], [1], [0, 0, 1, 1], [], []>} : vector<144x16xf32>, vector<16x16xf32>, vector<144x16xf32> -> vector<144x16xf32>
    %c200 = arith.constant 200 : index
    %c0_21 = arith.constant 0 : index
    %57 = vector.load %arg2[%c200, %c0_21] : memref<1880x128xf32, #tpu.memory_space<vmem>>, vector<144x16xf32>
    %58 = arith.mulf %56, %57 : vector<144x16xf32>
    %59 = vector.extract_strided_slice %58 {offsets = [0, 0], sizes = [16, 16], strides = [1, 1]} : vector<144x16xf32> to vector<16x16xf32>
    %60 = vector.extract_strided_slice %58 {offsets = [16, 0], sizes = [16, 16], strides = [1, 1]} : vector<144x16xf32> to vector<16x16xf32>
    %61 = arith.addf %59, %60 : vector<16x16xf32>
    %62 = vector.extract_strided_slice %58 {offsets = [32, 0], sizes = [16, 16], strides = [1, 1]} : vector<144x16xf32> to vector<16x16xf32>
    %63 = arith.addf %61, %62 : vector<16x16xf32>
    %64 = vector.extract_strided_slice %58 {offsets = [48, 0], sizes = [16, 16], strides = [1, 1]} : vector<144x16xf32> to vector<16x16xf32>
    %65 = arith.addf %63, %64 : vector<16x16xf32>
    %66 = vector.extract_strided_slice %58 {offsets = [64, 0], sizes = [16, 16], strides = [1, 1]} : vector<144x16xf32> to vector<16x16xf32>
    %67 = arith.addf %65, %66 : vector<16x16xf32>
    %68 = vector.extract_strided_slice %58 {offsets = [80, 0], sizes = [16, 16], strides = [1, 1]} : vector<144x16xf32> to vector<16x16xf32>
    %69 = arith.addf %67, %68 : vector<16x16xf32>
    %70 = vector.extract_strided_slice %58 {offsets = [96, 0], sizes = [16, 16], strides = [1, 1]} : vector<144x16xf32> to vector<16x16xf32>
    %71 = arith.addf %69, %70 : vector<16x16xf32>
    %72 = vector.extract_strided_slice %58 {offsets = [112, 0], sizes = [16, 16], strides = [1, 1]} : vector<144x16xf32> to vector<16x16xf32>
    %73 = arith.addf %71, %72 : vector<16x16xf32>
    %74 = vector.extract_strided_slice %58 {offsets = [128, 0], sizes = [16, 16], strides = [1, 1]} : vector<144x16xf32> to vector<16x16xf32>
    %75 = arith.addf %73, %74 : vector<16x16xf32>
    %c344 = arith.constant 344 : index
    %c0_22 = arith.constant 0 : index
    %76 = vector.load %arg2[%c344, %c0_22] : memref<1880x128xf32, #tpu.memory_space<vmem>>, vector<16x16xf32>
    %cst_23 = arith.constant dense<0.000000e+00> : vector<16x16xf32>
    %77 = tpu.matmul %75, %76, %cst_23 {dimension_numbers = #tpu.dot_dimension_numbers<[1], [0], [0], [1], [0, 0, 1, 1], [], []>} : vector<16x16xf32>, vector<16x16xf32>, vector<16x16xf32> -> vector<16x16xf32>
    %c360 = arith.constant 360 : index
    %c0_24 = arith.constant 0 : index
    %78 = vector.load %arg2[%c360, %c0_24] : memref<1880x128xf32, #tpu.memory_space<vmem>>, vector<1x16xf32>
    %79 = vector.broadcast %78 : vector<1x16xf32> to vector<16x16xf32>
    %80 = arith.addf %77, %79 : vector<16x16xf32>
    %c368 = arith.constant 368 : index
    %c0_25 = arith.constant 0 : index
    %81 = vector.load %arg2[%c368, %c0_25] : memref<1880x128xf32, #tpu.memory_space<vmem>>, vector<144x16xf32>
    %82 = arith.mulf %56, %81 : vector<144x16xf32>
    %83 = vector.extract_strided_slice %82 {offsets = [0, 0], sizes = [16, 16], strides = [1, 1]} : vector<144x16xf32> to vector<16x16xf32>
    %84 = vector.extract_strided_slice %82 {offsets = [16, 0], sizes = [16, 16], strides = [1, 1]} : vector<144x16xf32> to vector<16x16xf32>
    %85 = arith.addf %83, %84 : vector<16x16xf32>
    %86 = vector.extract_strided_slice %82 {offsets = [32, 0], sizes = [16, 16], strides = [1, 1]} : vector<144x16xf32> to vector<16x16xf32>
    %87 = arith.addf %85, %86 : vector<16x16xf32>
    %88 = vector.extract_strided_slice %82 {offsets = [48, 0], sizes = [16, 16], strides = [1, 1]} : vector<144x16xf32> to vector<16x16xf32>
    %89 = arith.addf %87, %88 : vector<16x16xf32>
    %90 = vector.extract_strided_slice %82 {offsets = [64, 0], sizes = [16, 16], strides = [1, 1]} : vector<144x16xf32> to vector<16x16xf32>
    %91 = arith.addf %89, %90 : vector<16x16xf32>
    %92 = vector.extract_strided_slice %82 {offsets = [80, 0], sizes = [16, 16], strides = [1, 1]} : vector<144x16xf32> to vector<16x16xf32>
    %93 = arith.addf %91, %92 : vector<16x16xf32>
    %94 = vector.extract_strided_slice %82 {offsets = [96, 0], sizes = [16, 16], strides = [1, 1]} : vector<144x16xf32> to vector<16x16xf32>
    %95 = arith.addf %93, %94 : vector<16x16xf32>
    %96 = vector.extract_strided_slice %82 {offsets = [112, 0], sizes = [16, 16], strides = [1, 1]} : vector<144x16xf32> to vector<16x16xf32>
    %97 = arith.addf %95, %96 : vector<16x16xf32>
    %98 = vector.extract_strided_slice %82 {offsets = [128, 0], sizes = [16, 16], strides = [1, 1]} : vector<144x16xf32> to vector<16x16xf32>
    %99 = arith.addf %97, %98 : vector<16x16xf32>
    %c512 = arith.constant 512 : index
    %c0_26 = arith.constant 0 : index
    %100 = vector.load %arg2[%c512, %c0_26] : memref<1880x128xf32, #tpu.memory_space<vmem>>, vector<16x16xf32>
    %cst_27 = arith.constant dense<0.000000e+00> : vector<16x16xf32>
    %101 = tpu.matmul %99, %100, %cst_27 {dimension_numbers = #tpu.dot_dimension_numbers<[1], [0], [0], [1], [0, 0, 1, 1], [], []>} : vector<16x16xf32>, vector<16x16xf32>, vector<16x16xf32> -> vector<16x16xf32>
    %c528 = arith.constant 528 : index
    %c0_28 = arith.constant 0 : index
    %102 = vector.load %arg2[%c528, %c0_28] : memref<1880x128xf32, #tpu.memory_space<vmem>>, vector<1x16xf32>
    %103 = vector.broadcast %102 : vector<1x16xf32> to vector<16x16xf32>
    %104 = arith.addf %101, %103 : vector<16x16xf32>
    %c536 = arith.constant 536 : index
    %c0_29 = arith.constant 0 : index
    %105 = vector.load %arg2[%c536, %c0_29] : memref<1880x128xf32, #tpu.memory_space<vmem>>, vector<144x16xf32>
    %106 = arith.mulf %56, %105 : vector<144x16xf32>
    %107 = vector.extract_strided_slice %106 {offsets = [0, 0], sizes = [16, 16], strides = [1, 1]} : vector<144x16xf32> to vector<16x16xf32>
    %108 = vector.extract_strided_slice %106 {offsets = [16, 0], sizes = [16, 16], strides = [1, 1]} : vector<144x16xf32> to vector<16x16xf32>
    %109 = arith.addf %107, %108 : vector<16x16xf32>
    %110 = vector.extract_strided_slice %106 {offsets = [32, 0], sizes = [16, 16], strides = [1, 1]} : vector<144x16xf32> to vector<16x16xf32>
    %111 = arith.addf %109, %110 : vector<16x16xf32>
    %112 = vector.extract_strided_slice %106 {offsets = [48, 0], sizes = [16, 16], strides = [1, 1]} : vector<144x16xf32> to vector<16x16xf32>
    %113 = arith.addf %111, %112 : vector<16x16xf32>
    %114 = vector.extract_strided_slice %106 {offsets = [64, 0], sizes = [16, 16], strides = [1, 1]} : vector<144x16xf32> to vector<16x16xf32>
    %115 = arith.addf %113, %114 : vector<16x16xf32>
    %116 = vector.extract_strided_slice %106 {offsets = [80, 0], sizes = [16, 16], strides = [1, 1]} : vector<144x16xf32> to vector<16x16xf32>
    %117 = arith.addf %115, %116 : vector<16x16xf32>
    %118 = vector.extract_strided_slice %106 {offsets = [96, 0], sizes = [16, 16], strides = [1, 1]} : vector<144x16xf32> to vector<16x16xf32>
    %119 = arith.addf %117, %118 : vector<16x16xf32>
    %120 = vector.extract_strided_slice %106 {offsets = [112, 0], sizes = [16, 16], strides = [1, 1]} : vector<144x16xf32> to vector<16x16xf32>
    %121 = arith.addf %119, %120 : vector<16x16xf32>
    %122 = vector.extract_strided_slice %106 {offsets = [128, 0], sizes = [16, 16], strides = [1, 1]} : vector<144x16xf32> to vector<16x16xf32>
    %123 = arith.addf %121, %122 : vector<16x16xf32>
    %c680 = arith.constant 680 : index
    %c0_30 = arith.constant 0 : index
    %124 = vector.load %arg2[%c680, %c0_30] : memref<1880x128xf32, #tpu.memory_space<vmem>>, vector<16x16xf32>
    %cst_31 = arith.constant dense<0.000000e+00> : vector<16x16xf32>
    %125 = tpu.matmul %123, %124, %cst_31 {dimension_numbers = #tpu.dot_dimension_numbers<[1], [0], [0], [1], [0, 0, 1, 1], [], []>} : vector<16x16xf32>, vector<16x16xf32>, vector<16x16xf32> -> vector<16x16xf32>
    %c696 = arith.constant 696 : index
    %c0_32 = arith.constant 0 : index
    %126 = vector.load %arg2[%c696, %c0_32] : memref<1880x128xf32, #tpu.memory_space<vmem>>, vector<1x16xf32>
    %127 = vector.broadcast %126 : vector<1x16xf32> to vector<16x16xf32>
    %128 = arith.addf %125, %127 : vector<16x16xf32>
    %c704 = arith.constant 704 : index
    %c0_33 = arith.constant 0 : index
    %129 = vector.load %arg2[%c704, %c0_33] : memref<1880x128xf32, #tpu.memory_space<vmem>>, vector<64x16xf32>
    %c768 = arith.constant 768 : index
    %c0_34 = arith.constant 0 : index
    %130 = vector.load %arg2[%c768, %c0_34] : memref<1880x128xf32, #tpu.memory_space<vmem>>, vector<64x16xf32>
    %cst_35 = arith.constant dense<0.000000e+00> : vector<64x16xf32>
    %131 = tpu.matmul %129, %104, %cst_35 {dimension_numbers = #tpu.dot_dimension_numbers<[1], [0], [0], [1], [0, 0, 1, 1], [], []>} : vector<64x16xf32>, vector<16x16xf32>, vector<64x16xf32> -> vector<64x16xf32>
    %132 = arith.mulf %131, %130 : vector<64x16xf32>
    %cst_36 = arith.constant dense<0.000000e+00> : vector<64x16xf32>
    %133 = tpu.matmul %129, %128, %cst_36 {dimension_numbers = #tpu.dot_dimension_numbers<[1], [0], [0], [1], [0, 0, 1, 1], [], []>} : vector<64x16xf32>, vector<16x16xf32>, vector<64x16xf32> -> vector<64x16xf32>
    %134 = arith.mulf %133, %130 : vector<64x16xf32>
    %cst_37 = arith.constant dense<0.000000e+00> : vector<16x64xf32>
    %135 = tpu.matmul %80, %132, %cst_37 {dimension_numbers = #tpu.dot_dimension_numbers<[1], [1], [0], [0], [0, 0, 1, 0], [], []>} : vector<16x16xf32>, vector<64x16xf32>, vector<16x64xf32> -> vector<16x64xf32>
    %cst_38 = arith.constant dense<0xFF800000> : vector<16xf32>
    %136 = vector.multi_reduction <maximumf>, %135, %cst_38 [1] : vector<16x64xf32> to vector<16xf32>
    %137 = vector.shape_cast %136 : vector<16xf32> to vector<16x1xf32>
    %138 = vector.broadcast %137 : vector<16x1xf32> to vector<16x64xf32>
    %139 = arith.subf %135, %138 : vector<16x64xf32>
    %140 = math.exp %139 : vector<16x64xf32>
    %c832 = arith.constant 832 : index
    %c0_39 = arith.constant 0 : index
    %141 = vector.load %arg2[%c832, %c0_39] : memref<1880x128xf32, #tpu.memory_space<vmem>>, vector<64x4xf32>
    %cst_40 = arith.constant dense<0.000000e+00> : vector<16x4xf32>
    %142 = tpu.matmul %140, %141, %cst_40 {dimension_numbers = #tpu.dot_dimension_numbers<[1], [0], [0], [1], [0, 0, 1, 1], [], []>} : vector<16x64xf32>, vector<64x4xf32>, vector<16x4xf32> -> vector<16x4xf32>
    %143 = tpu.reciprocal %142 {approx = true} : vector<16x4xf32> -> vector<16x4xf32>
    %c896 = arith.constant 896 : index
    %c0_41 = arith.constant 0 : index
    %144 = vector.load %arg2[%c896, %c0_41] : memref<1880x128xf32, #tpu.memory_space<vmem>>, vector<4x64xf32>
    %cst_42 = arith.constant dense<0.000000e+00> : vector<16x64xf32>
    %145 = tpu.matmul %143, %144, %cst_42 {dimension_numbers = #tpu.dot_dimension_numbers<[1], [0], [0], [1], [0, 0, 1, 1], [], []>} : vector<16x4xf32>, vector<4x64xf32>, vector<16x64xf32> -> vector<16x64xf32>
    %146 = arith.mulf %140, %145 : vector<16x64xf32>
    %cst_43 = arith.constant dense<0.000000e+00> : vector<16x16xf32>
    %147 = tpu.matmul %146, %134, %cst_43 {dimension_numbers = #tpu.dot_dimension_numbers<[1], [0], [0], [1], [0, 0, 1, 1], [], []>} : vector<16x64xf32>, vector<64x16xf32>, vector<16x16xf32> -> vector<16x16xf32>
    %c904 = arith.constant 904 : index
    %c0_44 = arith.constant 0 : index
    %148 = vector.load %arg2[%c904, %c0_44] : memref<1880x128xf32, #tpu.memory_space<vmem>>, vector<16x16xf32>
    %cst_45 = arith.constant dense<0.000000e+00> : vector<16x16xf32>
    %149 = tpu.matmul %147, %148, %cst_45 {dimension_numbers = #tpu.dot_dimension_numbers<[1], [0], [0], [1], [0, 0, 1, 1], [], []>} : vector<16x16xf32>, vector<16x16xf32>, vector<16x16xf32> -> vector<16x16xf32>
    %c920 = arith.constant 920 : index
    %c0_46 = arith.constant 0 : index
    %150 = vector.load %arg2[%c920, %c0_46] : memref<1880x128xf32, #tpu.memory_space<vmem>>, vector<1x16xf32>
    %151 = vector.broadcast %150 : vector<1x16xf32> to vector<16x16xf32>
    %152 = arith.addf %149, %151 : vector<16x16xf32>
    %153 = arith.addf %30, %152 : vector<16x16xf32>
    %c928 = arith.constant 928 : index
    %c0_47 = arith.constant 0 : index
    %154 = vector.load %arg2[%c928, %c0_47] : memref<1880x128xf32, #tpu.memory_space<vmem>>, vector<1x16xf32>
    %c936 = arith.constant 936 : index
    %c0_48 = arith.constant 0 : index
    %155 = vector.load %arg2[%c936, %c0_48] : memref<1880x128xf32, #tpu.memory_space<vmem>>, vector<1x16xf32>
    %cst_49 = arith.constant dense<0.000000e+00> : vector<16xf32>
    %156 = vector.multi_reduction <add>, %153, %cst_49 [1] : vector<16x16xf32> to vector<16xf32>
    %157 = vector.shape_cast %156 : vector<16xf32> to vector<16x1xf32>
    %cst_50 = arith.constant 1.600000e+01 : f32
    %158 = vector.broadcast %cst_50 : f32 to vector<16x1xf32>
    %159 = arith.divf %157, %158 : vector<16x1xf32>
    %160 = vector.broadcast %159 : vector<16x1xf32> to vector<16x16xf32>
    %161 = arith.subf %153, %160 : vector<16x16xf32>
    %162 = arith.mulf %161, %161 : vector<16x16xf32>
    %cst_51 = arith.constant dense<0.000000e+00> : vector<16xf32>
    %163 = vector.multi_reduction <add>, %162, %cst_51 [1] : vector<16x16xf32> to vector<16xf32>
    %164 = vector.shape_cast %163 : vector<16xf32> to vector<16x1xf32>
    %cst_52 = arith.constant 1.600000e+01 : f32
    %165 = vector.broadcast %cst_52 : f32 to vector<16x1xf32>
    %166 = arith.divf %164, %165 : vector<16x1xf32>
    %167 = vector.broadcast %159 : vector<16x1xf32> to vector<16x16xf32>
    %168 = arith.subf %153, %167 : vector<16x16xf32>
    %cst_53 = arith.constant 9.99999974E-6 : f32
    %169 = vector.broadcast %cst_53 : f32 to vector<16x1xf32>
    %170 = arith.addf %166, %169 : vector<16x1xf32>
    %171 = math.rsqrt %170 : vector<16x1xf32>
    %172 = vector.broadcast %171 : vector<16x1xf32> to vector<16x16xf32>
    %173 = arith.mulf %168, %172 : vector<16x16xf32>
    %174 = vector.broadcast %154 : vector<1x16xf32> to vector<16x16xf32>
    %175 = arith.mulf %173, %174 : vector<16x16xf32>
    %176 = vector.broadcast %155 : vector<1x16xf32> to vector<16x16xf32>
    %177 = arith.addf %175, %176 : vector<16x16xf32>
    %c944 = arith.constant 944 : index
    %c0_54 = arith.constant 0 : index
    %178 = vector.load %arg2[%c944, %c0_54] : memref<1880x128xf32, #tpu.memory_space<vmem>>, vector<16x16xf32>
    %cst_55 = arith.constant dense<0.000000e+00> : vector<16x16xf32>
    %179 = tpu.matmul %177, %178, %cst_55 {dimension_numbers = #tpu.dot_dimension_numbers<[1], [0], [0], [1], [0, 0, 1, 1], [], []>} : vector<16x16xf32>, vector<16x16xf32>, vector<16x16xf32> -> vector<16x16xf32>
    %c960 = arith.constant 960 : index
    %c0_56 = arith.constant 0 : index
    %180 = vector.load %arg2[%c960, %c0_56] : memref<1880x128xf32, #tpu.memory_space<vmem>>, vector<1x16xf32>
    %181 = vector.broadcast %180 : vector<1x16xf32> to vector<16x16xf32>
    %182 = arith.addf %179, %181 : vector<16x16xf32>
    %cst_57 = arith.constant 5.000000e-01 : f32
    %183 = vector.broadcast %cst_57 : f32 to vector<16x16xf32>
    %184 = arith.mulf %183, %182 : vector<16x16xf32>
    %cst_58 = arith.constant 0.707106769 : f32
    %185 = vector.broadcast %cst_58 : f32 to vector<16x16xf32>
    %186 = arith.mulf %182, %185 : vector<16x16xf32>
    %cst_59 = arith.constant 0.000000e+00 : f32
    %187 = vector.broadcast %cst_59 : f32 to vector<16x16xf32>
    %188 = arith.cmpf oge, %186, %187 : vector<16x16xf32>
    %cst_60 = arith.constant 1.000000e+00 : f32
    %cst_61 = arith.constant -1.000000e+00 : f32
    %189 = vector.broadcast %cst_60 : f32 to vector<16x16xf32>
    %190 = vector.broadcast %cst_61 : f32 to vector<16x16xf32>
    %191 = arith.select %188, %189, %190 : vector<16x16xi1>, vector<16x16xf32>
    %192 = math.absf %186 : vector<16x16xf32>
    %cst_62 = arith.constant 0.327591091 : f32
    %193 = vector.broadcast %cst_62 : f32 to vector<16x16xf32>
    %194 = arith.mulf %193, %192 : vector<16x16xf32>
    %cst_63 = arith.constant 1.000000e+00 : f32
    %195 = vector.broadcast %cst_63 : f32 to vector<16x16xf32>
    %196 = arith.addf %195, %194 : vector<16x16xf32>
    %197 = tpu.reciprocal %196 {approx = true} : vector<16x16xf32> -> vector<16x16xf32>
    %cst_64 = arith.constant 1.06140542 : f32
    %198 = vector.broadcast %cst_64 : f32 to vector<16x16xf32>
    %199 = arith.mulf %198, %197 : vector<16x16xf32>
    %cst_65 = arith.constant -1.45315206 : f32
    %200 = vector.broadcast %cst_65 : f32 to vector<16x16xf32>
    %201 = arith.addf %199, %200 : vector<16x16xf32>
    %202 = arith.mulf %201, %197 : vector<16x16xf32>
    %cst_66 = arith.constant 1.42141378 : f32
    %203 = vector.broadcast %cst_66 : f32 to vector<16x16xf32>
    %204 = arith.addf %202, %203 : vector<16x16xf32>
    %205 = arith.mulf %204, %197 : vector<16x16xf32>
    %cst_67 = arith.constant -0.284496725 : f32
    %206 = vector.broadcast %cst_67 : f32 to vector<16x16xf32>
    %207 = arith.addf %205, %206 : vector<16x16xf32>
    %208 = arith.mulf %207, %197 : vector<16x16xf32>
    %cst_68 = arith.constant 0.254829586 : f32
    %209 = vector.broadcast %cst_68 : f32 to vector<16x16xf32>
    %210 = arith.addf %208, %209 : vector<16x16xf32>
    %211 = arith.mulf %210, %197 : vector<16x16xf32>
    %cst_69 = arith.constant 0.000000e+00 : f32
    %212 = vector.broadcast %cst_69 : f32 to vector<16x16xf32>
    %213 = arith.subf %212, %192 : vector<16x16xf32>
    %214 = arith.mulf %213, %192 : vector<16x16xf32>
    %215 = math.exp %214 : vector<16x16xf32>
    %216 = arith.mulf %211, %215 : vector<16x16xf32>
    %cst_70 = arith.constant 1.000000e+00 : f32
    %217 = vector.broadcast %cst_70 : f32 to vector<16x16xf32>
    %218 = arith.subf %217, %216 : vector<16x16xf32>
    %219 = arith.mulf %191, %218 : vector<16x16xf32>
    %cst_71 = arith.constant 1.000000e+00 : f32
    %220 = vector.broadcast %cst_71 : f32 to vector<16x16xf32>
    %221 = arith.addf %220, %219 : vector<16x16xf32>
    %222 = arith.mulf %184, %221 : vector<16x16xf32>
    %c968 = arith.constant 968 : index
    %c0_72 = arith.constant 0 : index
    %223 = vector.load %arg2[%c968, %c0_72] : memref<1880x128xf32, #tpu.memory_space<vmem>>, vector<16x16xf32>
    %cst_73 = arith.constant dense<0.000000e+00> : vector<16x16xf32>
    %224 = tpu.matmul %222, %223, %cst_73 {dimension_numbers = #tpu.dot_dimension_numbers<[1], [0], [0], [1], [0, 0, 1, 1], [], []>} : vector<16x16xf32>, vector<16x16xf32>, vector<16x16xf32> -> vector<16x16xf32>
    %225 = arith.addf %153, %224 : vector<16x16xf32>
    %c984 = arith.constant 984 : index
    %c0_74 = arith.constant 0 : index
    %226 = vector.load %arg2[%c984, %c0_74] : memref<1880x128xf32, #tpu.memory_space<vmem>>, vector<1x16xf32>
    %227 = vector.broadcast %226 : vector<1x16xf32> to vector<16x16xf32>
    %228 = arith.addf %225, %227 : vector<16x16xf32>
    %c992 = arith.constant 992 : index
    %c0_75 = arith.constant 0 : index
    %229 = vector.load %arg2[%c992, %c0_75] : memref<1880x128xf32, #tpu.memory_space<vmem>>, vector<32x16xf32>
    %c1024 = arith.constant 1024 : index
    %c0_76 = arith.constant 0 : index
    %230 = vector.load %arg2[%c1024, %c0_76] : memref<1880x128xf32, #tpu.memory_space<vmem>>, vector<64x32xf32>
    %cst_77 = arith.constant 0.000000e+00 : f32
    %231 = vector.broadcast %cst_77 : f32 to vector<4x32xf32>
    %c1088 = arith.constant 1088 : index
    %c0_78 = arith.constant 0 : index
    %232 = vector.load %arg2[%c1088, %c0_78] : memref<1880x128xf32, #tpu.memory_space<vmem>>, vector<1x32xf32>
    %233 = vector.broadcast %232 : vector<1x32xf32> to vector<4x32xf32>
    %234 = arith.addf %231, %233 : vector<4x32xf32>
    %235 = vector.extract_strided_slice %229 {offsets = [0, 0], sizes = [4, 16], strides = [1, 1]} : vector<32x16xf32> to vector<4x16xf32>
    %cst_79 = arith.constant dense<0.000000e+00> : vector<4x16xf32>
    %236 = tpu.matmul %235, %228, %cst_79 {dimension_numbers = #tpu.dot_dimension_numbers<[1], [0], [0], [1], [0, 0, 1, 1], [], []>} : vector<4x16xf32>, vector<16x16xf32>, vector<4x16xf32> -> vector<4x16xf32>
    %237 = vector.extract_strided_slice %230 {offsets = [0, 0], sizes = [16, 32], strides = [1, 1]} : vector<64x32xf32> to vector<16x32xf32>
    %cst_80 = arith.constant dense<0.000000e+00> : vector<4x32xf32>
    %238 = tpu.matmul %236, %237, %cst_80 {dimension_numbers = #tpu.dot_dimension_numbers<[1], [0], [0], [1], [0, 0, 1, 1], [], []>} : vector<4x16xf32>, vector<16x32xf32>, vector<4x32xf32> -> vector<4x32xf32>
    %239 = arith.addf %234, %238 : vector<4x32xf32>
    %240 = vector.extract_strided_slice %229 {offsets = [8, 0], sizes = [4, 16], strides = [1, 1]} : vector<32x16xf32> to vector<4x16xf32>
    %cst_81 = arith.constant dense<0.000000e+00> : vector<4x16xf32>
    %241 = tpu.matmul %240, %228, %cst_81 {dimension_numbers = #tpu.dot_dimension_numbers<[1], [0], [0], [1], [0, 0, 1, 1], [], []>} : vector<4x16xf32>, vector<16x16xf32>, vector<4x16xf32> -> vector<4x16xf32>
    %242 = vector.extract_strided_slice %230 {offsets = [16, 0], sizes = [16, 32], strides = [1, 1]} : vector<64x32xf32> to vector<16x32xf32>
    %cst_82 = arith.constant dense<0.000000e+00> : vector<4x32xf32>
    %243 = tpu.matmul %241, %242, %cst_82 {dimension_numbers = #tpu.dot_dimension_numbers<[1], [0], [0], [1], [0, 0, 1, 1], [], []>} : vector<4x16xf32>, vector<16x32xf32>, vector<4x32xf32> -> vector<4x32xf32>
    %244 = arith.addf %239, %243 : vector<4x32xf32>
    %245 = vector.extract_strided_slice %229 {offsets = [16, 0], sizes = [4, 16], strides = [1, 1]} : vector<32x16xf32> to vector<4x16xf32>
    %cst_83 = arith.constant dense<0.000000e+00> : vector<4x16xf32>
    %246 = tpu.matmul %245, %228, %cst_83 {dimension_numbers = #tpu.dot_dimension_numbers<[1], [0], [0], [1], [0, 0, 1, 1], [], []>} : vector<4x16xf32>, vector<16x16xf32>, vector<4x16xf32> -> vector<4x16xf32>
    %247 = vector.extract_strided_slice %230 {offsets = [32, 0], sizes = [16, 32], strides = [1, 1]} : vector<64x32xf32> to vector<16x32xf32>
    %cst_84 = arith.constant dense<0.000000e+00> : vector<4x32xf32>
    %248 = tpu.matmul %246, %247, %cst_84 {dimension_numbers = #tpu.dot_dimension_numbers<[1], [0], [0], [1], [0, 0, 1, 1], [], []>} : vector<4x16xf32>, vector<16x32xf32>, vector<4x32xf32> -> vector<4x32xf32>
    %249 = arith.addf %244, %248 : vector<4x32xf32>
    %250 = vector.extract_strided_slice %229 {offsets = [24, 0], sizes = [4, 16], strides = [1, 1]} : vector<32x16xf32> to vector<4x16xf32>
    %cst_85 = arith.constant dense<0.000000e+00> : vector<4x16xf32>
    %251 = tpu.matmul %250, %228, %cst_85 {dimension_numbers = #tpu.dot_dimension_numbers<[1], [0], [0], [1], [0, 0, 1, 1], [], []>} : vector<4x16xf32>, vector<16x16xf32>, vector<4x16xf32> -> vector<4x16xf32>
    %252 = vector.extract_strided_slice %230 {offsets = [48, 0], sizes = [16, 32], strides = [1, 1]} : vector<64x32xf32> to vector<16x32xf32>
    %cst_86 = arith.constant dense<0.000000e+00> : vector<4x32xf32>
    %253 = tpu.matmul %251, %252, %cst_86 {dimension_numbers = #tpu.dot_dimension_numbers<[1], [0], [0], [1], [0, 0, 1, 1], [], []>} : vector<4x16xf32>, vector<16x32xf32>, vector<4x32xf32> -> vector<4x32xf32>
    %254 = arith.addf %249, %253 : vector<4x32xf32>
    %c1096 = arith.constant 1096 : index
    %c0_87 = arith.constant 0 : index
    %255 = vector.load %arg2[%c1096, %c0_87] : memref<1880x128xf32, #tpu.memory_space<vmem>>, vector<1x32xf32>
    %c1104 = arith.constant 1104 : index
    %c0_88 = arith.constant 0 : index
    %256 = vector.load %arg2[%c1104, %c0_88] : memref<1880x128xf32, #tpu.memory_space<vmem>>, vector<1x32xf32>
    %cst_89 = arith.constant dense<0.000000e+00> : vector<4xf32>
    %257 = vector.multi_reduction <add>, %254, %cst_89 [1] : vector<4x32xf32> to vector<4xf32>
    %258 = vector.shape_cast %257 : vector<4xf32> to vector<4x1xf32>
    %cst_90 = arith.constant 3.200000e+01 : f32
    %259 = vector.broadcast %cst_90 : f32 to vector<4x1xf32>
    %260 = arith.divf %258, %259 : vector<4x1xf32>
    %261 = vector.broadcast %260 : vector<4x1xf32> to vector<4x32xf32>
    %262 = arith.subf %254, %261 : vector<4x32xf32>
    %263 = arith.mulf %262, %262 : vector<4x32xf32>
    %cst_91 = arith.constant dense<0.000000e+00> : vector<4xf32>
    %264 = vector.multi_reduction <add>, %263, %cst_91 [1] : vector<4x32xf32> to vector<4xf32>
    %265 = vector.shape_cast %264 : vector<4xf32> to vector<4x1xf32>
    %cst_92 = arith.constant 3.200000e+01 : f32
    %266 = vector.broadcast %cst_92 : f32 to vector<4x1xf32>
    %267 = arith.divf %265, %266 : vector<4x1xf32>
    %268 = vector.broadcast %260 : vector<4x1xf32> to vector<4x32xf32>
    %269 = arith.subf %254, %268 : vector<4x32xf32>
    %cst_93 = arith.constant 9.99999974E-6 : f32
    %270 = vector.broadcast %cst_93 : f32 to vector<4x1xf32>
    %271 = arith.addf %267, %270 : vector<4x1xf32>
    %272 = math.rsqrt %271 : vector<4x1xf32>
    %273 = vector.broadcast %272 : vector<4x1xf32> to vector<4x32xf32>
    %274 = arith.mulf %269, %273 : vector<4x32xf32>
    %275 = vector.broadcast %255 : vector<1x32xf32> to vector<4x32xf32>
    %276 = arith.mulf %274, %275 : vector<4x32xf32>
    %277 = vector.broadcast %256 : vector<1x32xf32> to vector<4x32xf32>
    %278 = arith.addf %276, %277 : vector<4x32xf32>
    %c1120 = arith.constant 1120 : index
    %c0_94 = arith.constant 0 : index
    %279 = vector.load %arg2[%c1120, %c0_94] : memref<1880x128xf32, #tpu.memory_space<vmem>>, vector<5x4xf32>
    %cst_95 = arith.constant dense<0.000000e+00> : vector<5x32xf32>
    %280 = tpu.matmul %279, %278, %cst_95 {dimension_numbers = #tpu.dot_dimension_numbers<[1], [0], [0], [1], [0, 0, 1, 1], [], []>} : vector<5x4xf32>, vector<4x32xf32>, vector<5x32xf32> -> vector<5x32xf32>
    %c1128 = arith.constant 1128 : index
    %c0_96 = arith.constant 0 : index
    %281 = vector.load %arg2[%c1128, %c0_96] : memref<1880x128xf32, #tpu.memory_space<vmem>>, vector<5x1xf32>
    %c1112 = arith.constant 1112 : index
    %c0_97 = arith.constant 0 : index
    %282 = vector.load %arg2[%c1112, %c0_97] : memref<1880x128xf32, #tpu.memory_space<vmem>>, vector<1x32xf32>
    %cst_98 = arith.constant dense<0.000000e+00> : vector<5x32xf32>
    %283 = tpu.matmul %281, %282, %cst_98 {dimension_numbers = #tpu.dot_dimension_numbers<[1], [0], [0], [1], [0, 0, 1, 1], [], []>} : vector<5x1xf32>, vector<1x32xf32>, vector<5x32xf32> -> vector<5x32xf32>
    %284 = arith.addf %280, %283 : vector<5x32xf32>
    %c1136 = arith.constant 1136 : index
    %c0_99 = arith.constant 0 : index
    %285 = vector.load %arg2[%c1136, %c0_99] : memref<1880x128xf32, #tpu.memory_space<vmem>>, vector<1x32xf32>
    %c1144 = arith.constant 1144 : index
    %c0_100 = arith.constant 0 : index
    %286 = vector.load %arg2[%c1144, %c0_100] : memref<1880x128xf32, #tpu.memory_space<vmem>>, vector<1x32xf32>
    %cst_101 = arith.constant dense<0.000000e+00> : vector<5xf32>
    %287 = vector.multi_reduction <add>, %284, %cst_101 [1] : vector<5x32xf32> to vector<5xf32>
    %288 = vector.shape_cast %287 : vector<5xf32> to vector<5x1xf32>
    %cst_102 = arith.constant 3.200000e+01 : f32
    %289 = vector.broadcast %cst_102 : f32 to vector<5x1xf32>
    %290 = arith.divf %288, %289 : vector<5x1xf32>
    %291 = vector.broadcast %290 : vector<5x1xf32> to vector<5x32xf32>
    %292 = arith.subf %284, %291 : vector<5x32xf32>
    %293 = arith.mulf %292, %292 : vector<5x32xf32>
    %cst_103 = arith.constant dense<0.000000e+00> : vector<5xf32>
    %294 = vector.multi_reduction <add>, %293, %cst_103 [1] : vector<5x32xf32> to vector<5xf32>
    %295 = vector.shape_cast %294 : vector<5xf32> to vector<5x1xf32>
    %cst_104 = arith.constant 3.200000e+01 : f32
    %296 = vector.broadcast %cst_104 : f32 to vector<5x1xf32>
    %297 = arith.divf %295, %296 : vector<5x1xf32>
    %298 = vector.broadcast %290 : vector<5x1xf32> to vector<5x32xf32>
    %299 = arith.subf %284, %298 : vector<5x32xf32>
    %cst_105 = arith.constant 9.99999974E-6 : f32
    %300 = vector.broadcast %cst_105 : f32 to vector<5x1xf32>
    %301 = arith.addf %297, %300 : vector<5x1xf32>
    %302 = math.rsqrt %301 : vector<5x1xf32>
    %303 = vector.broadcast %302 : vector<5x1xf32> to vector<5x32xf32>
    %304 = arith.mulf %299, %303 : vector<5x32xf32>
    %305 = vector.broadcast %285 : vector<1x32xf32> to vector<5x32xf32>
    %306 = arith.mulf %304, %305 : vector<5x32xf32>
    %307 = vector.broadcast %286 : vector<1x32xf32> to vector<5x32xf32>
    %308 = arith.addf %306, %307 : vector<5x32xf32>
    %309 = vector.extract_strided_slice %308 {offsets = [0, 0], sizes = [4, 32], strides = [1, 1]} : vector<5x32xf32> to vector<4x32xf32>
    %c1152 = arith.constant 1152 : index
    %c0_106 = arith.constant 0 : index
    %310 = vector.load %arg2[%c1152, %c0_106] : memref<1880x128xf32, #tpu.memory_space<vmem>>, vector<72x4xf32>
    %cst_107 = arith.constant dense<0.000000e+00> : vector<72x32xf32>
    %311 = tpu.matmul %310, %309, %cst_107 {dimension_numbers = #tpu.dot_dimension_numbers<[1], [0], [0], [1], [0, 0, 1, 1], [], []>} : vector<72x4xf32>, vector<4x32xf32>, vector<72x32xf32> -> vector<72x32xf32>
    %c1224 = arith.constant 1224 : index
    %c0_108 = arith.constant 0 : index
    %312 = vector.load %arg2[%c1224, %c0_108] : memref<1880x128xf32, #tpu.memory_space<vmem>>, vector<72x32xf32>
    %313 = arith.mulf %311, %312 : vector<72x32xf32>
    %314 = vector.extract_strided_slice %313 {offsets = [0, 0], sizes = [4, 32], strides = [1, 1]} : vector<72x32xf32> to vector<4x32xf32>
    %315 = vector.extract_strided_slice %313 {offsets = [8, 0], sizes = [4, 32], strides = [1, 1]} : vector<72x32xf32> to vector<4x32xf32>
    %316 = arith.addf %314, %315 : vector<4x32xf32>
    %317 = vector.extract_strided_slice %313 {offsets = [16, 0], sizes = [4, 32], strides = [1, 1]} : vector<72x32xf32> to vector<4x32xf32>
    %318 = arith.addf %316, %317 : vector<4x32xf32>
    %319 = vector.extract_strided_slice %313 {offsets = [24, 0], sizes = [4, 32], strides = [1, 1]} : vector<72x32xf32> to vector<4x32xf32>
    %320 = arith.addf %318, %319 : vector<4x32xf32>
    %321 = vector.extract_strided_slice %313 {offsets = [32, 0], sizes = [4, 32], strides = [1, 1]} : vector<72x32xf32> to vector<4x32xf32>
    %322 = arith.addf %320, %321 : vector<4x32xf32>
    %323 = vector.extract_strided_slice %313 {offsets = [40, 0], sizes = [4, 32], strides = [1, 1]} : vector<72x32xf32> to vector<4x32xf32>
    %324 = arith.addf %322, %323 : vector<4x32xf32>
    %325 = vector.extract_strided_slice %313 {offsets = [48, 0], sizes = [4, 32], strides = [1, 1]} : vector<72x32xf32> to vector<4x32xf32>
    %326 = arith.addf %324, %325 : vector<4x32xf32>
    %327 = vector.extract_strided_slice %313 {offsets = [56, 0], sizes = [4, 32], strides = [1, 1]} : vector<72x32xf32> to vector<4x32xf32>
    %328 = arith.addf %326, %327 : vector<4x32xf32>
    %329 = vector.extract_strided_slice %313 {offsets = [64, 0], sizes = [4, 32], strides = [1, 1]} : vector<72x32xf32> to vector<4x32xf32>
    %330 = arith.addf %328, %329 : vector<4x32xf32>
    %c1296 = arith.constant 1296 : index
    %c0_109 = arith.constant 0 : index
    %331 = vector.load %arg2[%c1296, %c0_109] : memref<1880x128xf32, #tpu.memory_space<vmem>>, vector<32x32xf32>
    %cst_110 = arith.constant dense<0.000000e+00> : vector<4x32xf32>
    %332 = tpu.matmul %330, %331, %cst_110 {dimension_numbers = #tpu.dot_dimension_numbers<[1], [0], [0], [1], [0, 0, 1, 1], [], []>} : vector<4x32xf32>, vector<32x32xf32>, vector<4x32xf32> -> vector<4x32xf32>
    %c1328 = arith.constant 1328 : index
    %c0_111 = arith.constant 0 : index
    %333 = vector.load %arg2[%c1328, %c0_111] : memref<1880x128xf32, #tpu.memory_space<vmem>>, vector<1x32xf32>
    %334 = vector.broadcast %333 : vector<1x32xf32> to vector<4x32xf32>
    %335 = arith.addf %332, %334 : vector<4x32xf32>
    %c1336 = arith.constant 1336 : index
    %c0_112 = arith.constant 0 : index
    %336 = vector.load %arg2[%c1336, %c0_112] : memref<1880x128xf32, #tpu.memory_space<vmem>>, vector<72x32xf32>
    %337 = arith.mulf %311, %336 : vector<72x32xf32>
    %338 = vector.extract_strided_slice %337 {offsets = [0, 0], sizes = [4, 32], strides = [1, 1]} : vector<72x32xf32> to vector<4x32xf32>
    %339 = vector.extract_strided_slice %337 {offsets = [8, 0], sizes = [4, 32], strides = [1, 1]} : vector<72x32xf32> to vector<4x32xf32>
    %340 = arith.addf %338, %339 : vector<4x32xf32>
    %341 = vector.extract_strided_slice %337 {offsets = [16, 0], sizes = [4, 32], strides = [1, 1]} : vector<72x32xf32> to vector<4x32xf32>
    %342 = arith.addf %340, %341 : vector<4x32xf32>
    %343 = vector.extract_strided_slice %337 {offsets = [24, 0], sizes = [4, 32], strides = [1, 1]} : vector<72x32xf32> to vector<4x32xf32>
    %344 = arith.addf %342, %343 : vector<4x32xf32>
    %345 = vector.extract_strided_slice %337 {offsets = [32, 0], sizes = [4, 32], strides = [1, 1]} : vector<72x32xf32> to vector<4x32xf32>
    %346 = arith.addf %344, %345 : vector<4x32xf32>
    %347 = vector.extract_strided_slice %337 {offsets = [40, 0], sizes = [4, 32], strides = [1, 1]} : vector<72x32xf32> to vector<4x32xf32>
    %348 = arith.addf %346, %347 : vector<4x32xf32>
    %349 = vector.extract_strided_slice %337 {offsets = [48, 0], sizes = [4, 32], strides = [1, 1]} : vector<72x32xf32> to vector<4x32xf32>
    %350 = arith.addf %348, %349 : vector<4x32xf32>
    %351 = vector.extract_strided_slice %337 {offsets = [56, 0], sizes = [4, 32], strides = [1, 1]} : vector<72x32xf32> to vector<4x32xf32>
    %352 = arith.addf %350, %351 : vector<4x32xf32>
    %353 = vector.extract_strided_slice %337 {offsets = [64, 0], sizes = [4, 32], strides = [1, 1]} : vector<72x32xf32> to vector<4x32xf32>
    %354 = arith.addf %352, %353 : vector<4x32xf32>
    %c1408 = arith.constant 1408 : index
    %c0_113 = arith.constant 0 : index
    %355 = vector.load %arg2[%c1408, %c0_113] : memref<1880x128xf32, #tpu.memory_space<vmem>>, vector<32x32xf32>
    %cst_114 = arith.constant dense<0.000000e+00> : vector<4x32xf32>
    %356 = tpu.matmul %354, %355, %cst_114 {dimension_numbers = #tpu.dot_dimension_numbers<[1], [0], [0], [1], [0, 0, 1, 1], [], []>} : vector<4x32xf32>, vector<32x32xf32>, vector<4x32xf32> -> vector<4x32xf32>
    %c1440 = arith.constant 1440 : index
    %c0_115 = arith.constant 0 : index
    %357 = vector.load %arg2[%c1440, %c0_115] : memref<1880x128xf32, #tpu.memory_space<vmem>>, vector<1x32xf32>
    %358 = vector.broadcast %357 : vector<1x32xf32> to vector<4x32xf32>
    %359 = arith.addf %356, %358 : vector<4x32xf32>
    %c1448 = arith.constant 1448 : index
    %c0_116 = arith.constant 0 : index
    %360 = vector.load %arg2[%c1448, %c0_116] : memref<1880x128xf32, #tpu.memory_space<vmem>>, vector<72x32xf32>
    %361 = arith.mulf %311, %360 : vector<72x32xf32>
    %362 = vector.extract_strided_slice %361 {offsets = [0, 0], sizes = [4, 32], strides = [1, 1]} : vector<72x32xf32> to vector<4x32xf32>
    %363 = vector.extract_strided_slice %361 {offsets = [8, 0], sizes = [4, 32], strides = [1, 1]} : vector<72x32xf32> to vector<4x32xf32>
    %364 = arith.addf %362, %363 : vector<4x32xf32>
    %365 = vector.extract_strided_slice %361 {offsets = [16, 0], sizes = [4, 32], strides = [1, 1]} : vector<72x32xf32> to vector<4x32xf32>
    %366 = arith.addf %364, %365 : vector<4x32xf32>
    %367 = vector.extract_strided_slice %361 {offsets = [24, 0], sizes = [4, 32], strides = [1, 1]} : vector<72x32xf32> to vector<4x32xf32>
    %368 = arith.addf %366, %367 : vector<4x32xf32>
    %369 = vector.extract_strided_slice %361 {offsets = [32, 0], sizes = [4, 32], strides = [1, 1]} : vector<72x32xf32> to vector<4x32xf32>
    %370 = arith.addf %368, %369 : vector<4x32xf32>
    %371 = vector.extract_strided_slice %361 {offsets = [40, 0], sizes = [4, 32], strides = [1, 1]} : vector<72x32xf32> to vector<4x32xf32>
    %372 = arith.addf %370, %371 : vector<4x32xf32>
    %373 = vector.extract_strided_slice %361 {offsets = [48, 0], sizes = [4, 32], strides = [1, 1]} : vector<72x32xf32> to vector<4x32xf32>
    %374 = arith.addf %372, %373 : vector<4x32xf32>
    %375 = vector.extract_strided_slice %361 {offsets = [56, 0], sizes = [4, 32], strides = [1, 1]} : vector<72x32xf32> to vector<4x32xf32>
    %376 = arith.addf %374, %375 : vector<4x32xf32>
    %377 = vector.extract_strided_slice %361 {offsets = [64, 0], sizes = [4, 32], strides = [1, 1]} : vector<72x32xf32> to vector<4x32xf32>
    %378 = arith.addf %376, %377 : vector<4x32xf32>
    %c1520 = arith.constant 1520 : index
    %c0_117 = arith.constant 0 : index
    %379 = vector.load %arg2[%c1520, %c0_117] : memref<1880x128xf32, #tpu.memory_space<vmem>>, vector<32x32xf32>
    %cst_118 = arith.constant dense<0.000000e+00> : vector<4x32xf32>
    %380 = tpu.matmul %378, %379, %cst_118 {dimension_numbers = #tpu.dot_dimension_numbers<[1], [0], [0], [1], [0, 0, 1, 1], [], []>} : vector<4x32xf32>, vector<32x32xf32>, vector<4x32xf32> -> vector<4x32xf32>
    %c1552 = arith.constant 1552 : index
    %c0_119 = arith.constant 0 : index
    %381 = vector.load %arg2[%c1552, %c0_119] : memref<1880x128xf32, #tpu.memory_space<vmem>>, vector<1x32xf32>
    %382 = vector.broadcast %381 : vector<1x32xf32> to vector<4x32xf32>
    %383 = arith.addf %380, %382 : vector<4x32xf32>
    %384 = vector.extract_strided_slice %308 {offsets = [4, 0], sizes = [1, 32], strides = [1, 1]} : vector<5x32xf32> to vector<1x32xf32>
    %c1120_120 = arith.constant 1120 : index
    %c0_121 = arith.constant 0 : index
    %385 = vector.load %arg2[%c1120_120, %c0_121] : memref<1880x128xf32, #tpu.memory_space<vmem>>, vector<5x4xf32>
    %c1128_122 = arith.constant 1128 : index
    %c0_123 = arith.constant 0 : index
    %386 = vector.load %arg2[%c1128_122, %c0_123] : memref<1880x128xf32, #tpu.memory_space<vmem>>, vector<5x1xf32>
    %cst_124 = arith.constant 2.500000e-01 : f32
    %387 = vector.broadcast %cst_124 : f32 to vector<1x32xf32>
    %388 = arith.mulf %384, %387 : vector<1x32xf32>
    %cst_125 = arith.constant dense<0.000000e+00> : vector<5x32xf32>
    %389 = tpu.matmul %385, %335, %cst_125 {dimension_numbers = #tpu.dot_dimension_numbers<[1], [0], [0], [1], [0, 0, 1, 1], [], []>} : vector<5x4xf32>, vector<4x32xf32>, vector<5x32xf32> -> vector<5x32xf32>
    %cst_126 = arith.constant dense<0.000000e+00> : vector<5x32xf32>
    %390 = tpu.matmul %386, %388, %cst_126 {dimension_numbers = #tpu.dot_dimension_numbers<[1], [0], [0], [1], [0, 0, 1, 1], [], []>} : vector<5x1xf32>, vector<1x32xf32>, vector<5x32xf32> -> vector<5x32xf32>
    %391 = arith.addf %389, %390 : vector<5x32xf32>
    %cst_127 = arith.constant dense<0.000000e+00> : vector<5x32xf32>
    %392 = tpu.matmul %385, %359, %cst_127 {dimension_numbers = #tpu.dot_dimension_numbers<[1], [0], [0], [1], [0, 0, 1, 1], [], []>} : vector<5x4xf32>, vector<4x32xf32>, vector<5x32xf32> -> vector<5x32xf32>
    %cst_128 = arith.constant dense<0.000000e+00> : vector<5x32xf32>
    %393 = tpu.matmul %386, %384, %cst_128 {dimension_numbers = #tpu.dot_dimension_numbers<[1], [0], [0], [1], [0, 0, 1, 1], [], []>} : vector<5x1xf32>, vector<1x32xf32>, vector<5x32xf32> -> vector<5x32xf32>
    %394 = arith.addf %392, %393 : vector<5x32xf32>
    %cst_129 = arith.constant dense<0.000000e+00> : vector<5x32xf32>
    %395 = tpu.matmul %385, %383, %cst_129 {dimension_numbers = #tpu.dot_dimension_numbers<[1], [0], [0], [1], [0, 0, 1, 1], [], []>} : vector<5x4xf32>, vector<4x32xf32>, vector<5x32xf32> -> vector<5x32xf32>
    %cst_130 = arith.constant dense<0.000000e+00> : vector<5x32xf32>
    %396 = tpu.matmul %386, %384, %cst_130 {dimension_numbers = #tpu.dot_dimension_numbers<[1], [0], [0], [1], [0, 0, 1, 1], [], []>} : vector<5x1xf32>, vector<1x32xf32>, vector<5x32xf32> -> vector<5x32xf32>
    %397 = arith.addf %395, %396 : vector<5x32xf32>
    %c1560 = arith.constant 1560 : index
    %c0_131 = arith.constant 0 : index
    %398 = vector.load %arg2[%c1560, %c0_131] : memref<1880x128xf32, #tpu.memory_space<vmem>>, vector<40x5xf32>
    %c1600 = arith.constant 1600 : index
    %c0_132 = arith.constant 0 : index
    %399 = vector.load %arg2[%c1600, %c0_132] : memref<1880x128xf32, #tpu.memory_space<vmem>>, vector<40x32xf32>
    %cst_133 = arith.constant dense<0.000000e+00> : vector<40x32xf32>
    %400 = tpu.matmul %398, %394, %cst_133 {dimension_numbers = #tpu.dot_dimension_numbers<[1], [0], [0], [1], [0, 0, 1, 1], [], []>} : vector<40x5xf32>, vector<5x32xf32>, vector<40x32xf32> -> vector<40x32xf32>
    %401 = arith.mulf %400, %399 : vector<40x32xf32>
    %cst_134 = arith.constant dense<0.000000e+00> : vector<40x32xf32>
    %402 = tpu.matmul %398, %397, %cst_134 {dimension_numbers = #tpu.dot_dimension_numbers<[1], [0], [0], [1], [0, 0, 1, 1], [], []>} : vector<40x5xf32>, vector<5x32xf32>, vector<40x32xf32> -> vector<40x32xf32>
    %403 = arith.mulf %402, %399 : vector<40x32xf32>
    %cst_135 = arith.constant dense<0.000000e+00> : vector<5x40xf32>
    %404 = tpu.matmul %391, %401, %cst_135 {dimension_numbers = #tpu.dot_dimension_numbers<[1], [1], [0], [0], [0, 0, 1, 0], [], []>} : vector<5x32xf32>, vector<40x32xf32>, vector<5x40xf32> -> vector<5x40xf32>
    %cst_136 = arith.constant dense<0xFF800000> : vector<5xf32>
    %405 = vector.multi_reduction <maximumf>, %404, %cst_136 [1] : vector<5x40xf32> to vector<5xf32>
    %406 = vector.shape_cast %405 : vector<5xf32> to vector<5x1xf32>
    %407 = vector.broadcast %406 : vector<5x1xf32> to vector<5x40xf32>
    %408 = arith.subf %404, %407 : vector<5x40xf32>
    %409 = math.exp %408 : vector<5x40xf32>
    %c1640 = arith.constant 1640 : index
    %c0_137 = arith.constant 0 : index
    %410 = vector.load %arg2[%c1640, %c0_137] : memref<1880x128xf32, #tpu.memory_space<vmem>>, vector<40x8xf32>
    %cst_138 = arith.constant dense<0.000000e+00> : vector<5x8xf32>
    %411 = tpu.matmul %409, %410, %cst_138 {dimension_numbers = #tpu.dot_dimension_numbers<[1], [0], [0], [1], [0, 0, 1, 1], [], []>} : vector<5x40xf32>, vector<40x8xf32>, vector<5x8xf32> -> vector<5x8xf32>
    %412 = tpu.reciprocal %411 {approx = true} : vector<5x8xf32> -> vector<5x8xf32>
    %c1680 = arith.constant 1680 : index
    %c0_139 = arith.constant 0 : index
    %413 = vector.load %arg2[%c1680, %c0_139] : memref<1880x128xf32, #tpu.memory_space<vmem>>, vector<8x40xf32>
    %cst_140 = arith.constant dense<0.000000e+00> : vector<5x40xf32>
    %414 = tpu.matmul %412, %413, %cst_140 {dimension_numbers = #tpu.dot_dimension_numbers<[1], [0], [0], [1], [0, 0, 1, 1], [], []>} : vector<5x8xf32>, vector<8x40xf32>, vector<5x40xf32> -> vector<5x40xf32>
    %415 = arith.mulf %409, %414 : vector<5x40xf32>
    %cst_141 = arith.constant dense<0.000000e+00> : vector<5x32xf32>
    %416 = tpu.matmul %415, %403, %cst_141 {dimension_numbers = #tpu.dot_dimension_numbers<[1], [0], [0], [1], [0, 0, 1, 1], [], []>} : vector<5x40xf32>, vector<40x32xf32>, vector<5x32xf32> -> vector<5x32xf32>
    %c1688 = arith.constant 1688 : index
    %c0_142 = arith.constant 0 : index
    %417 = vector.load %arg2[%c1688, %c0_142] : memref<1880x128xf32, #tpu.memory_space<vmem>>, vector<32x32xf32>
    %cst_143 = arith.constant dense<0.000000e+00> : vector<5x32xf32>
    %418 = tpu.matmul %416, %417, %cst_143 {dimension_numbers = #tpu.dot_dimension_numbers<[1], [0], [0], [1], [0, 0, 1, 1], [], []>} : vector<5x32xf32>, vector<32x32xf32>, vector<5x32xf32> -> vector<5x32xf32>
    %c1720 = arith.constant 1720 : index
    %c0_144 = arith.constant 0 : index
    %419 = vector.load %arg2[%c1720, %c0_144] : memref<1880x128xf32, #tpu.memory_space<vmem>>, vector<1x32xf32>
    %420 = vector.broadcast %419 : vector<1x32xf32> to vector<5x32xf32>
    %421 = arith.addf %418, %420 : vector<5x32xf32>
    %422 = arith.addf %284, %421 : vector<5x32xf32>
    %c1728 = arith.constant 1728 : index
    %c0_145 = arith.constant 0 : index
    %423 = vector.load %arg2[%c1728, %c0_145] : memref<1880x128xf32, #tpu.memory_space<vmem>>, vector<1x32xf32>
    %c1736 = arith.constant 1736 : index
    %c0_146 = arith.constant 0 : index
    %424 = vector.load %arg2[%c1736, %c0_146] : memref<1880x128xf32, #tpu.memory_space<vmem>>, vector<1x32xf32>
    %cst_147 = arith.constant dense<0.000000e+00> : vector<5xf32>
    %425 = vector.multi_reduction <add>, %422, %cst_147 [1] : vector<5x32xf32> to vector<5xf32>
    %426 = vector.shape_cast %425 : vector<5xf32> to vector<5x1xf32>
    %cst_148 = arith.constant 3.200000e+01 : f32
    %427 = vector.broadcast %cst_148 : f32 to vector<5x1xf32>
    %428 = arith.divf %426, %427 : vector<5x1xf32>
    %429 = vector.broadcast %428 : vector<5x1xf32> to vector<5x32xf32>
    %430 = arith.subf %422, %429 : vector<5x32xf32>
    %431 = arith.mulf %430, %430 : vector<5x32xf32>
    %cst_149 = arith.constant dense<0.000000e+00> : vector<5xf32>
    %432 = vector.multi_reduction <add>, %431, %cst_149 [1] : vector<5x32xf32> to vector<5xf32>
    %433 = vector.shape_cast %432 : vector<5xf32> to vector<5x1xf32>
    %cst_150 = arith.constant 3.200000e+01 : f32
    %434 = vector.broadcast %cst_150 : f32 to vector<5x1xf32>
    %435 = arith.divf %433, %434 : vector<5x1xf32>
    %436 = vector.broadcast %428 : vector<5x1xf32> to vector<5x32xf32>
    %437 = arith.subf %422, %436 : vector<5x32xf32>
    %cst_151 = arith.constant 9.99999974E-6 : f32
    %438 = vector.broadcast %cst_151 : f32 to vector<5x1xf32>
    %439 = arith.addf %435, %438 : vector<5x1xf32>
    %440 = math.rsqrt %439 : vector<5x1xf32>
    %441 = vector.broadcast %440 : vector<5x1xf32> to vector<5x32xf32>
    %442 = arith.mulf %437, %441 : vector<5x32xf32>
    %443 = vector.broadcast %423 : vector<1x32xf32> to vector<5x32xf32>
    %444 = arith.mulf %442, %443 : vector<5x32xf32>
    %445 = vector.broadcast %424 : vector<1x32xf32> to vector<5x32xf32>
    %446 = arith.addf %444, %445 : vector<5x32xf32>
    %c1744 = arith.constant 1744 : index
    %c0_152 = arith.constant 0 : index
    %447 = vector.load %arg2[%c1744, %c0_152] : memref<1880x128xf32, #tpu.memory_space<vmem>>, vector<32x32xf32>
    %cst_153 = arith.constant dense<0.000000e+00> : vector<5x32xf32>
    %448 = tpu.matmul %446, %447, %cst_153 {dimension_numbers = #tpu.dot_dimension_numbers<[1], [0], [0], [1], [0, 0, 1, 1], [], []>} : vector<5x32xf32>, vector<32x32xf32>, vector<5x32xf32> -> vector<5x32xf32>
    %c1776 = arith.constant 1776 : index
    %c0_154 = arith.constant 0 : index
    %449 = vector.load %arg2[%c1776, %c0_154] : memref<1880x128xf32, #tpu.memory_space<vmem>>, vector<1x32xf32>
    %450 = vector.broadcast %449 : vector<1x32xf32> to vector<5x32xf32>
    %451 = arith.addf %448, %450 : vector<5x32xf32>
    %cst_155 = arith.constant 5.000000e-01 : f32
    %452 = vector.broadcast %cst_155 : f32 to vector<5x32xf32>
    %453 = arith.mulf %452, %451 : vector<5x32xf32>
    %cst_156 = arith.constant 0.707106769 : f32
    %454 = vector.broadcast %cst_156 : f32 to vector<5x32xf32>
    %455 = arith.mulf %451, %454 : vector<5x32xf32>
    %cst_157 = arith.constant 0.000000e+00 : f32
    %456 = vector.broadcast %cst_157 : f32 to vector<5x32xf32>
    %457 = arith.cmpf oge, %455, %456 : vector<5x32xf32>
    %cst_158 = arith.constant 1.000000e+00 : f32
    %cst_159 = arith.constant -1.000000e+00 : f32
    %458 = vector.broadcast %cst_158 : f32 to vector<5x32xf32>
    %459 = vector.broadcast %cst_159 : f32 to vector<5x32xf32>
    %460 = arith.select %457, %458, %459 : vector<5x32xi1>, vector<5x32xf32>
    %461 = math.absf %455 : vector<5x32xf32>
    %cst_160 = arith.constant 0.327591091 : f32
    %462 = vector.broadcast %cst_160 : f32 to vector<5x32xf32>
    %463 = arith.mulf %462, %461 : vector<5x32xf32>
    %cst_161 = arith.constant 1.000000e+00 : f32
    %464 = vector.broadcast %cst_161 : f32 to vector<5x32xf32>
    %465 = arith.addf %464, %463 : vector<5x32xf32>
    %466 = tpu.reciprocal %465 {approx = true} : vector<5x32xf32> -> vector<5x32xf32>
    %cst_162 = arith.constant 1.06140542 : f32
    %467 = vector.broadcast %cst_162 : f32 to vector<5x32xf32>
    %468 = arith.mulf %467, %466 : vector<5x32xf32>
    %cst_163 = arith.constant -1.45315206 : f32
    %469 = vector.broadcast %cst_163 : f32 to vector<5x32xf32>
    %470 = arith.addf %468, %469 : vector<5x32xf32>
    %471 = arith.mulf %470, %466 : vector<5x32xf32>
    %cst_164 = arith.constant 1.42141378 : f32
    %472 = vector.broadcast %cst_164 : f32 to vector<5x32xf32>
    %473 = arith.addf %471, %472 : vector<5x32xf32>
    %474 = arith.mulf %473, %466 : vector<5x32xf32>
    %cst_165 = arith.constant -0.284496725 : f32
    %475 = vector.broadcast %cst_165 : f32 to vector<5x32xf32>
    %476 = arith.addf %474, %475 : vector<5x32xf32>
    %477 = arith.mulf %476, %466 : vector<5x32xf32>
    %cst_166 = arith.constant 0.254829586 : f32
    %478 = vector.broadcast %cst_166 : f32 to vector<5x32xf32>
    %479 = arith.addf %477, %478 : vector<5x32xf32>
    %480 = arith.mulf %479, %466 : vector<5x32xf32>
    %cst_167 = arith.constant 0.000000e+00 : f32
    %481 = vector.broadcast %cst_167 : f32 to vector<5x32xf32>
    %482 = arith.subf %481, %461 : vector<5x32xf32>
    %483 = arith.mulf %482, %461 : vector<5x32xf32>
    %484 = math.exp %483 : vector<5x32xf32>
    %485 = arith.mulf %480, %484 : vector<5x32xf32>
    %cst_168 = arith.constant 1.000000e+00 : f32
    %486 = vector.broadcast %cst_168 : f32 to vector<5x32xf32>
    %487 = arith.subf %486, %485 : vector<5x32xf32>
    %488 = arith.mulf %460, %487 : vector<5x32xf32>
    %cst_169 = arith.constant 1.000000e+00 : f32
    %489 = vector.broadcast %cst_169 : f32 to vector<5x32xf32>
    %490 = arith.addf %489, %488 : vector<5x32xf32>
    %491 = arith.mulf %453, %490 : vector<5x32xf32>
    %c1784 = arith.constant 1784 : index
    %c0_170 = arith.constant 0 : index
    %492 = vector.load %arg2[%c1784, %c0_170] : memref<1880x128xf32, #tpu.memory_space<vmem>>, vector<32x32xf32>
    %cst_171 = arith.constant dense<0.000000e+00> : vector<5x32xf32>
    %493 = tpu.matmul %491, %492, %cst_171 {dimension_numbers = #tpu.dot_dimension_numbers<[1], [0], [0], [1], [0, 0, 1, 1], [], []>} : vector<5x32xf32>, vector<32x32xf32>, vector<5x32xf32> -> vector<5x32xf32>
    %494 = arith.addf %422, %493 : vector<5x32xf32>
    %c1816 = arith.constant 1816 : index
    %c0_172 = arith.constant 0 : index
    %495 = vector.load %arg2[%c1816, %c0_172] : memref<1880x128xf32, #tpu.memory_space<vmem>>, vector<1x32xf32>
    %496 = vector.broadcast %495 : vector<1x32xf32> to vector<5x32xf32>
    %497 = arith.addf %494, %496 : vector<5x32xf32>
    %498 = vector.extract_strided_slice %497 {offsets = [4, 0], sizes = [1, 32], strides = [1, 1]} : vector<5x32xf32> to vector<1x32xf32>
    %cst_173 = arith.constant 5.000000e-01 : f32
    %499 = vector.broadcast %cst_173 : f32 to vector<1x32xf32>
    %500 = arith.mulf %499, %498 : vector<1x32xf32>
    %cst_174 = arith.constant 0.707106769 : f32
    %501 = vector.broadcast %cst_174 : f32 to vector<1x32xf32>
    %502 = arith.mulf %498, %501 : vector<1x32xf32>
    %cst_175 = arith.constant 0.000000e+00 : f32
    %503 = vector.broadcast %cst_175 : f32 to vector<1x32xf32>
    %504 = arith.cmpf oge, %502, %503 : vector<1x32xf32>
    %cst_176 = arith.constant 1.000000e+00 : f32
    %cst_177 = arith.constant -1.000000e+00 : f32
    %505 = vector.broadcast %cst_176 : f32 to vector<1x32xf32>
    %506 = vector.broadcast %cst_177 : f32 to vector<1x32xf32>
    %507 = arith.select %504, %505, %506 : vector<1x32xi1>, vector<1x32xf32>
    %508 = math.absf %502 : vector<1x32xf32>
    %cst_178 = arith.constant 0.327591091 : f32
    %509 = vector.broadcast %cst_178 : f32 to vector<1x32xf32>
    %510 = arith.mulf %509, %508 : vector<1x32xf32>
    %cst_179 = arith.constant 1.000000e+00 : f32
    %511 = vector.broadcast %cst_179 : f32 to vector<1x32xf32>
    %512 = arith.addf %511, %510 : vector<1x32xf32>
    %513 = tpu.reciprocal %512 {approx = true} : vector<1x32xf32> -> vector<1x32xf32>
    %cst_180 = arith.constant 1.06140542 : f32
    %514 = vector.broadcast %cst_180 : f32 to vector<1x32xf32>
    %515 = arith.mulf %514, %513 : vector<1x32xf32>
    %cst_181 = arith.constant -1.45315206 : f32
    %516 = vector.broadcast %cst_181 : f32 to vector<1x32xf32>
    %517 = arith.addf %515, %516 : vector<1x32xf32>
    %518 = arith.mulf %517, %513 : vector<1x32xf32>
    %cst_182 = arith.constant 1.42141378 : f32
    %519 = vector.broadcast %cst_182 : f32 to vector<1x32xf32>
    %520 = arith.addf %518, %519 : vector<1x32xf32>
    %521 = arith.mulf %520, %513 : vector<1x32xf32>
    %cst_183 = arith.constant -0.284496725 : f32
    %522 = vector.broadcast %cst_183 : f32 to vector<1x32xf32>
    %523 = arith.addf %521, %522 : vector<1x32xf32>
    %524 = arith.mulf %523, %513 : vector<1x32xf32>
    %cst_184 = arith.constant 0.254829586 : f32
    %525 = vector.broadcast %cst_184 : f32 to vector<1x32xf32>
    %526 = arith.addf %524, %525 : vector<1x32xf32>
    %527 = arith.mulf %526, %513 : vector<1x32xf32>
    %cst_185 = arith.constant 0.000000e+00 : f32
    %528 = vector.broadcast %cst_185 : f32 to vector<1x32xf32>
    %529 = arith.subf %528, %508 : vector<1x32xf32>
    %530 = arith.mulf %529, %508 : vector<1x32xf32>
    %531 = math.exp %530 : vector<1x32xf32>
    %532 = arith.mulf %527, %531 : vector<1x32xf32>
    %cst_186 = arith.constant 1.000000e+00 : f32
    %533 = vector.broadcast %cst_186 : f32 to vector<1x32xf32>
    %534 = arith.subf %533, %532 : vector<1x32xf32>
    %535 = arith.mulf %507, %534 : vector<1x32xf32>
    %cst_187 = arith.constant 1.000000e+00 : f32
    %536 = vector.broadcast %cst_187 : f32 to vector<1x32xf32>
    %537 = arith.addf %536, %535 : vector<1x32xf32>
    %538 = arith.mulf %500, %537 : vector<1x32xf32>
    %c1824 = arith.constant 1824 : index
    %c0_188 = arith.constant 0 : index
    %539 = vector.load %arg2[%c1824, %c0_188] : memref<1880x128xf32, #tpu.memory_space<vmem>>, vector<1x32xf32>
    %c1832 = arith.constant 1832 : index
    %c0_189 = arith.constant 0 : index
    %540 = vector.load %arg2[%c1832, %c0_189] : memref<1880x128xf32, #tpu.memory_space<vmem>>, vector<1x32xf32>
    %cst_190 = arith.constant dense<0.000000e+00> : vector<1xf32>
    %541 = vector.multi_reduction <add>, %538, %cst_190 [1] : vector<1x32xf32> to vector<1xf32>
    %542 = vector.shape_cast %541 : vector<1xf32> to vector<1x1xf32>
    %cst_191 = arith.constant 3.200000e+01 : f32
    %543 = vector.broadcast %cst_191 : f32 to vector<1x1xf32>
    %544 = arith.divf %542, %543 : vector<1x1xf32>
    %545 = vector.broadcast %544 : vector<1x1xf32> to vector<1x32xf32>
    %546 = arith.subf %538, %545 : vector<1x32xf32>
    %547 = arith.mulf %546, %546 : vector<1x32xf32>
    %cst_192 = arith.constant dense<0.000000e+00> : vector<1xf32>
    %548 = vector.multi_reduction <add>, %547, %cst_192 [1] : vector<1x32xf32> to vector<1xf32>
    %549 = vector.shape_cast %548 : vector<1xf32> to vector<1x1xf32>
    %cst_193 = arith.constant 3.200000e+01 : f32
    %550 = vector.broadcast %cst_193 : f32 to vector<1x1xf32>
    %551 = arith.divf %549, %550 : vector<1x1xf32>
    %552 = vector.broadcast %544 : vector<1x1xf32> to vector<1x32xf32>
    %553 = arith.subf %538, %552 : vector<1x32xf32>
    %cst_194 = arith.constant 9.99999974E-6 : f32
    %554 = vector.broadcast %cst_194 : f32 to vector<1x1xf32>
    %555 = arith.addf %551, %554 : vector<1x1xf32>
    %556 = math.rsqrt %555 : vector<1x1xf32>
    %557 = vector.broadcast %556 : vector<1x1xf32> to vector<1x32xf32>
    %558 = arith.mulf %553, %557 : vector<1x32xf32>
    %559 = arith.mulf %558, %539 : vector<1x32xf32>
    %560 = arith.addf %559, %540 : vector<1x32xf32>
    %c1840 = arith.constant 1840 : index
    %c0_195 = arith.constant 0 : index
    %561 = vector.load %arg2[%c1840, %c0_195] : memref<1880x128xf32, #tpu.memory_space<vmem>>, vector<32x128xf32>
    %cst_196 = arith.constant dense<0.000000e+00> : vector<1x128xf32>
    %562 = tpu.matmul %560, %561, %cst_196 {dimension_numbers = #tpu.dot_dimension_numbers<[1], [0], [0], [1], [0, 0, 1, 1], [], []>} : vector<1x32xf32>, vector<32x128xf32>, vector<1x128xf32> -> vector<1x128xf32>
    %c1872 = arith.constant 1872 : index
    %c0_197 = arith.constant 0 : index
    %563 = vector.load %arg2[%c1872, %c0_197] : memref<1880x128xf32, #tpu.memory_space<vmem>>, vector<1x128xf32>
    %564 = arith.addf %562, %563 : vector<1x128xf32>
    %c0_198 = arith.constant 0 : index
    %c0_199 = arith.constant 0 : index
    %c0_200 = arith.constant 0 : index
    %565 = vector.load %arg3[%c0_198, %c0_199, %c0_200] : memref<1x1x128xf32, #tpu.memory_space<vmem>>, vector<1x1x128xf32>
    %566 = vector.shape_cast %565 : vector<1x1x128xf32> to vector<1x128xf32>
    %567 = vector.shape_cast %564 : vector<1x128xf32> to vector<1x1x128xf32>
    tpu.vector_store %arg3[%c0_198, %c0_199, %c0_200], %567 {strides = array<i32>} : memref<1x1x128xf32, #tpu.memory_space<vmem>>, vector<1x1x128xf32>,
    return
  }
  func.func @transform_0(%arg0: i32) -> (i32, i32, i32) {
    %c0_i32 = arith.constant 0 : i32
    %c0_i32_0 = arith.constant 0 : i32
    %c0_i32_1 = arith.constant 0 : i32
    return %arg0, %c0_i32, %c0_i32_0 : i32, i32, i32
  }
  func.func @transform_1(%arg0: i32) -> (i32, i32) {
    %c0_i32 = arith.constant 0 : i32
    %c0_i32_0 = arith.constant 0 : i32
    %c0_i32_1 = arith.constant 0 : i32
    return %c0_i32, %c0_i32_0 : i32, i32
  }
  func.func @transform_2(%arg0: i32) -> (i32, i32, i32) {
    %c0_i32 = arith.constant 0 : i32
    %c0_i32_0 = arith.constant 0 : i32
    %c0_i32_1 = arith.constant 0 : i32
    return %arg0, %c0_i32, %c0_i32_0 : i32, i32, i32
  }
}

</mosaic_0001>

<bundles_post_ra>
// kernel: forward.1
= control target key start
LH: loop header
LB: loop body
LE: loop exit
PB: predicated region body
PF: predicated region fallthrough
CT: control target
= control target key end

     0   :  { %7 = vsyncpa [#allocation3], 0  ;;  %s6321_s0 = inlined_call_operand.vmem [shape: f32[2,16,10], index: 0, kind: input, shape index: {}]   ;;  %s6322_s1 = inlined_call_operand.hbm [shape: f32[1880,128], index: 1, kind: input, shape index: {}]   ;;  %s6323_s2 = inlined_call_operand.hbm [shape: f32[2,1,128], index: 2, kind: output, shape index: {}]  }
   0x1   :  { %8 = vsyncpa [#allocation4], 0 }
   0x2   :  { %10 = vsyncpa [#allocation4 + $0x1], 0  ;;  %s5751_s9 = smov 0   ;;  %s5753_s10 = smov 0  }
   0x3   :  { %s5755_s11 = smov 0   ;;  %s5757_s12 = smov 0  }
   0x4 LB: > { %s5772_s13 = sadd.s32 4294967295, %s5727_s12   ;;  %s4701_s14 = sadd.s32 4294967294, %s5727_s12   ;;  %s5727_s12 = sphi %s5757_s12, %s6331_s12   ;;  %s5723_s11 = sphi %s5755_s11, %s6330_s11   ;;  %s5719_s10 = sphi %s5753_s10, %s6329_s10   ;;  %s5715_s9 = sphi %s5751_s9, %s6328_s9  }
   0x5   : > { %s5776_s15 = sadd.s32 1, %s5727_s12   ;;  %s70_s16 = sadd.s32 1, %s5723_s11 }
   0x6   : > { %s67_s17 = ssub.s32 %s5727_s12, %s5776_s15  ;;  %p80_p0 = scmp.ne.s32.totalorder %s5723_s11, %s5719_s10 }
   0x7   : > { %p68_p1 = scmp.eq.s32.totalorder %s67_s17, 0  ;;  %p81_p2 = scmp.eq.s32.totalorder %s5772_s13, 1 }
   0x8   : > { %p86_p3 = scmp.ne.s32.totalorder %s5719_s10, %s5715_s9  ;;  %p87_p4 = scmp.eq.s32.totalorder %s4701_s14, 1 }
   0x9   : > { %s5787_s18 = scalar_select %p68_p1, %s5723_s11, %s70_s16  }
   0xa   : > { %p5789_p5 = por %p81_p2, %p80_p0  ;;  %p5793_p6 = por %p87_p4, %p86_p3 }
   0xb   : > { %p4702_p7 = scmp.ge.s32.totalorder %s5727_s12, 1  ;;  %p94_p8 = scmp.lt.s32.totalorder %s5727_s12, 3 }
   0xc   : > { %s6325_s20 = scalar_select %p5793_p6, 1, 0 }
   0xd   : > { %p5548_p9 = scmp.eq.s32.totalorder %s5772_s13, 0  ;;  %p5800_p10 = pnand %p4702_p7, %p94_p8 }
   0xe   : > { %s5729_s22 = smov [#allocation2]  }
   0xf   : > { %s106_s23 = sshll.u32 %s5729_s22, 4  ;;  %p5540_p11 = pneg %p5800_p10  ;;  %s107_s23 = int_to_ptr.vmem [resolvable:$true] %s106_s23 }
  0x10   : > { %s5648_s24 = scalar_lea.vmem %s107_s23, 30080  ;;  %p5656_p3 = scmp.lt.s32.totalorder %s107_s23, %s107_s23 }
  0x11   : > { %p5541_p12 = pnand %p5548_p9, %p5540_p11  ;;  %p5649_p0 = scmp.ne.s32.totalorder %s107_s23, %s5648_s24 }
  0x12   : > { %p5657_p4 = scmp.lt.s32.totalorder %s5648_s24, %s5648_s24 }
  0x13   : > { %p5639_p13 = pneg %p5541_p12 }
  0x14   : > { %p5658_p6 = por %p5657_p4, %p5656_p3 }
  0x15   : > { %p5651_p1 = pnand %p5649_p0, %p5639_p13 }
  0x17   : > { %p5652_p2 = pneg %p5651_p1 }
  0x19   : > { %p5659_p7 = pnand %p5658_p6, %p5652_p2 }
  0x1b   : > { %5662 = shalt.err (!%p5659_p7)
}
  0x1c   : > { %s5730_s25 = smov 128   ;;  %s5731_s26 = smov 8  }
  0x1d   : > { %5543 = dma.hbm_to_vmem [thread:$0]  (!%p5541_p12), %s6322_s1, 30080, %s107_s23, [#allocation3], %s5730_s25, %s5730_s25, %s5731_s26  }
  0x1e   : > { %130 = sbr.rel (%p5800_p10) target bundleno = 7976 (0x1f28), region = 28 }
  0x23   : > { %5706 = dma.done.wait (%p5548_p9), [#allocation3], 30080  }
  0x24   : > { %5708 = vsyncadd (%p5548_p9), [#allocation3], 4294937216  ;;  %p151_p8 = scmp.lt.s32.totalorder %s5772_s13, 1  ;;  %vm172_vm0 = vcmask 1041408   ;;  %vm165_vm1 = vcmask 80896   ;;  %v158_v1 = vld [vmem:[#allocation2] sm:$0xff] }
  0x25   : > { %v159_v0 = vld [vmem:[#allocation2 + $0x8] sm:$0x3]  ;;  %v4709_v4 = vld [vmem:[#allocation2 + $0x10] ss:$0 sm:$0xff]  ;;  %vm253_vm2 = vcmask 130048   ;;  %v333_v49 = vld [vmem:[#allocation2 + $0x38] sm:$0xff] }
  0x26   : > { %s152_s29 = scalar_select %p151_p8, %s5772_s13, 1  ;;  %5081 = vmatprep.subr.msk.mxu0 %vm172_vm0, %v159_v0  ;;  %v4713_v28 = vld [vmem:[#allocation2 + $0x18] ss:$0 sm:$0xff]  ;;  %v4714_v30 = vld [vmem:[#allocation2 + $0x20] ss:$0 sm:$0xff]  ;;  %v335_v50 = vld [vmem:[#allocation2 + $0x48] sm:$0xff] }
  0x27   : > { %5082 = vmatpush3.msk.msra.mxu0 %vm172_vm0, %v159_v0  ;;  %5095 = vmatprep.mubr.msk.f32.mxu1 %vm253_vm2, %v335_v50  ;;  %v4715_v58 = vld [vmem:[#allocation2 + $0x28] ss:$0 sm:$0xff]  ;;  %v4716_v60 = vld [vmem:[#allocation2 + $0x30] ss:$0 sm:$0xff]  ;;  %vm1351_vm3 = vcmask 523264   ;;  %vm1463_vm4 = vcmask 1043456  }
  0x28   : > { %s4864_s30 = sshll.u32 %s152_s29, 4  ;;  %5083 = vmatprep.subr.mxu0 %v158_v1  ;;  %vm1456_vm5 = vcmask 31744   ;;  %vm5734_vm8 = vmmov 0   ;;  %vm2595_vm9 = vcmask 257024   ;;  %vm2627_vm10 = vcmask 1040384   ;;  %s149_s6 = sand.u32 1, %s5719_s10  }
  0x29   : > { %s155_s5 = scalar_lea.vmem %s6321_s0, %s4864_s30  ;;  %5084 = vmatpush3.msra.mxu0 %v158_v1  ;;  %vm2623_vm11 = vcmask 7168   ;;  %vm2779_vm12 = vcmask 258048   ;;  %vm2987_vm13 = vcmask 261120   ;;  %vm3670_vm14 = vcmask 1044480   ;;  %s4861_s7 = sshll.u32 %s5772_s13, 4 }
  0x2a   : > { %v156_v2 = vld [vmem:[%s155_s5] sm:$0xff]  ;;  %v157_v3 = vld [vmem:[%s155_s5 + $0x8] sm:$0xff]  ;;  %vm3654_vm15 = vcmask 39936   ;;  %vm3955_vm0 = vcmask 323584   ;;  %s150_s8 = scalar_lea.vmem [#allocation5], %s149_s6  ;;  %s6286_s21 = scalar_lea.hbm %s6323_s2, %s4861_s7 }
  0x2b   : > { %5085 = vmatprep.mubr.msk.f32.mxu0 %vm165_vm1, %v156_v2  ;;  %s4634_s14 = sshll.u32 %s150_s8, 4  ;;  %s4622_s22 = scalar_lea.sflag [#allocation4], %s149_s6  ;;  %s4635_s14 = int_to_ptr.vmem [resolvable:$true] %s4634_s14 }
  0x2c   : > { %5086 = vmatmul.mubr.msk.f32.vlgmr.msra.gmra.mxu0 %vm165_vm1, %v157_v3  ;;  %v334_v3 = vld [vmem:[#allocation2 + $0x40] sm:$0xff]  ;;  %vm3967_vm1 = vcmask 326656   ;;  %s5663_s23 = scalar_lea.vmem %s4635_s14, 16  ;;  %s5735_s24 = smov [#allocation5]  }
  0x2d   : > { %5092 = vmatprep.mubr.msk.f32.mxu0 %vm253_vm2, %v333_v49  ;;  %v705_v49 = vld [vmem:[#allocation2 + $0x198] sm:$0xff]  ;;  %p5664_p6 = scmp.ne.s32.totalorder %s4635_s14, %s5663_s23  ;;  %s5667_s13 = sshll.u32 %s5735_s24, 4  ;;  %s5668_s13 = int_to_ptr.vmem [resolvable:$false] %s5667_s13 }
  0x2e   : > { %s5669_s25 = scalar_lea.vmem %s5668_s13, 32  ;;  %p5670_p11 = scmp.lt.s32.totalorder %s4635_s14, %s5668_s13 }
  0x2f   : > { %p5665_p9 = pnand %p5664_p6, %p5789_p5  ;;  %p5671_p12 = scmp.lt.s32.totalorder %s5669_s25, %s5663_s23 }
  0x31   : > { %p5666_p10 = pneg %p5665_p9  ;;  %p5672_p13 = por %p5671_p12, %p5670_p11 }
  0x33   : > { %p5673_p0 = pnand %p5672_p13, %p5666_p10 }
  0xec   : > { %v5087_v5 = vpop.f32.mrf.mxu0 }
  0xed   : > { %v248_v6 = vadd.f32 %v5087_v5, %v4709_v4  ;;  %v337_v5 = vld [vmem:[#allocation2 + $0x58] sm:$0xff] }
  0xee   : > { %v242_v7 = vpop.f32.mrf.mxu0 }
  0xef   : > { %v243_v8 = vadd.f32 %v4709_v4, %v242_v7  ;;  %v257_v9 = vsel %vm253_vm2, %v248_v6, 0.0  ;;  %v336_v4 = vld [vmem:[#allocation2 + $0x50] sm:$0xff]  ;;  %v339_v7 = vld [vmem:[#allocation2 + $0x68] sm:$0xff] }
  0xf0   : > { %258 = vadd.xlane.f32.xlu0 %v257_v9  ;;  %v341_v9 = vld [vmem:[#allocation2 + $0x78] sm:$0xff] }
  0xf1   : > { %v254_v10 = vsel %vm253_vm2, %v243_v8, 0.0 }
  0xf4   : > { %255 = vadd.xlane.f32.xlu0 %v254_v10  ;;  %v342_v10 = vld [vmem:[#allocation2 + $0x80] sm:$0xff] }
 0x179   : > { %v259_v11 = vpop.xlane.xlu0 %258 }
 0x17a   : > { %v262_v12 = vmul.f32 0.0625, %v259_v11  ;;  %v343_v11 = vld [vmem:[#allocation2 + $0x88] sm:$0xff] }
 0x17c   : > { %v264_v13 = vsub.f32 %v248_v6, %v262_v12  ;;  %v338_v6 = vld [vmem:[#allocation2 + $0x60] sm:$0xff]  ;;  %v344_v12 = vld [vmem:[#allocation2 + $0x90] sm:$0xff] }
 0x17d   : > { %v256_v14 = vpop.xlane.xlu0 %255 }
 0x17e   : > { %v261_v15 = vmul.f32 0.0625, %v256_v14  ;;  %v266_v16 = vmul.f32 %v264_v13, %v264_v13  ;;  %v346_v14 = vld [vmem:[#allocation2 + $0xa0] sm:$0xff] }
 0x180   : > { %v263_v17 = vsub.f32 %v243_v8, %v261_v15  ;;  %v270_v18 = vsel %vm253_vm2, %v266_v16, 0.0  ;;  %v340_v8 = vld [vmem:[#allocation2 + $0x70] sm:$0xff]  ;;  %v347_v15 = vld [vmem:[#allocation2 + $0xa8] sm:$0xff] }
 0x181   : > { %271 = vadd.xlane.f32.xlu1 %v270_v18  ;;  %v348_v16 = vld [vmem:[#allocation2 + $0xb0] sm:$0xff]  ;;  %v350_v18 = vld [vmem:[#allocation2 + $0xc0] sm:$0xff] }
 0x182   : > { %v265_v19 = vmul.f32 %v263_v17, %v263_v17 }
 0x184   : > { %v267_v20 = vsel %vm253_vm2, %v265_v19, 0.0  ;;  %v613_v19 = vld [vmem:[#allocation2 + $0x160] sm:$0xff] }
 0x185   : > { %268 = vadd.xlane.f32.xlu1 %v267_v20  ;;  %v612_v20 = vld [vmem:[#allocation2 + $0x158] sm:$0xff] }
 0x20a   : > { %v272_v21 = vpop.xlane.xlu1 %271 }
 0x20b   : > { %v274_v22 = vmul.f32 0.0625, %v272_v21  ;;  %v5856_v21 = vld [vmem:[#allocation2 + $0x208] sm:$0xff] }
 0x20d   : > { %v276_v23 = vadd.f32 1e-05, %v274_v22 }
 0x20e   : > { %v269_v24 = vpop.xlane.xlu1 %268 }
 0x20f   : > { %5589 = vrsqrt.f32 %v276_v23  ;;  %v273_v25 = vmul.f32 0.0625, %v269_v24 }
 0x211   : > { %v275_v26 = vadd.f32 1e-05, %v273_v25 }
 0x213   : > { %5591 = vrsqrt.f32 %v275_v26 }
 0x21c   : > { %v5590_v27 = vpop.eup %5589 }
 0x21d   : > { %v280_v29 = vmul.f32 %v5590_v27, %v264_v13  ;;  %v345_v13 = vld [vmem:[#allocation2 + $0x98] sm:$0xff]  ;;  %v561_v27 = vld [vmem:[#allocation2 + $0xd0] sm:$0xff] }
 0x21f   : > { %v286_v31 = vmul.f32 %v4713_v28, %v280_v29  ;;  %v841_v29 = vld [vmem:[#allocation2 + $0x220] sm:$0xff] }
 0x220   : > { %v5592_v32 = vpop.eup %5591 }
 0x221   : > { %v5826_v33 = vadd.f32 %v4714_v30, %v286_v31  ;;  %v279_v34 = vmul.f32 %v5592_v32, %v263_v17  ;;  %v349_v17 = vld [vmem:[#allocation2 + $0xb8] sm:$0xff]  ;;  %v563_v31 = vld [vmem:[#allocation2 + $0xe0] sm:$0xff]  ;;  %v703_v32 = vld [vmem:[#allocation2 + $0x188] sm:$0xff] }
 0x223   : > { %v298_v35 = vsel %vm253_vm2, %v5826_v33, 0.0  ;;  %v285_v36 = vmul.f32 %v4713_v28, %v279_v34  ;;  %v701_v28 = vld [vmem:[#allocation2 + $0x178] sm:$0xff]  ;;  %v843_v34 = vld [vmem:[#allocation2 + $0x230] sm:$0xff] }
 0x224   : > { %299 = vadd.xlane.f32.xlu0 %v298_v35 }
 0x225   : > { %v5830_v37 = vadd.f32 %v4714_v30, %v285_v36  ;;  %v560_v36 = vld [vmem:[#allocation2 + $0xc8] sm:$0xff] }
 0x227   : > { %v295_v38 = vsel %vm253_vm2, %v5830_v37, 0.0 }
 0x228   : > { %296 = vadd.xlane.f32.xlu1 %v295_v38  ;;  %v700_v38 = vld [vmem:[#allocation2 + $0x170] sm:$0xff] }
 0x2ad   : > { %v300_v39 = vpop.xlane.xlu0 %299 }
 0x2ae   : > { %v302_v40 = vmul.f32 0.0625, %v300_v39  ;;  %v562_v39 = vld [vmem:[#allocation2 + $0xd8] sm:$0xff] }
 0x2b0   : > { %v304_v41 = vsub.f32 %v5826_v33, %v302_v40 }
 0x2b1   : > { %v297_v42 = vpop.xlane.xlu1 %296 }
 0x2b2   : > { %v301_v43 = vmul.f32 0.0625, %v297_v42  ;;  %v306_v44 = vmul.f32 %v304_v41, %v304_v41  ;;  %v702_v42 = vld [vmem:[#allocation2 + $0x180] sm:$0xff] }
 0x2b4   : > { %v303_v45 = vsub.f32 %v5830_v37, %v301_v43  ;;  %v310_v46 = vsel %vm253_vm2, %v306_v44, 0.0  ;;  %v842_v43 = vld [vmem:[#allocation2 + $0x228] sm:$0xff] }
 0x2b5   : > { %311 = vadd.xlane.f32.xlu0 %v310_v46 }
 0x2b6   : > { %v305_v47 = vmul.f32 %v303_v45, %v303_v45 }
 0x2b8   : > { %v307_v48 = vsel %vm253_vm2, %v305_v47, 0.0 }
 0x2b9   : > { %308 = vadd.xlane.f32.xlu1 %v307_v48  ;;  %v565_v48 = vld [vmem:[#allocation2 + $0xf0] sm:$0xff] }
 0x33e   : > { %v312_v51 = vpop.xlane.xlu0 %311 }
 0x33f   : > { %v314_v52 = vmul.f32 0.0625, %v312_v51 }
 0x341   : > { %v316_v53 = vadd.f32 1e-05, %v314_v52 }
 0x342   : > { %v309_v54 = vpop.xlane.xlu1 %308 }
 0x343   : > { %5593 = vrsqrt.f32 %v316_v53  ;;  %v313_v55 = vmul.f32 0.0625, %v309_v54 }
 0x345   : > { %v315_v56 = vadd.f32 1e-05, %v313_v55  ;;  %v845_v55 = vld [vmem:[#allocation2 + $0x240] sm:$0xff] }
 0x347   : > { %5595 = vrsqrt.f32 %v315_v56 }
 0x350   : > { %v5594_v57 = vpop.eup %5593 }
 0x351   : > { %v320_v59 = vmul.f32 %v5594_v57, %v304_v41  ;;  %v840_v41 = vld [vmem:[#allocation2 + $0x218] sm:$0xff] }
 0x353   : > { %v326_v61 = vmul.f32 %v4715_v58, %v320_v59 }
 0x354   : > { %v5596_v62 = vpop.eup %5595 }
 0x355   : > { %v332_v63 = vadd.f32 %v4716_v60, %v326_v61  ;;  %v319_v0 = vmul.f32 %v5596_v62, %v303_v45  ;;  %v704_v61 = vld [vmem:[#allocation2 + $0x190] sm:$0xff] }
 0x357   : > { %5088 = vmatprep.subr.mxu0 %v332_v63  ;;  %5530 = vmatprep.subr.mxu1 %v332_v63  ;;  %v325_v1 = vmul.f32 %v4715_v58, %v319_v0 }
 0x358   : > { %5089 = vmatpush3.msra.mxu0 %v332_v63  ;;  %5532 = vmatpush3.msra.mxu1 %v332_v63 }
 0x359   : > { %v331_v2 = vadd.f32 %v4716_v60, %v325_v1  ;;  %v564_v60 = vld [vmem:[#allocation2 + $0xe8] sm:$0xff]  ;;  %v844_v1 = vld [vmem:[#allocation2 + $0x238] sm:$0xff] }
 0x35b   : > { %5090 = vmatprep.subr.mxu0 %v331_v2  ;;  %5531 = vmatprep.subr.mxu1 %v331_v2 }
 0x35c   : > { %5091 = vmatpush3.msra.mxu0 %v331_v2  ;;  %5533 = vmatpush3.msra.mxu1 %v331_v2  ;;  %v567_v2 = vld [vmem:[#allocation2 + $0x100] sm:$0xff] }
 0x35d   : > { %5093 = vmatmul.mubr.msk.f32.vlgmr.msra.gmra.mxu0 %vm253_vm2, %v334_v3  ;;  %5096 = vmatmul.mubr.msk.f32.vlgmr.msra.gmra.mxu1 %vm253_vm2, %v336_v4 }
 0x35e   : > { %5098 = vmatprep.mubr.msk.f32.mxu1 %vm253_vm2, %v337_v5  ;;  %5119 = vmatprep.subr.mxu0 %v613_v19 }
 0x35f   : > { %5120 = vmatpush3.msra.mxu0 %v613_v19 }
 0x360   : > { %5121 = vmatprep.subr.mxu0 %v612_v20 }
 0x361   : > { %5099 = vmatmul.mubr.msk.f32.gmra.mxu1 %vm253_vm2, %v338_v6  ;;  %5122 = vmatpush3.msra.mxu0 %v612_v20  ;;  %v707_v6 = vld [vmem:[#allocation2 + $0x1a8] sm:$0xff]  ;;  %v569_v20 = vld [vmem:[#allocation2 + $0x110] sm:$0xff] }
 0x362   : > { %5101 = vmatprep.mubr.msk.f32.mxu1 %vm253_vm2, %v339_v7  ;;  %5126 = vmatprep.subr.mxu0 %v5856_v21  ;;  %v566_v7 = vld [vmem:[#allocation2 + $0xf8] sm:$0xff] }
 0x365   : > { %5102 = vmatmul.mubr.msk.f32.gmra.mxu1 %vm253_vm2, %v340_v8 }
 0x366   : > { %5104 = vmatprep.mubr.msk.f32.mxu1 %vm253_vm2, %v341_v9 }
 0x369   : > { %5105 = vmatmul.mubr.msk.f32.gmra.mxu1 %vm253_vm2, %v342_v10 }
 0x36a   : > { %5107 = vmatprep.mubr.msk.f32.mxu1 %vm253_vm2, %v343_v11 }
 0x36d   : > { %5108 = vmatmul.mubr.msk.f32.gmra.mxu1 %vm253_vm2, %v344_v12 }
 0x36e   : > { %5110 = vmatprep.mubr.msk.f32.mxu1 %vm253_vm2, %v345_v13  ;;  %v847_v13 = vld [vmem:[#allocation2 + $0x250] sm:$0xff] }
 0x371   : > { %5111 = vmatmul.mubr.msk.f32.gmra.mxu1 %vm253_vm2, %v346_v14  ;;  %v706_v14 = vld [vmem:[#allocation2 + $0x1a0] sm:$0xff] }
 0x372   : > { %5113 = vmatprep.mubr.msk.f32.mxu1 %vm253_vm2, %v347_v15  ;;  %v846_v15 = vld [vmem:[#allocation2 + $0x248] sm:$0xff] }
 0x375   : > { %5114 = vmatmul.mubr.msk.f32.gmra.mxu1 %vm253_vm2, %v348_v16 }
 0x376   : > { %5116 = vmatprep.mubr.msk.f32.mxu1 %vm253_vm2, %v349_v17 }
 0x379   : > { %5117 = vmatmul.mubr.msk.f32.gmra.mxu1 %vm253_vm2, %v350_v18 }
 0x41d   : > { %v5097_v22 = vpop.f32.mrf.mxu1  ;;  %v5094_v25 = vpop.f32.mrf.mxu0 }
 0x41e   : > { %v579_v44 = vmul.f32 %v5094_v25, %v561_v27  ;;  %v719_v45 = vmul.f32 %v5094_v25, %v701_v28  ;;  %v581_v46 = vmul.f32 %v5097_v22, %v563_v31  ;;  %v721_v47 = vmul.f32 %v5097_v22, %v703_v32  ;;  %v849_v31 = vld [vmem:[#allocation2 + $0x260] sm:$0xff] }
 0x41f   : > { %v481_v23 = vpop.f32.mrf.mxu1  ;;  %v471_v35 = vpop.f32.mrf.mxu0  ;;  %v859_v51 = vmul.f32 %v5094_v25, %v841_v29  ;;  %v861_v52 = vmul.f32 %v5097_v22, %v843_v34  ;;  %v568_v22 = vld [vmem:[#allocation2 + $0x108] sm:$0xff]  ;;  %v709_v29 = vld [vmem:[#allocation2 + $0x1b8] sm:$0xff] }
 0x420   : > { %v578_v53 = vmul.f32 %v560_v36, %v471_v35  ;;  %v580_v54 = vmul.f32 %v562_v39, %v481_v23  ;;  %v718_v56 = vmul.f32 %v700_v38, %v471_v35  ;;  %v858_v57 = vmul.f32 %v840_v41, %v471_v35  ;;  %v708_v38 = vld [vmem:[#allocation2 + $0x1b0] sm:$0xff]  ;;  %v570_v39 = vld [vmem:[#allocation2 + $0x118] sm:$0xff] }
 0x421   : > { %v5100_v24 = vpop.f32.mrf.mxu1  ;;  %v720_v58 = vmul.f32 %v702_v42, %v481_v23  ;;  %v860_v59 = vmul.f32 %v842_v43, %v481_v23  ;;  %v597_v3 = vadd.f32 %v581_v46, %v579_v44  ;;  %v737_v4 = vadd.f32 %v721_v47, %v719_v45  ;;  %v571_v45 = vld [vmem:[#allocation2 + $0x120] sm:$0xff] }
 0x422   : > { %v583_v63 = vmul.f32 %v5100_v24, %v565_v48  ;;  %v723_v0 = vmul.f32 %v5100_v24, %v705_v49  ;;  %v863_v5 = vmul.f32 %v5100_v24, %v845_v55  ;;  %v877_v9 = vadd.f32 %v861_v52, %v859_v51  ;;  %v710_v51 = vld [vmem:[#allocation2 + $0x1c0] sm:$0xff]  ;;  %v848_v55 = vld [vmem:[#allocation2 + $0x258] sm:$0xff] }
 0x423   : > { %v491_v26 = vpop.f32.mrf.mxu1  ;;  %v596_v10 = vadd.f32 %v580_v54, %v578_v53  ;;  %v736_v16 = vadd.f32 %v720_v58, %v718_v56  ;;  %v876_v17 = vadd.f32 %v860_v59, %v858_v57  ;;  %v572_v53 = vld [vmem:[#allocation2 + $0x128] sm:$0xff]  ;;  %v573_v57 = vld [vmem:[#allocation2 + $0x130] sm:$0xff] }
 0x424   : > { %v582_v11 = vmul.f32 %v564_v60, %v491_v26  ;;  %v722_v12 = vmul.f32 %v704_v61, %v491_v26  ;;  %v862_v18 = vmul.f32 %v844_v1, %v491_v26  ;;  %v599_v24 = vadd.f32 %v597_v3, %v583_v63  ;;  %v712_v63 = vld [vmem:[#allocation2 + $0x1d0] sm:$0xff]  ;;  %v711_v3 = vld [vmem:[#allocation2 + $0x1c8] sm:$0xff] }
 0x425   : > { %v5103_v30 = vpop.f32.mrf.mxu1  ;;  %v739_v25 = vadd.f32 %v737_v4, %v723_v0  ;;  %v879_v32 = vadd.f32 %v877_v9, %v863_v5  ;;  %v851_v4 = vld [vmem:[#allocation2 + $0x270] sm:$0xff] }
 0x426   : > { %v585_v19 = vmul.f32 %v5103_v30, %v567_v2  ;;  %v725_v27 = vmul.f32 %v5103_v30, %v707_v6  ;;  %v865_v34 = vmul.f32 %v5103_v30, %v847_v13  ;;  %v598_v26 = vadd.f32 %v596_v10, %v582_v11 }
 0x427   : > { %v501_v40 = vpop.f32.mrf.mxu1  ;;  %v738_v42 = vadd.f32 %v736_v16, %v722_v12  ;;  %v878_v46 = vadd.f32 %v876_v17, %v862_v18  ;;  %v850_v12 = vld [vmem:[#allocation2 + $0x268] sm:$0xff]  ;;  %v713_v18 = vld [vmem:[#allocation2 + $0x1d8] sm:$0xff] }
 0x428   : > { %v584_v28 = vmul.f32 %v566_v7, %v501_v40  ;;  %v724_v35 = vmul.f32 %v706_v14, %v501_v40  ;;  %v864_v36 = vmul.f32 %v846_v15, %v501_v40  ;;  %v601_v47 = vadd.f32 %v599_v24, %v585_v19  ;;  %v575_v7 = vld [vmem:[#allocation2 + $0x140] sm:$0xff] }
 0x429   : > { %v5106_v50 = vpop.f32.mrf.mxu1  ;;  %v741_v30 = vadd.f32 %v739_v25, %v725_v27  ;;  %v881_v58 = vadd.f32 %v879_v32, %v865_v34  ;;  %v714_v15 = vld [vmem:[#allocation2 + $0x1e0] sm:$0xff] }
 0x42a   : > { %v587_v43 = vmul.f32 %v5106_v50, %v569_v20  ;;  %v727_v48 = vmul.f32 %v5106_v50, %v709_v29  ;;  %v867_v49 = vmul.f32 %v5106_v50, %v849_v31  ;;  %v600_v54 = vadd.f32 %v598_v26, %v584_v28  ;;  %v574_v50 = vld [vmem:[#allocation2 + $0x138] sm:$0xff]  ;;  %v576_v31 = vld [vmem:[#allocation2 + $0x148] sm:$0xff] }
 0x42b   : > { %v5859_v62 = vpop.f32.mrf.mxu1  ;;  %v740_v59 = vadd.f32 %v738_v42, %v724_v35  ;;  %v880_v60 = vadd.f32 %v878_v46, %v864_v36  ;;  %v852_v28 = vld [vmem:[#allocation2 + $0x278] sm:$0xff]  ;;  %v715_v36 = vld [vmem:[#allocation2 + $0x1e8] sm:$0xff] }
 0x42c   : > { %v586_v44 = vmul.f32 %v568_v22, %v5859_v62  ;;  %v726_v40 = vmul.f32 %v708_v38, %v5859_v62  ;;  %v603_v1 = vadd.f32 %v601_v47, %v587_v43  ;;  %v743_v9 = vadd.f32 %v741_v30, %v727_v48  ;;  %v577_v22 = vld [vmem:[#allocation2 + $0x150] sm:$0xff] }
 0x42d   : > { %v5861_v8 = vpop.f32.mrf.mxu1  ;;  %v883_v10 = vadd.f32 %v881_v58, %v867_v49  ;;  %v866_v11 = vmul.f32 %v848_v55, %v5859_v62  ;;  %v856_v55 = vld [vmem:[#allocation2 + $0x298] sm:$0xff] }
 0x42e   : > { %v589_v61 = vmul.f32 %v5861_v8, %v571_v45  ;;  %v602_v2 = vadd.f32 %v600_v54, %v586_v44  ;;  %v742_v16 = vadd.f32 %v740_v59, %v726_v40  ;;  %v729_v25 = vmul.f32 %v5861_v8, %v711_v3  ;;  %v854_v44 = vld [vmem:[#allocation2 + $0x288] sm:$0xff] }
 0x42f   : > { %v5863_v23 = vpop.f32.mrf.mxu1  ;;  %v869_v27 = vmul.f32 %v5861_v8, %v851_v4  ;;  %v882_v26 = vadd.f32 %v880_v60, %v866_v11  ;;  %v853_v8 = vld [vmem:[#allocation2 + $0x280] sm:$0xff] }
 0x430   : > { %v588_v56 = vmul.f32 %v570_v39, %v5863_v23  ;;  %v728_v5 = vmul.f32 %v710_v51, %v5863_v23  ;;  %v605_v24 = vadd.f32 %v603_v1, %v589_v61  ;;  %v868_v34 = vmul.f32 %v850_v12, %v5863_v23  ;;  %v716_v39 = vld [vmem:[#allocation2 + $0x1f0] sm:$0xff]  ;;  %v717_v51 = vld [vmem:[#allocation2 + $0x1f8] sm:$0xff] }
 0x431   : > { %v5865_v41 = vpop.f32.mrf.mxu1  ;;  %v745_v30 = vadd.f32 %v743_v9, %v729_v25 }
 0x432   : > { %v591_v13 = vmul.f32 %v5865_v41, %v573_v57  ;;  %v604_v17 = vadd.f32 %v602_v2, %v588_v56  ;;  %v744_v32 = vadd.f32 %v742_v16, %v728_v5  ;;  %v731_v43 = vmul.f32 %v5865_v41, %v713_v18  ;;  %v855_v57 = vld [vmem:[#allocation2 + $0x290] sm:$0xff]  ;;  %v857_v2 = vld [vmem:[#allocation2 + $0x2a0] sm:$0xff]  ;;  %v892_v16 = vld [vmem:[#allocation2 + $0x2a8] sm:$0xff] }
 0x433   : > { %v531_v52 = vpop.f32.mrf.mxu1  ;;  %v884_v56 = vadd.f32 %v882_v26, %v868_v34  ;;  %v752_v5 = vld [vmem:[#allocation2 + $0x200] sm:$0xff] }
 0x434   : > { %v590_v6 = vmul.f32 %v572_v53, %v531_v52  ;;  %v730_v19 = vmul.f32 %v712_v63, %v531_v52  ;;  %v607_v42 = vadd.f32 %v605_v24, %v591_v13  ;;  %v870_v48 = vmul.f32 %v852_v28, %v531_v52  ;;  %v984_v26 = vld [vmem:[#allocation2 + $0x2e0] sm:$0xff] }
 0x435   : > { %v5871_v0 = vpop.f32.mrf.mxu1  ;;  %v747_v61 = vadd.f32 %v745_v30, %v731_v43  ;;  %v871_v63 = vmul.f32 %v5865_v41, %v853_v8  ;;  %v893_v41 = vld [vmem:[#allocation2 + $0x2b0] sm:$0xff] }
 0x436   : > { %v593_v29 = vmul.f32 %v5871_v0, %v575_v7  ;;  %v606_v35 = vadd.f32 %v604_v17, %v590_v6  ;;  %v746_v47 = vadd.f32 %v744_v32, %v730_v19  ;;  %v733_v23 = vmul.f32 %v5871_v0, %v715_v36  ;;  %v981_v32 = vld [vmem:[#allocation2 + $0x2c8] sm:$0xff]  ;;  %v986_v43 = vld [vmem:[#allocation2 + $0x2f0] sm:$0xff] }
 0x437   : > { %v541_v14 = vpop.f32.mrf.mxu1  ;;  %v886_v52 = vadd.f32 %v884_v56, %v870_v48  ;;  %v885_v6 = vadd.f32 %v883_v10, %v869_v27  ;;  %v873_v9 = vmul.f32 %v5871_v0, %v855_v57  ;;  %v4735_v10 = vld [vmem:[#allocation2 + $0x168] ss:$0 sm:$0xff]  ;;  %v5912_v30 = vld [vmem:[#allocation2 + $0x330] sm:$0xff]  ;;  %v5922_v57 = vld [vmem:[#allocation2 + $0x320] sm:$0xff] }
 0x438   : > { %v592_v20 = vmul.f32 %v574_v50, %v541_v14  ;;  %v732_v38 = vmul.f32 %v714_v15, %v541_v14  ;;  %v609_v54 = vadd.f32 %v607_v42, %v593_v29  ;;  %v872_v59 = vmul.f32 %v854_v44, %v541_v14  ;;  %v4741_v29 = vld [vmem:[#allocation2 + $0x2b8] ss:$0 sm:$0xff]  ;;  %v985_v42 = vld [vmem:[#allocation2 + $0x2e8] sm:$0xff] }
 0x439   : > { %v5118_v62 = vpop.f32.mrf.mxu1  ;;  %v749_v7 = vadd.f32 %v747_v61, %v733_v23  ;;  %v887_v12 = vadd.f32 %v885_v6, %v871_v63  ;;  %v987_v44 = vld [vmem:[#allocation2 + $0x2f8] sm:$0xff]  ;;  %v5932_v61 = vld [vmem:[#allocation2 + $0x310] sm:$0xff] }
 0x43a   : > { %v595_v45 = vmul.f32 %v5118_v62, %v577_v22  ;;  %v608_v49 = vadd.f32 %v606_v35, %v592_v20  ;;  %v748_v58 = vadd.f32 %v746_v47, %v732_v38  ;;  %v735_v1 = vmul.f32 %v5118_v62, %v717_v51  ;;  %v4738_v22 = vld [vmem:[#allocation2 + $0x210] ss:$0 sm:$0xff]  ;;  %v5910_v51 = vld [vmem:[#allocation2 + $0x338] sm:$0xff] }
 0x43b   : > { %v551_v46 = vpop.f32.mrf.mxu1  ;;  %v888_v11 = vadd.f32 %v886_v52, %v872_v59  ;;  %v875_v14 = vmul.f32 %v5118_v62, %v857_v2  ;;  %v889_v17 = vadd.f32 %v887_v12, %v873_v9  ;;  %v982_v35 = vld [vmem:[#allocation2 + $0x2d0] sm:$0xff]  ;;  %v5927_v59 = vld [vmem:[#allocation2 + $0x318] sm:$0xff]  ;;  %v5942_v52 = vld [vmem:[#allocation2 + $0x300] sm:$0xff] }
 0x43c   : > { %v594_v53 = vmul.f32 %v576_v31, %v551_v46  ;;  %v734_v40 = vmul.f32 %v716_v39, %v551_v46  ;;  %v611_v50 = vadd.f32 %v609_v54, %v595_v45  ;;  %v874_v4 = vmul.f32 %v856_v55, %v551_v46  ;;  %v983_v39 = vld [vmem:[#allocation2 + $0x2d8] sm:$0xff]  ;;  %v5917_v55 = vld [vmem:[#allocation2 + $0x328] sm:$0xff]  ;;  %v1370_v9 = vld [vmem:[#allocation2 + $0x370] sm:$0xff] }
 0x43d   : > { %v751_v13 = vadd.f32 %v749_v7, %v735_v1  ;;  %v891_v0 = vadd.f32 %v889_v17, %v875_v14  ;;  %v1371_v7 = vld [vmem:[#allocation2 + $0x378] sm:$0xff]  ;;  %v1365_v14 = vld [vmem:[#allocation2 + $0x348] sm:$0xff]  ;;  %v1455_v17 = vld [vmem:[#allocation2 + $0x380] sm:$0xf] }
 0x43e   : > { %v610_v60 = vadd.f32 %v608_v49, %v594_v53  ;;  %v750_v3 = vadd.f32 %v748_v58, %v734_v40  ;;  %v890_v15 = vadd.f32 %v888_v11, %v874_v4  ;;  %v1369_v11 = vld [vmem:[#allocation2 + $0x368] sm:$0xff]  ;;  %v1367_v12 = vld [vmem:[#allocation2 + $0x358] sm:$0xff] }
 0x440   : > { %5123 = vmatprep.mubr.msk.f32.mxu0 %vm253_vm2, %v610_v60 }
 0x441   : > { %5124 = vmatmul.mubr.msk.f32.vlgmr.msra.gmra.mxu0 %vm253_vm2, %v611_v50  ;;  %v5937_v50 = vld [vmem:[#allocation2 + $0x308] sm:$0xff] }
 0x442   : > { %5127 = vmatpush3.msra.mxu0 %v5856_v21  ;;  %5130 = vmatprep.mubr.msk.f32.mxu0 %vm253_vm2, %v750_v3  ;;  %v980_v21 = vld [vmem:[#allocation2 + $0x2c0] sm:$0xff] }
 0x443   : > { %5128 = vmatprep.subr.mxu0 %v752_v5 }
 0x444   : > { %5129 = vmatpush3.msra.mxu0 %v752_v5 }
 0x445   : > { %5131 = vmatmul.mubr.msk.f32.vlgmr.msra.gmra.mxu0 %vm253_vm2, %v751_v13  ;;  %5133 = vmatprep.subr.mxu0 %v893_v41  ;;  %v1366_v13 = vld [vmem:[#allocation2 + $0x350] sm:$0xff] }
 0x446   : > { %5134 = vmatpush3.msra.mxu0 %v893_v41  ;;  %5137 = vmatprep.mubr.msk.f32.mxu0 %vm253_vm2, %v890_v15  ;;  %v1368_v41 = vld [vmem:[#allocation2 + $0x360] sm:$0xff] }
 0x447   : > { %5135 = vmatprep.subr.mxu0 %v892_v16  ;;  %v1364_v15 = vld [vmem:[#allocation2 + $0x340] sm:$0xff] }
 0x448   : > { %5136 = vmatpush3.msra.mxu0 %v892_v16 }
 0x449   : > { %5138 = vmatmul.mubr.msk.f32.vlgmr.msra.gmra.mxu0 %vm253_vm2, %v891_v0 }
 0x44a   : > { %5144 = vmatprep.mubr.msk.f32.mxu0 %vm253_vm2, %v980_v21 }
 0x501   : > { %v5125_v18 = vpop.f32.mrf.mxu0 }
 0x502   : > { %v5892_v19 = vadd.f32 %v5125_v18, %v4735_v10 }
 0x503   : > { %v691_v20 = vpop.f32.mrf.mxu0 }
 0x504   : > { %v692_v24 = vadd.f32 %v4735_v10, %v691_v20 }
 0x505   : > { %v5132_v25 = vpop.f32.mrf.mxu0 }
 0x506   : > { %v837_v27 = vadd.f32 %v5132_v25, %v4738_v22  ;;  %5188 = vmatprep.mubr.msk.f32.mxu1 %vm253_vm2, %v692_v24 }
 0x507   : > { %v831_v28 = vpop.f32.mrf.mxu0 }
 0x508   : > { %v832_v62 = vadd.f32 %v4738_v22, %v831_v28  ;;  %5140 = vmatprep.subr.mxu0 %v837_v27 }
 0x509   : > { %v5139_v31 = vpop.f32.mrf.mxu0  ;;  %5141 = vmatpush3.msra.mxu0 %v837_v27 }
 0x50a   : > { %v977_v34 = vadd.f32 %v5139_v31, %v4741_v29  ;;  %5142 = vmatprep.subr.mxu0 %v832_v62 }
 0x50b   : > { %v971_v36 = vpop.f32.mrf.mxu0  ;;  %5143 = vmatpush3.msra.mxu0 %v832_v62 }
 0x50c   : > { %v972_v38 = vadd.f32 %v4741_v29, %v971_v36  ;;  %5145 = vmatmul.mubr.msk.f32.vlgmr.msra.gmra.mxu0 %vm253_vm2, %v981_v32  ;;  %5156 = vmatprep.subr.mxu0 %v977_v34 }
 0x50d   : > { %5157 = vmatpush3.msra.mxu0 %v977_v34  ;;  %5147 = vmatprep.mubr.msk.f32.mxu0 %vm253_vm2, %v982_v35 }
 0x50e   : > { %5158 = vmatprep.subr.mxu0 %v972_v38 }
 0x50f   : > { %5159 = vmatpush3.msra.mxu0 %v972_v38 }
 0x510   : > { %5148 = vmatmul.mubr.msk.f32.gmra.mxu0 %vm253_vm2, %v983_v39  ;;  %5191 = vmatprep.subr.mxu0 %v1371_v7 }
 0x511   : > { %5150 = vmatprep.mubr.msk.f32.mxu0 %vm253_vm2, %v984_v26 }
 0x514   : > { %5151 = vmatmul.mubr.msk.f32.gmra.mxu0 %vm253_vm2, %v985_v42 }
 0x515   : > { %5153 = vmatprep.mubr.msk.f32.mxu0 %vm253_vm2, %v986_v43 }
 0x518   : > { %5154 = vmatmul.mubr.msk.f32.gmra.mxu0 %vm253_vm2, %v987_v44 }
 0x519   : > { %5160 = vmatprep.mubr.msk.f32.mxu0 %vm253_vm2, %v980_v21 }
 0x51c   : > { %5161 = vmatmul.mubr.msk.f32.vlgmr.msra.gmra.mxu0 %vm253_vm2, %v981_v32 }
 0x51d   : > { %5163 = vmatprep.mubr.msk.f32.mxu0 %vm253_vm2, %v982_v35  ;;  %5192 = vmatpush3.msra.mxu0 %v1371_v7  ;;  %v1756_v7 = vld [vmem:[#allocation2 + $0x3b8] sm:$0xff] }
 0x51e   : > { %5193 = vmatprep.subr.mxu0 %v1370_v9 }
 0x51f   : > { %5194 = vmatpush3.msra.mxu0 %v1370_v9  ;;  %v1755_v9 = vld [vmem:[#allocation2 + $0x3b0] sm:$0xff] }
 0x520   : > { %5164 = vmatmul.mubr.msk.f32.gmra.mxu0 %vm253_vm2, %v983_v39  ;;  %5195 = vmatprep.subr.mxu0 %v1369_v11 }
 0x521   : > { %5166 = vmatprep.mubr.msk.f32.mxu0 %vm253_vm2, %v984_v26  ;;  %5196 = vmatpush3.msra.mxu0 %v1369_v11 }
 0x522   : > { %5197 = vmatprep.subr.mxu0 %v1368_v41 }
 0x523   : > { %5198 = vmatpush3.msra.mxu0 %v1368_v41 }
 0x524   : > { %5167 = vmatmul.mubr.msk.f32.gmra.mxu0 %vm253_vm2, %v985_v42  ;;  %5199 = vmatprep.subr.mxu0 %v1367_v12 }
 0x525   : > { %5169 = vmatprep.mubr.msk.f32.mxu0 %vm253_vm2, %v986_v43  ;;  %5200 = vmatpush3.msra.mxu0 %v1367_v12 }
 0x526   : > { %5201 = vmatprep.subr.mxu0 %v1366_v13 }
 0x527   : > { %5202 = vmatpush3.msra.mxu0 %v1366_v13 }
 0x528   : > { %5170 = vmatmul.mubr.msk.f32.gmra.mxu0 %vm253_vm2, %v987_v44  ;;  %5203 = vmatprep.subr.mxu0 %v1365_v14 }
 0x529   : > { %5204 = vmatpush3.msra.mxu0 %v1365_v14 }
 0x52a   : > { %5205 = vmatprep.subr.mxu0 %v1364_v15 }
 0x52b   : > { %5206 = vmatpush3.msra.mxu0 %v1364_v15 }
 0x5cc   : > { %v5146_v45 = vpop.f32.mrf.mxu0 }
 0x5cd   : > { %v1126_v1 = vmul.f32 %v5146_v45, %v5937_v50 }
 0x5ce   : > { %v1086_v46 = vpop.f32.mrf.mxu0 }
 0x5cf   : > { %v1125_v2 = vmul.f32 %v1086_v46, %v5942_v52 }
 0x5d0   : > { %v5149_v8 = vpop.f32.mrf.mxu0 }
 0x5d1   : > { %v1128_v60 = vmul.f32 %v5149_v8, %v5927_v59 }
 0x5d2   : > { %v1096_v47 = vpop.f32.mrf.mxu0 }
 0x5d3   : > { %v1127_v63 = vmul.f32 %v1096_v47, %v5932_v61 }
 0x5d4   : > { %v5152_v48 = vpop.f32.mrf.mxu0 }
 0x5d5   : > { %v1130_v56 = vmul.f32 %v5152_v48, %v5917_v55 }
 0x5d6   : > { %v1106_v49 = vpop.f32.mrf.mxu0 }
 0x5d7   : > { %v1129_v58 = vmul.f32 %v1106_v49, %v5922_v57 }
 0x5d8   : > { %v5155_v53 = vpop.f32.mrf.mxu0 }
 0x5d9   : > { %v1132_v54 = vmul.f32 %v5155_v53, %v5910_v51  ;;  %v1626_v53 = vld [vmem:[#allocation2 + $0x390] sm:$0xff] }
 0x5da   : > { %v1116_v23 = vpop.f32.mrf.mxu0  ;;  %5234 = vmatprep.subr.mxu0 %v1626_v53 }
 0x5db   : > { %v1131_v40 = vmul.f32 %v1116_v23, %v5912_v30  ;;  %5172 = vmatprep.subr.msk.mxu1 %vm253_vm2, %v1132_v54 }
 0x5dc   : > { %5173 = vmatpush3.xpose.msk.msra.mxu1 %vm253_vm2, %v1132_v54  ;;  %v5162_v16 = vpop.f32.mrf.mxu0 }
 0x5dd   : > { %5174 = vmatprep.subr.msk.mxu1 %vm253_vm2, %v1131_v40  ;;  %v1239_v46 = vmul.f32 %v5162_v16, %v5937_v50 }
 0x5de   : > { %v1199_v0 = vpop.f32.mrf.mxu0 }
 0x5df   : > { %v1238_v8 = vmul.f32 %v1199_v0, %v5942_v52 }
 0x5e0   : > { %5175 = vmatpush3.xpose.msk.msra.mxu1 %vm253_vm2, %v1131_v40  ;;  %v5165_v21 = vpop.f32.mrf.mxu0  ;;  %v4777_v40 = vld [vmem:[#allocation2 + $0x398] ss:$0 sm:$0xff] }
 0x5e1   : > { %5176 = vmatprep.subr.msk.mxu1 %vm253_vm2, %v1130_v56  ;;  %v1241_v44 = vmul.f32 %v5165_v21, %v5927_v59 }
 0x5e2   : > { %v1209_v10 = vpop.f32.mrf.mxu0 }
 0x5e3   : > { %v1240_v45 = vmul.f32 %v1209_v10, %v5932_v61 }
 0x5e4   : > { %5177 = vmatpush3.xpose.msk.msra.mxu1 %vm253_vm2, %v1130_v56  ;;  %v5168_v18 = vpop.f32.mrf.mxu0 }
 0x5e5   : > { %5178 = vmatprep.subr.msk.mxu1 %vm253_vm2, %v1129_v58  ;;  %v1243_v42 = vmul.f32 %v5168_v18, %v5917_v55 }
 0x5e8   : > { %5179 = vmatpush3.xpose.msk.msra.mxu1 %vm253_vm2, %v1129_v58 }
 0x5e9   : > { %5180 = vmatprep.subr.msk.mxu1 %vm253_vm2, %v1128_v60 }
 0x5ec   : > { %5181 = vmatpush3.xpose.msk.msra.mxu1 %vm253_vm2, %v1128_v60 }
 0x5ed   : > { %5182 = vmatprep.subr.msk.mxu1 %vm253_vm2, %v1127_v63 }
 0x5f0   : > { %5183 = vmatpush3.xpose.msk.msra.mxu1 %vm253_vm2, %v1127_v63 }
 0x5f1   : > { %5184 = vmatprep.subr.msk.mxu1 %vm253_vm2, %v1126_v1 }
 0x5f4   : > { %5185 = vmatpush3.xpose.msk.msra.mxu1 %vm253_vm2, %v1126_v1 }
 0x5f5   : > { %5186 = vmatprep.subr.msk.mxu1 %vm253_vm2, %v1125_v2 }
 0x5f8   : > { %5187 = vmatpush3.xpose.msk.msra.mxu1 %vm253_vm2, %v1125_v2 }
 0x5f9   : > { %5210 = vmatprep.subr.msk.mxu1 %vm1463_vm4, %v1455_v17 }
 0x5fb   : > { %5189 = vmatmul.mubr.msk.f32.vlgmr.msra.gmra.mxu1 %vm253_vm2, %v5892_v19  ;;  %v1219_v19 = vpop.f32.mrf.mxu0 }
 0x5fc   : > { %5211 = vmatpush3.msk.msra.mxu1 %vm1463_vm4, %v1455_v17  ;;  %v1242_v43 = vmul.f32 %v1219_v19, %v5922_v57  ;;  %v4780_v17 = vld [vmem:[#allocation2 + $0x3a0] ss:$0 sm:$0xff]  ;;  %v4781_v19 = vld [vmem:[#allocation2 + $0x3a8] ss:$0 sm:$0xff] }
 0x5fd   : > { %v5171_v20 = vpop.f32.mrf.mxu0 }
 0x5fe   : > { %v1245_v22 = vmul.f32 %v5171_v20, %v5910_v51 }
 0x5ff   : > { %v1229_v34 = vpop.f32.mrf.mxu0 }
 0x600   : > { %5215 = vmatprep.subr.mxu1 %v1245_v22  ;;  %v1244_v26 = vmul.f32 %v1229_v34, %v5912_v30  ;;  %v1625_v30 = vld [vmem:[#allocation2 + $0x388] sm:$0xff] }
 0x6bb   : > { %v5190_v3 = vpop.f32.mrf.mxu1 }
 0x6bc   : > { %v1355_v4 = vsel %vm1351_vm3, %v5190_v3, -inf }
 0x6bd   : > { %1356 = vmax.xlane.f32.xlu1 %v1355_v4  ;;  %v1342_v5 = vpop.f32.mrf.mxu1 }
 0x6be   : > { %v1352_v6 = vsel %vm1351_vm3, %v1342_v5, -inf }
 0x6bf   : > { %1353 = vmax.xlane.f32.xlu0 %v1352_v6 }
 0x746   : > { %v1357_v24 = vpop.xlane.xlu1 %1356 }
 0x747   : > { %v1359_v25 = vsub.f32 %v5190_v3, %v1357_v24 }
 0x748   : > { %v1354_v27 = vpop.xlane.xlu0 %1353 }
 0x749   : > { %v1358_v28 = vsub.f32 %v1342_v5, %v1354_v27  ;;  %v1362_v29 = vmul.f32 1.442695, %v1359_v25  ;;  %v1896_v25 = vld [vmem:[#allocation2 + $0x3d0] sm:$0xff]  ;;  %v1895_v27 = vld [vmem:[#allocation2 + $0x3c8] sm:$0xff] }
 0x74b   : > { %v1360_v62 = vmul.f32 1.442695, %v1358_v28  ;;  %v4782_v28 = vld [vmem:[#allocation2 + $0x3c0] ss:$0 sm:$0xff] }
 0x74d   : > { %5597 = vpow2.f32 %v1360_v62 }
 0x74e   : > { %5599 = vpow2.f32 %v1362_v29 }
 0x75a   : > { %v5598_v31 = vpop.eup %5597 }
 0x75b   : > { %v5600_v32 = vpop.eup %5599  ;;  %5207 = vmatprep.mubr.msk.f32.mxu0 %vm1351_vm3, %v5598_v31 }
 0x75c   : > { %5208 = vmatmul.mubr.msk.f32.vlgmr.msra.gmra.mxu0 %vm1351_vm3, %v5600_v32 }
 0x75d   : > { %5235 = vmatpush3.msra.mxu0 %v1626_v53 }
 0x75e   : > { %5236 = vmatprep.subr.mxu0 %v1625_v30 }
 0x75f   : > { %5237 = vmatpush3.msra.mxu0 %v1625_v30 }
 0x760   : > { %5241 = vmatprep.subr.mxu0 %v1756_v7 }
 0x81c   : > { %v5209_v35 = vpop.f32.mrf.mxu0 }
 0x81e   : > { %v1444_v36 = vpop.f32.mrf.mxu0 }
 0x81f   : > { %5601 = vrcp.f32 %v1444_v36 }
 0x820   : > { %5603 = vrcp.f32 %v5209_v35 }
 0x82c   : > { %v5602_v38 = vpop.eup %5601 }
 0x82d   : > { %v5604_v39 = vpop.eup %5603  ;;  %5212 = vmatprep.mubr.msk.f32.mxu1 %vm1456_vm5, %v5602_v38 }
 0x82e   : > { %5213 = vmatmul.mubr.msk.f32.vlgmr.msra.gmra.mxu1 %vm1456_vm5, %v5604_v39 }
 0x82f   : > { %5216 = vmatpush3.msra.mxu1 %v1245_v22 }
 0x830   : > { %5217 = vmatprep.subr.mxu1 %v1244_v26 }
 0x831   : > { %5218 = vmatpush3.msra.mxu1 %v1244_v26 }
 0x832   : > { %5219 = vmatprep.subr.mxu1 %v1243_v42 }
 0x833   : > { %5220 = vmatpush3.msra.mxu1 %v1243_v42 }
 0x834   : > { %5221 = vmatprep.subr.mxu1 %v1242_v43 }
 0x835   : > { %5222 = vmatpush3.msra.mxu1 %v1242_v43 }
 0x836   : > { %5223 = vmatprep.subr.mxu1 %v1241_v44 }
 0x837   : > { %5224 = vmatpush3.msra.mxu1 %v1241_v44 }
 0x838   : > { %5225 = vmatprep.subr.mxu1 %v1240_v45 }
 0x839   : > { %5226 = vmatpush3.msra.mxu1 %v1240_v45 }
 0x83a   : > { %5227 = vmatprep.subr.mxu1 %v1239_v46 }
 0x83b   : > { %5228 = vmatpush3.msra.mxu1 %v1239_v46 }
 0x83c   : > { %5229 = vmatprep.subr.mxu1 %v1238_v8 }
 0x83d   : > { %5230 = vmatpush3.msra.mxu1 %v1238_v8 }
 0x8ee   : > { %v5214_v47 = vpop.f32.mrf.mxu1 }
 0x8ef   : > { %v1543_v51 = vmul.f32 %v5600_v32, %v5214_v47 }
 0x8f0   : > { %v1533_v48 = vpop.f32.mrf.mxu1 }
 0x8f1   : > { %v1542_v49 = vmul.f32 %v5598_v31, %v1533_v48 }
 0x8f3   : > { %5231 = vmatprep.mubr.msk.f32.mxu1 %vm1351_vm3, %v1542_v49 }
 0x8f4   : > { %5232 = vmatmul.mubr.msk.f32.vlgmr.msra.gmra.mxu1 %vm1351_vm3, %v1543_v51 }
 0x9b4   : > { %v5233_v54 = vpop.f32.mrf.mxu1 }
 0x9b6   : > { %v1616_v23 = vpop.f32.mrf.mxu1 }
 0x9b7   : > { %5238 = vmatprep.mubr.msk.f32.mxu0 %vm253_vm2, %v1616_v23 }
 0x9b8   : > { %5239 = vmatmul.mubr.msk.f32.vlgmr.msra.gmra.mxu0 %vm253_vm2, %v5233_v54 }
 0x9b9   : > { %5242 = vmatpush3.msra.mxu0 %v1756_v7 }
 0x9ba   : > { %5243 = vmatprep.subr.mxu0 %v1755_v9 }
 0x9bb   : > { %5244 = vmatpush3.msra.mxu0 %v1755_v9  ;;  %v5732_v9 = vmov -1.0  }
 0x9bc   : > { %5248 = vmatprep.subr.mxu0 %v1896_v25 }
 0xa78   : > { %v5240_v55 = vpop.f32.mrf.mxu0 }
 0xa79   : > { %v1710_v56 = vadd.f32 %v5240_v55, %v4777_v40 }
 0xa7a   : > { %v1704_v57 = vpop.f32.mrf.mxu0 }
 0xa7b   : > { %v5973_v58 = vadd.f32 %v1710_v56, %v5826_v33  ;;  %v1705_v59 = vadd.f32 %v4777_v40, %v1704_v57 }
 0xa7d   : > { %v5976_v60 = vadd.f32 %v1705_v59, %v5830_v37  ;;  %v1720_v61 = vsel %vm253_vm2, %v5973_v58, 0.0 }
 0xa7e   : > { %1721 = vadd.xlane.f32.xlu1 %v1720_v61 }
 0xa7f   : > { %v1717_v63 = vsel %vm253_vm2, %v5976_v60, 0.0 }
 0xa80   : > { %1718 = vadd.xlane.f32.xlu0 %v1717_v63 }
 0xb07   : > { %v1722_v50 = vpop.xlane.xlu1 %1721 }
 0xb08   : > { %v1724_v1 = vmul.f32 0.0625, %v1722_v50 }
 0xb09   : > { %v1719_v52 = vpop.xlane.xlu0 %1718 }
 0xb0a   : > { %v1726_v2 = vsub.f32 %v5973_v58, %v1724_v1  ;;  %v1723_v3 = vmul.f32 0.0625, %v1719_v52 }
 0xb0c   : > { %v1725_v33 = vsub.f32 %v5976_v60, %v1723_v3  ;;  %v1728_v4 = vmul.f32 %v1726_v2, %v1726_v2 }
 0xb0e   : > { %v1732_v37 = vsel %vm253_vm2, %v1728_v4, 0.0  ;;  %v1727_v5 = vmul.f32 %v1725_v33, %v1725_v33 }
 0xb0f   : > { %1733 = vadd.xlane.f32.xlu1 %v1732_v37 }
 0xb10   : > { %v1729_v6 = vsel %vm253_vm2, %v1727_v5, 0.0 }
 0xb11   : > { %1730 = vadd.xlane.f32.xlu0 %v1729_v6 }
 0xb98   : > { %v1734_v11 = vpop.xlane.xlu1 %1733 }
 0xb99   : > { %v1736_v41 = vmul.f32 0.0625, %v1734_v11 }
 0xb9a   : > { %v1731_v12 = vpop.xlane.xlu0 %1730 }
 0xb9b   : > { %v1738_v13 = vadd.f32 1e-05, %v1736_v41  ;;  %v1735_v14 = vmul.f32 0.0625, %v1731_v12 }
 0xb9d   : > { %5605 = vrsqrt.f32 %v1738_v13  ;;  %v1737_v15 = vadd.f32 1e-05, %v1735_v14 }
 0xb9f   : > { %5607 = vrsqrt.f32 %v1737_v15 }
 0xbaa   : > { %v5606_v16 = vpop.eup %5605 }
 0xbab   : > { %v1742_v0 = vmul.f32 %v5606_v16, %v1726_v2 }
 0xbac   : > { %v5608_v21 = vpop.eup %5607 }
 0xbad   : > { %v1741_v10 = vmul.f32 %v5608_v21, %v1725_v33  ;;  %v1748_v18 = vmul.f32 %v4780_v17, %v1742_v0 }
 0xbaf   : > { %v1747_v20 = vmul.f32 %v4780_v17, %v1741_v10  ;;  %v1754_v24 = vadd.f32 %v4781_v19, %v1748_v18 }
 0xbb1   : > { %v1753_v22 = vadd.f32 %v4781_v19, %v1747_v20  ;;  %v5733_v19 = vmov 0.0   ;;  %v1992_v20 = vld [vmem:[#allocation2 + $0x408] sm:$0xff] }
 0xbb2   : > { %5255 = vmatprep.subr.mxu1 %v5733_v19  ;;  %5259 = vmatprep.mubr.msk.f32.mxu1 %vm5734_vm8, %v5733_v19 }
 0xbb3   : > { %5245 = vmatprep.mubr.msk.f32.mxu0 %vm253_vm2, %v1753_v22 }
 0xbb4   : > { %5246 = vmatmul.mubr.msk.f32.vlgmr.msra.gmra.mxu0 %vm253_vm2, %v1754_v24  ;;  %v4787_v24 = vld [vmem:[#allocation2 + $0x3d8] ss:$0 sm:$0xff] }
 0xbb5   : > { %5249 = vmatpush3.msra.mxu0 %v1896_v25 }
 0xbb6   : > { %5250 = vmatprep.subr.mxu0 %v1895_v27 }
 0xbb7   : > { %5251 = vmatpush3.msra.mxu0 %v1895_v27 }
 0xbb8   : > { %5262 = vmatprep.subr.mxu0 %v5733_v19 }
 0xc74   : > { %v5247_v29 = vpop.f32.mrf.mxu0 }
 0xc75   : > { %v1840_v62 = vadd.f32 %v5247_v29, %v4782_v28 }
 0xc76   : > { %v1834_v31 = vpop.f32.mrf.mxu0 }
 0xc77   : > { %v1846_v32 = vmul.f32 0.70710677, %v1840_v62  ;;  %v1835_v34 = vadd.f32 %v4782_v28, %v1834_v31  ;;  %v1844_v21 = vmul.f32 0.5, %v1840_v62  ;;  %v1987_v31 = vld [vmem:[#allocation2 + $0x3e0] sm:$0xff] }
 0xc79   : > { %v1852_v35 = vand.u32 2147483647, %v1846_v32  ;;  %v1845_v36 = vmul.f32 0.70710677, %v1835_v34  ;;  %vm1848_vm6 = vcmp.ge.f32.partialorder %v1846_v32, 0.0  ;;  %v1843_v17 = vmul.f32 0.5, %v1835_v34 }
 0xc7a   : > { %v1850_v11 = vsel %vm1848_vm6, 1.0, %v5732_v9  ;;  %v1988_v32 = vld [vmem:[#allocation2 + $0x3e8] sm:$0xff]  ;;  %v1991_v34 = vld [vmem:[#allocation2 + $0x400] sm:$0xff] }
 0xc7b   : > { %v1854_v38 = vmul.f32 0.3275911, %v1852_v35  ;;  %v1851_v39 = vand.u32 2147483647, %v1845_v36  ;;  %v1878_v44 = vsub.f32 0.0, %v1852_v35  ;;  %vm1847_vm7 = vcmp.ge.f32.partialorder %v1845_v36, 0.0 }
 0xc7c   : > { %v1849_v14 = vsel %vm1847_vm7, 1.0, %v5732_v9 }
 0xc7d   : > { %v1856_v26 = vadd.f32 1.0, %v1854_v38  ;;  %v1853_v42 = vmul.f32 0.3275911, %v1851_v39  ;;  %v1877_v45 = vsub.f32 0.0, %v1851_v39  ;;  %v1880_v46 = vmul.f32 %v1878_v44, %v1852_v35  ;;  %v1994_v35 = vld [vmem:[#allocation2 + $0x418] sm:$0xff]  ;;  %v1993_v38 = vld [vmem:[#allocation2 + $0x410] sm:$0xff] }
 0xc7f   : > { %5609 = vrcp.f32 %v1856_v26  ;;  %v1855_v43 = vadd.f32 1.0, %v1853_v42  ;;  %v1879_v47 = vmul.f32 %v1877_v45, %v1851_v39  ;;  %v1883_v49 = vmul.f32 1.442695, %v1880_v46  ;;  %v1996_v26 = vld [vmem:[#allocation2 + $0x428] sm:$0xff]  ;;  %v1998_v45 = vld [vmem:[#allocation2 + $0x438] sm:$0xff] }
 0xc81   : > { %5611 = vrcp.f32 %v1855_v43  ;;  %v1881_v54 = vmul.f32 1.442695, %v1879_v47  ;;  %v1995_v43 = vld [vmem:[#allocation2 + $0x420] sm:$0xff] }
 0xc82   : > { %5613 = vpow2.f32 %v1883_v49 }
 0xc83   : > { %5615 = vpow2.f32 %v1881_v54 }
 0xc8c   : > { %v5610_v8 = vpop.eup %5609 }
 0xc8d   : > { %v1860_v48 = vmul.f32 1.0614054, %v5610_v8 }
 0xc8e   : > { %v5612_v51 = vpop.eup %5611 }
 0xc8f   : > { %v1862_v53 = vadd.f32 -1.4531521, %v1860_v48  ;;  %v1859_v30 = vmul.f32 1.0614054, %v5612_v51  ;;  %v5614_v33 = vpop.eup %5613 }
 0xc90   : > { %v5616_v6 = vpop.eup %5615 }
 0xc91   : > { %v1864_v23 = vmul.f32 %v5610_v8, %v1862_v53  ;;  %v1861_v40 = vadd.f32 -1.4531521, %v1859_v30  ;;  %v4788_v30 = vld [vmem:[#allocation2 + $0x440] ss:$0 sm:$0xff] }
 0xc93   : > { %v1866_v55 = vadd.f32 1.4214138, %v1864_v23  ;;  %v1863_v56 = vmul.f32 %v5612_v51, %v1861_v40 }
 0xc95   : > { %v1868_v57 = vmul.f32 %v5610_v8, %v1866_v55  ;;  %v1865_v59 = vadd.f32 1.4214138, %v1863_v56 }
 0xc97   : > { %v1870_v61 = vadd.f32 -0.28449672, %v1868_v57  ;;  %v1867_v63 = vmul.f32 %v5612_v51, %v1865_v59 }
 0xc99   : > { %v1872_v50 = vmul.f32 %v5610_v8, %v1870_v61  ;;  %v1869_v1 = vadd.f32 -0.28449672, %v1867_v63 }
 0xc9b   : > { %v1874_v52 = vadd.f32 0.2548296, %v1872_v50  ;;  %v1871_v2 = vmul.f32 %v5612_v51, %v1869_v1 }
 0xc9d   : > { %v1876_v3 = vmul.f32 %v5610_v8, %v1874_v52  ;;  %v1873_v4 = vadd.f32 0.2548296, %v1871_v2  ;;  %v1997_v8 = vld [vmem:[#allocation2 + $0x430] sm:$0xff] }
 0xc9f   : > { %v1886_v37 = vmul.f32 %v5614_v33, %v1876_v3  ;;  %v1875_v5 = vmul.f32 %v5612_v51, %v1873_v4 }
 0xca1   : > { %v1888_v7 = vsub.f32 1.0, %v1886_v37  ;;  %v1885_v41 = vmul.f32 %v5616_v6, %v1875_v5  ;;  %v2622_v37 = vld [vmem:[#allocation2 + $0x458] sm:$0x1]  ;;  %v6040_v5 = vld [vmem:[#allocation2 + $0x468] sm:$0x1f] }
 0xca3   : > { %v1890_v12 = vmul.f32 %v1888_v7, %v1850_v11  ;;  %v1887_v13 = vsub.f32 1.0, %v1885_v41 }
 0xca5   : > { %v1889_v15 = vmul.f32 %v1887_v13, %v1849_v14  ;;  %v1892_v16 = vadd.f32 1.0, %v1890_v12  ;;  %v4797_v12 = vld [vmem:[#allocation2 + $0x448] ss:$0 sm:$0xff]  ;;  %v4798_v14 = vld [vmem:[#allocation2 + $0x450] ss:$0 sm:$0xff] }
 0xca7   : > { %v1891_v0 = vadd.f32 1.0, %v1889_v15  ;;  %v1894_v18 = vmul.f32 %v1892_v16, %v1844_v21 }
 0xca9   : > { %v1893_v10 = vmul.f32 %v1891_v0, %v1843_v17  ;;  %v6048_v17 = vld [vmem:[#allocation2 + $0x460] sm:$0x1f] }
 0xcab   : > { %5252 = vmatprep.mubr.msk.f32.mxu0 %vm253_vm2, %v1893_v10 }
 0xcac   : > { %5253 = vmatmul.mubr.msk.f32.vlgmr.msra.gmra.mxu0 %vm253_vm2, %v1894_v18 }
 0xcad   : > { %5266 = vmatprep.mubr.msk.f32.mxu0 %vm5734_vm8, %v5733_v19  ;;  %5263 = vmatpush3.msra.mxu0 %v1992_v20 }
 0xcae   : > { %5264 = vmatprep.subr.mxu0 %v5733_v19 }
 0xcaf   : > { %5265 = vmatpush3.msra.mxu0 %v1991_v34 }
 0xcb0   : > { %5276 = vmatprep.subr.mxu0 %v5733_v19 }
 0xd6c   : > { %v5254_v22 = vpop.f32.mrf.mxu0 }
 0xd6d   : > { %v1979_v25 = vadd.f32 %v5254_v22, %v5973_v58  ;;  %v1989_v58 = vld [vmem:[#allocation2 + $0x3f0] sm:$0xff] }
 0xd6e   : > { %v1969_v27 = vpop.f32.mrf.mxu0 }
 0xd6f   : > { %v1986_v28 = vadd.f32 %v4787_v24, %v1979_v25  ;;  %v1978_v29 = vadd.f32 %v1969_v27, %v5976_v60  ;;  %v1990_v60 = vld [vmem:[#allocation2 + $0x3f8] sm:$0xff] }
 0xd71   : > { %v1985_v62 = vadd.f32 %v4787_v24, %v1978_v29  ;;  %5256 = vmatpush3.msra.mxu1 %v1986_v28 }
 0xd72   : > { %5257 = vmatprep.subr.mxu1 %v5733_v19 }
 0xd73   : > { %5258 = vmatpush3.msra.mxu1 %v1985_v62 }
 0xd74   : > { %5260 = vmatmul.mubr.msk.f32.vlgmr.msra.gmra.mxu1 %vm253_vm2, %v1987_v31  ;;  %5269 = vmatprep.subr.mxu1 %v5733_v19 }
 0xd75   : > { %5270 = vmatpush3.msra.mxu1 %v1986_v28  ;;  %5273 = vmatprep.mubr.msk.f32.mxu1 %vm5734_vm8, %v5733_v19 }
 0xd76   : > { %5271 = vmatprep.subr.mxu1 %v5733_v19 }
 0xd77   : > { %5272 = vmatpush3.msra.mxu1 %v1985_v62 }
 0xd78   : > { %5274 = vmatmul.mubr.msk.f32.vlgmr.msra.gmra.mxu1 %vm253_vm2, %v1988_v32  ;;  %5283 = vmatprep.subr.mxu1 %v5733_v19 }
 0xd79   : > { %5284 = vmatpush3.msra.mxu1 %v1986_v28  ;;  %5287 = vmatprep.mubr.msk.f32.mxu1 %vm5734_vm8, %v5733_v19 }
 0xd7a   : > { %5285 = vmatprep.subr.mxu1 %v5733_v19 }
 0xd7b   : > { %5286 = vmatpush3.msra.mxu1 %v1985_v62 }
 0xd7c   : > { %5288 = vmatmul.mubr.msk.f32.vlgmr.msra.gmra.mxu1 %vm253_vm2, %v1989_v58  ;;  %5297 = vmatprep.subr.mxu1 %v5733_v19 }
 0xd7d   : > { %5298 = vmatpush3.msra.mxu1 %v1986_v28  ;;  %5301 = vmatprep.mubr.msk.f32.mxu1 %vm5734_vm8, %v5733_v19 }
 0xd7e   : > { %5299 = vmatprep.subr.mxu1 %v5733_v19 }
 0xd7f   : > { %5300 = vmatpush3.msra.mxu1 %v1985_v62 }
 0xd80   : > { %5302 = vmatmul.mubr.msk.f32.vlgmr.msra.gmra.mxu1 %vm253_vm2, %v1990_v60  ;;  %5311 = vmatprep.subr.mxu1 %v5733_v19  ;;  %v4803_v60 = vld [vmem:[#allocation2 + $0x470] ss:$0 sm:$0xff] }
 0xd81   : > { %5313 = vmatprep.mubr.msk.f32.mxu1 %vm5734_vm8, %v5733_v19  ;;  %5312 = vmatpush3.msk.msra.mxu1 %vm2627_vm10, %v2622_v37  ;;  %v2956_v37 = vld [vmem:[#allocation2 + $0x4e8] sm:$0xff] }
 0xd82   : > { %5321 = vmatprep.subr.mxu1 %v5733_v19 }
 0xd84   : > { %5314 = vmatmul.mubr.msk.f32.vlgmr.msra.gmra.mxu1 %vm2623_vm11, %v6040_v5 }
 0xd85   : > { %5323 = vmatprep.mubr.msk.f32.mxu1 %vm5734_vm8, %v5733_v19 }
 0xe34   : > { %v2074_v36 = vpop.f32.mrf.mxu1 }
 0xe35   : > { %5267 = vmatmul.mubr.msk.f32.vlgmr.msra.gmra.mxu0 %vm253_vm2, %v2074_v36 }
 0xe36   : > { %v5261_v39 = vpop.f32.mrf.mxu1  ;;  %5277 = vmatpush3.msra.mxu0 %v1994_v35  ;;  %5280 = vmatprep.mubr.msk.f32.mxu0 %vm5734_vm8, %v5733_v19  ;;  %v4804_v35 = vld [vmem:[#allocation2 + $0x478] ss:$0 sm:$0xff] }
 0xe37   : > { %5278 = vmatprep.subr.mxu0 %v5733_v19  ;;  %v2803_v39 = vld [vmem:[#allocation2 + $0x480] sm:$0xff] }
 0xe38   : > { %v2221_v42 = vpop.f32.mrf.mxu1  ;;  %5279 = vmatpush3.msra.mxu0 %v1993_v38 }
 0xe39   : > { %5281 = vmatmul.mubr.msk.f32.vlgmr.msra.gmra.mxu0 %vm253_vm2, %v2221_v42  ;;  %5290 = vmatprep.subr.mxu0 %v5733_v19  ;;  %v2805_v42 = vld [vmem:[#allocation2 + $0x490] sm:$0xff] }
 0xe3a   : > { %v5275_v44 = vpop.f32.mrf.mxu1  ;;  %5291 = vmatpush3.msra.mxu0 %v1996_v26  ;;  %5294 = vmatprep.mubr.msk.f32.mxu0 %vm5734_vm8, %v5733_v19  ;;  %v2804_v26 = vld [vmem:[#allocation2 + $0x488] sm:$0xff] }
 0xe3b   : > { %5292 = vmatprep.subr.mxu0 %v5733_v19  ;;  %v2807_v44 = vld [vmem:[#allocation2 + $0x4a0] sm:$0xff] }
 0xe3c   : > { %v2368_v46 = vpop.f32.mrf.mxu1  ;;  %5293 = vmatpush3.msra.mxu0 %v1995_v43  ;;  %v2806_v43 = vld [vmem:[#allocation2 + $0x498] sm:$0xff] }
 0xe3d   : > { %5295 = vmatmul.mubr.msk.f32.vlgmr.msra.gmra.mxu0 %vm253_vm2, %v2368_v46  ;;  %5304 = vmatprep.subr.mxu0 %v5733_v19  ;;  %v2809_v46 = vld [vmem:[#allocation2 + $0x4b0] sm:$0xff] }
 0xe3e   : > { %v5289_v47 = vpop.f32.mrf.mxu1  ;;  %5305 = vmatpush3.msra.mxu0 %v1998_v45  ;;  %5308 = vmatprep.mubr.msk.f32.mxu0 %vm5734_vm8, %v5733_v19  ;;  %v2808_v45 = vld [vmem:[#allocation2 + $0x4a8] sm:$0xff] }
 0xe3f   : > { %5306 = vmatprep.subr.mxu0 %v5733_v19  ;;  %v2811_v47 = vld [vmem:[#allocation2 + $0x4c0] sm:$0xff] }
 0xe40   : > { %v2515_v48 = vpop.f32.mrf.mxu1  ;;  %5307 = vmatpush3.msra.mxu0 %v1997_v8  ;;  %v2810_v8 = vld [vmem:[#allocation2 + $0x4b8] sm:$0xff] }
 0xe41   : > { %5309 = vmatmul.mubr.msk.f32.vlgmr.msra.gmra.mxu0 %vm253_vm2, %v2515_v48  ;;  %5316 = vmatprep.subr.mxu0 %v5733_v19  ;;  %v2981_v48 = vld [vmem:[#allocation2 + $0x528] sm:$0xff]  ;;  %vm4043_vm2 = vcmask 64512  }
 0xe42   : > { %v5303_v49 = vpop.f32.mrf.mxu1  ;;  %5318 = vmatprep.mubr.msk.f32.mxu0 %vm5734_vm8, %v5733_v19 }
 0xe43   : > { %v2980_v49 = vld [vmem:[#allocation2 + $0x520] sm:$0xff] }
 0xe44   : > { %v2697_v0 = vpop.f32.mrf.mxu1 }
 0xe46   : > { %v5315_v21 = vpop.f32.mrf.mxu1 }
 0xef5   : > { %v2147_v51 = vpop.f32.mrf.mxu0 }
 0xef6   : > { %v2151_v40 = vadd.f32 %v4788_v30, %v2147_v51  ;;  %v2979_v51 = vld [vmem:[#allocation2 + $0x518] sm:$0xff] }
 0xef7   : > { %v5268_v53 = vpop.f32.mrf.mxu0 }
 0xef8   : > { %v2978_v53 = vld [vmem:[#allocation2 + $0x510] sm:$0xff] }
 0xef9   : > { %v2294_v54 = vpop.f32.mrf.mxu0 }
 0xefa   : > { %v2298_v56 = vadd.f32 %v2294_v54, %v2151_v40 }
 0xefb   : > { %v5282_v23 = vpop.f32.mrf.mxu0 }
 0xefd   : > { %v2441_v55 = vpop.f32.mrf.mxu0 }
 0xefe   : > { %v2445_v59 = vadd.f32 %v2441_v55, %v2298_v56 }
 0xeff   : > { %v5296_v57 = vpop.f32.mrf.mxu0 }
 0xf01   : > { %v2588_v61 = vpop.f32.mrf.mxu0 }
 0xf02   : > { %v2592_v63 = vadd.f32 %v2588_v61, %v2445_v59  ;;  %v2953_v59 = vld [vmem:[#allocation2 + $0x4d0] sm:$0xff] }
 0xf03   : > { %v5310_v50 = vpop.f32.mrf.mxu0 }
 0xf04   : > { %v2596_v1 = vsel %vm2595_vm9, %v2592_v63, 0.0  ;;  %v2954_v50 = vld [vmem:[#allocation2 + $0x4d8] sm:$0xff] }
 0xf05   : > { %2597 = vadd.xlane.f32.xlu0 %v2596_v1 }
 0xf8e   : > { %v2598_v52 = vpop.xlane.xlu0 %2597 }
 0xf8f   : > { %v2600_v2 = vmul.f32 0.03125, %v2598_v52 }
 0xf91   : > { %v2601_v3 = vsub.f32 %v2592_v63, %v2600_v2  ;;  %v2952_v63 = vld [vmem:[#allocation2 + $0x4c8] sm:$0xff]  ;;  %v2955_v2 = vld [vmem:[#allocation2 + $0x4e0] sm:$0xff] }
 0xf93   : > { %v2602_v33 = vmul.f32 %v2601_v3, %v2601_v3 }
 0xf95   : > { %v2603_v4 = vsel %vm2595_vm9, %v2602_v33, 0.0 }
 0xf96   : > { %2604 = vadd.xlane.f32.xlu1 %v2603_v4 }
0x101f   : > { %v2605_v6 = vpop.xlane.xlu1 %2604 }
0x1020   : > { %v2606_v7 = vmul.f32 0.03125, %v2605_v6 }
0x1022   : > { %v2607_v11 = vadd.f32 1e-05, %v2606_v7 }
0x1024   : > { %5617 = vrsqrt.f32 %v2607_v11 }
0x1031   : > { %v5618_v41 = vpop.eup %5617 }
0x1032   : > { %v2609_v13 = vmul.f32 %v5618_v41, %v2601_v3  ;;  %v3062_v41 = vld [vmem:[#allocation2 + $0x540] sm:$0xff] }
0x1034   : > { %v2614_v15 = vmul.f32 %v4797_v12, %v2609_v13  ;;  %v2957_v12 = vld [vmem:[#allocation2 + $0x4f0] sm:$0xff] }
0x1036   : > { %v2619_v16 = vadd.f32 %v4798_v14, %v2614_v15 }
0x1038   : > { %5317 = vmatpush3.msk.msra.mxu0 %vm1463_vm4, %v2619_v16  ;;  %v3061_v16 = vld [vmem:[#allocation2 + $0x538] sm:$0xff] }
0x1039   : > { %5319 = vmatmul.mubr.msk.f32.vlgmr.msra.gmra.mxu0 %vm1456_vm5, %v6048_v17  ;;  %5350 = vmatprep.subr.mxu0 %v5733_v19 }
0x103a   : > { %5358 = vmatprep.mubr.msk.f32.mxu0 %vm5734_vm8, %v5733_v19  ;;  %5351 = vmatpush3.msra.mxu0 %v2981_v48 }
0x103b   : > { %5352 = vmatprep.subr.mxu0 %v5733_v19 }
0x103c   : > { %5353 = vmatpush3.msra.mxu0 %v2980_v49  ;;  %v3171_v49 = vld [vmem:[#allocation2 + $0x5b8] sm:$0xff] }
0x103d   : > { %5354 = vmatprep.subr.mxu0 %v5733_v19 }
0x103e   : > { %5355 = vmatpush3.msra.mxu0 %v2979_v51  ;;  %v3067_v51 = vld [vmem:[#allocation2 + $0x568] sm:$0xff] }
0x103f   : > { %5356 = vmatprep.subr.mxu0 %v5733_v19 }
0x1040   : > { %5357 = vmatpush3.msra.mxu0 %v2978_v53 }
0x1041   : > { %5361 = vmatprep.subr.mxu0 %v5733_v19 }
0x10f9   : > { %v2773_v10 = vpop.f32.mrf.mxu0 }
0x10fa   : > { %v6056_v18 = vadd.f32 %v2773_v10, %v2697_v0  ;;  %v3063_v0 = vld [vmem:[#allocation2 + $0x548] sm:$0xff]  ;;  %v2958_v10 = vld [vmem:[#allocation2 + $0x4f8] sm:$0xff] }
0x10fb   : > { %v5320_v20 = vpop.f32.mrf.mxu0 }
0x10fc   : > { %v2780_v22 = vsel %vm2779_vm12, %v6056_v18, 0.0 }
0x10fd   : > { %2781 = vadd.xlane.f32.xlu0 %v2780_v22 }
0x1186   : > { %v2782_v24 = vpop.xlane.xlu0 %2781 }
0x1187   : > { %v2783_v25 = vmul.f32 0.03125, %v2782_v24 }
0x1189   : > { %v2784_v27 = vsub.f32 %v6056_v18, %v2783_v25  ;;  %v3064_v25 = vld [vmem:[#allocation2 + $0x550] sm:$0xff] }
0x118b   : > { %v2785_v28 = vmul.f32 %v2784_v27, %v2784_v27 }
0x118d   : > { %v2786_v29 = vsel %vm2779_vm12, %v2785_v28, 0.0  ;;  %v2959_v28 = vld [vmem:[#allocation2 + $0x500] sm:$0xff] }
0x118e   : > { %2787 = vadd.xlane.f32.xlu1 %v2786_v29 }
0x1217   : > { %v2788_v62 = vpop.xlane.xlu1 %2787 }
0x1218   : > { %v2789_v31 = vmul.f32 0.03125, %v2788_v62 }
0x121a   : > { %v2790_v32 = vadd.f32 1e-05, %v2789_v31 }
0x121c   : > { %5619 = vrsqrt.f32 %v2790_v32 }
0x1229   : > { %v5620_v58 = vpop.eup %5619 }
0x122a   : > { %v2792_v34 = vmul.f32 %v5620_v58, %v2784_v27  ;;  %v3065_v58 = vld [vmem:[#allocation2 + $0x558] sm:$0xff] }
0x122c   : > { %v2797_v36 = vmul.f32 %v4803_v60, %v2792_v34 }
0x122e   : > { %v6062_v38 = vadd.f32 %v4804_v35, %v2797_v36  ;;  %v3170_v35 = vld [vmem:[#allocation2 + $0x5b0] sm:$0xff] }
0x1230   : > { %5322 = vmatpush3.msk.msra.mxu1 %vm1463_vm4, %v6062_v38 }
0x1231   : > { %5324 = vmatmul.mubr.msk.f32.vlgmr.msra.gmra.mxu1 %vm1456_vm5, %v2803_v39  ;;  %5398 = vmatprep.subr.mxu1 %v5733_v19 }
0x1232   : > { %5326 = vmatprep.mubr.msk.f32.mxu1 %vm5734_vm8, %v5733_v19 }
0x1235   : > { %5327 = vmatmul.mubr.msk.f32.gmra.mxu1 %vm1456_vm5, %v2804_v26 }
0x1236   : > { %5329 = vmatprep.mubr.msk.f32.mxu1 %vm5734_vm8, %v5733_v19 }
0x1239   : > { %5330 = vmatmul.mubr.msk.f32.gmra.mxu1 %vm1456_vm5, %v2805_v42  ;;  %v3066_v42 = vld [vmem:[#allocation2 + $0x560] sm:$0xff] }
0x123a   : > { %5332 = vmatprep.mubr.msk.f32.mxu1 %vm5734_vm8, %v5733_v19 }
0x123d   : > { %5333 = vmatmul.mubr.msk.f32.gmra.mxu1 %vm1456_vm5, %v2806_v43 }
0x123e   : > { %5335 = vmatprep.mubr.msk.f32.mxu1 %vm5734_vm8, %v5733_v19 }
0x1241   : > { %5336 = vmatmul.mubr.msk.f32.gmra.mxu1 %vm1456_vm5, %v2807_v44  ;;  %v2960_v44 = vld [vmem:[#allocation2 + $0x508] sm:$0xff] }
0x1242   : > { %5338 = vmatprep.mubr.msk.f32.mxu1 %vm5734_vm8, %v5733_v19 }
0x1245   : > { %5339 = vmatmul.mubr.msk.f32.gmra.mxu1 %vm1456_vm5, %v2808_v45  ;;  %v3169_v45 = vld [vmem:[#allocation2 + $0x5a8] sm:$0xff] }
0x1246   : > { %5341 = vmatprep.mubr.msk.f32.mxu1 %vm5734_vm8, %v5733_v19 }
0x1249   : > { %5342 = vmatmul.mubr.msk.f32.gmra.mxu1 %vm1456_vm5, %v2809_v46 }
0x124a   : > { %5344 = vmatprep.mubr.msk.f32.mxu1 %vm5734_vm8, %v5733_v19 }
0x124d   : > { %5345 = vmatmul.mubr.msk.f32.gmra.mxu1 %vm1456_vm5, %v2810_v8 }
0x124e   : > { %5347 = vmatprep.mubr.msk.f32.mxu1 %vm5734_vm8, %v5733_v19 }
0x1251   : > { %5348 = vmatmul.mubr.msk.f32.gmra.mxu1 %vm1456_vm5, %v2811_v47 }
0x1252   : > { %5400 = vmatprep.mubr.msk.f32.mxu1 %vm5734_vm8, %v5733_v19 }
0x12f1   : > { %v2908_v30 = vpop.f32.mrf.mxu1 }
0x12f2   : > { %v2961_v33 = vmul.f32 %v2952_v63, %v2908_v30  ;;  %v3070_v29 = vmul.f32 %v3061_v16, %v2908_v30  ;;  %v3172_v63 = vld [vmem:[#allocation2 + $0x5c0] sm:$0xff] }
0x12f3   : > { %v5325_v54 = vpop.f32.mrf.mxu1 }
0x12f5   : > { %v2913_v23 = vpop.f32.mrf.mxu1 }
0x12f6   : > { %v2962_v52 = vmul.f32 %v2953_v59, %v2913_v23  ;;  %v3071_v20 = vmul.f32 %v3062_v41, %v2913_v23  ;;  %v3179_v48 = vmul.f32 %v3170_v35, %v2913_v23  ;;  %v3090_v23 = vld [vmem:[#allocation2 + $0x598] sm:$0xff] }
0x12f7   : > { %v5328_v40 = vpop.f32.mrf.mxu1  ;;  %v3196_v35 = vld [vmem:[#allocation2 + $0x5f8] sm:$0xff] }
0x12f8   : > { %v2970_v7 = vadd.f32 %v2962_v52, %v2961_v33  ;;  %v3079_v34 = vadd.f32 %v3071_v20, %v3070_v29 }
0x12f9   : > { %v6098_v55 = vpop.f32.mrf.mxu1 }
0x12fa   : > { %v2963_v4 = vmul.f32 %v2954_v50, %v6098_v55  ;;  %v3072_v62 = vmul.f32 %v3063_v0, %v6098_v55  ;;  %v3068_v50 = vld [vmem:[#allocation2 + $0x570] sm:$0xff] }
0x12fb   : > { %v5331_v56 = vpop.f32.mrf.mxu1 }
0x12fc   : > { %v2971_v14 = vadd.f32 %v2970_v7, %v2963_v4  ;;  %v3080_v46 = vadd.f32 %v3079_v34, %v3072_v62  ;;  %v3069_v7 = vld [vmem:[#allocation2 + $0x578] sm:$0xff]  ;;  %v3198_v62 = vld [vmem:[#allocation2 + $0x608] sm:$0xff] }
0x12fd   : > { %v6100_v57 = vpop.f32.mrf.mxu1 }
0x12fe   : > { %v2964_v11 = vmul.f32 %v2955_v2, %v6100_v57  ;;  %v3073_v36 = vmul.f32 %v3064_v25, %v6100_v57  ;;  %v3180_v2 = vmul.f32 %v3171_v49, %v6098_v55  ;;  %v3181_v41 = vmul.f32 %v3172_v63, %v6100_v57  ;;  %v3175_v57 = vld [vmem:[#allocation2 + $0x5d8] sm:$0xff]  ;;  %v3087_v25 = vld [vmem:[#allocation2 + $0x580] sm:$0xff] }
0x12ff   : > { %v5334_v61 = vpop.f32.mrf.mxu1 }
0x1300   : > { %v2972_v22 = vadd.f32 %v2971_v14, %v2964_v11  ;;  %v3081_v54 = vadd.f32 %v3080_v46, %v3073_v36  ;;  %v3178_v61 = vmul.f32 %v3169_v45, %v2908_v30  ;;  %v3089_v30 = vld [vmem:[#allocation2 + $0x590] sm:$0xff]  ;;  %v3277_v36 = vmul.f32 0.25, %v6062_v38 }
0x1301   : > { %v6102_v1 = vpop.f32.mrf.mxu1  ;;  %v3174_v14 = vld [vmem:[#allocation2 + $0x5d0] sm:$0xff] }
0x1302   : > { %v2965_v15 = vmul.f32 %v2956_v37, %v6102_v1  ;;  %v3074_v8 = vmul.f32 %v3065_v58, %v6102_v1  ;;  %v3173_v37 = vld [vmem:[#allocation2 + $0x5c8] sm:$0xff]  ;;  %v3187_v11 = vadd.f32 %v3179_v48, %v3178_v61 }
0x1303   : > { %v5337_v3 = vpop.f32.mrf.mxu1 }
0x1304   : > { %v2973_v31 = vadd.f32 %v2972_v22, %v2965_v15  ;;  %v3082_v3 = vadd.f32 %v3081_v54, %v3074_v8  ;;  %v3188_v55 = vadd.f32 %v3187_v11, %v3180_v2  ;;  %v3182_v15 = vmul.f32 %v3173_v37, %v6102_v1  ;;  %v3647_v11 = vld [vmem:[#allocation2 + $0x630] sm:$0xff] }
0x1305   : > { %v6105_v6 = vpop.f32.mrf.mxu1  ;;  %v3425_v8 = vrot.slane %v6062_v38, 4 }
0x1306   : > { %v2966_v24 = vmul.f32 %v2957_v12, %v6105_v6  ;;  %v3075_v40 = vmul.f32 %v3066_v42, %v6105_v6  ;;  %v3189_v20 = vadd.f32 %v3188_v55, %v3181_v41  ;;  %v3183_v22 = vmul.f32 %v3174_v14, %v6105_v6  ;;  %v3197_v6 = vld [vmem:[#allocation2 + $0x600] sm:$0xff]  ;;  %v3648_v41 = vld [vmem:[#allocation2 + $0x638] sm:$0xff] }
0x1307   : > { %v5340_v13 = vpop.f32.mrf.mxu1  ;;  %v3279_v42 = vrot.slane %v3277_v36, 4  ;;  %v3964_v36 = vld [vmem:[#allocation2 + $0x678] sm:$0xff] }
0x1308   : > { %v2974_v39 = vadd.f32 %v2973_v31, %v2966_v24  ;;  %v3083_v12 = vadd.f32 %v3082_v3, %v3075_v40  ;;  %v3177_v31 = vld [vmem:[#allocation2 + $0x5e8] sm:$0xff]  ;;  %v3644_v3 = vld [vmem:[#allocation2 + $0x618] sm:$0xff] }
0x1309   : > { %v6109_v21 = vpop.f32.mrf.mxu1 }
0x130a   : > { %v2967_v32 = vmul.f32 %v2958_v10, %v6109_v21  ;;  %v3076_v33 = vmul.f32 %v3067_v51, %v6109_v21  ;;  %v3088_v10 = vld [vmem:[#allocation2 + $0x588] sm:$0xff]  ;;  %v3184_v29 = vmul.f32 %v3175_v57, %v6109_v21  ;;  %v4819_v51 = vld [vmem:[#allocation2 + $0x610] ss:$0 sm:$0xff] }
0x130b   : > { %v5343_v27 = vpop.f32.mrf.mxu1 }
0x130c   : > { %v2975_v47 = vadd.f32 %v2974_v39, %v2967_v32  ;;  %v3084_v16 = vadd.f32 %v3083_v12, %v3076_v33  ;;  %v3176_v27 = vld [vmem:[#allocation2 + $0x5e0] sm:$0xff] }
0x130d   : > { %v6114_v60 = vpop.f32.mrf.mxu1 }
0x130e   : > { %v2968_v26 = vmul.f32 %v2959_v28, %v6114_v60  ;;  %v3077_v13 = vmul.f32 %v3068_v50, %v6114_v60  ;;  %v3190_v28 = vadd.f32 %v3189_v20, %v3182_v15  ;;  %v3185_v58 = vmul.f32 %v3176_v27, %v6114_v60  ;;  %v3195_v60 = vld [vmem:[#allocation2 + $0x5f0] sm:$0xff] }
0x130f   : > { %v5346_v43 = vpop.f32.mrf.mxu1  ;;  %v3651_v27 = vld [vmem:[#allocation2 + $0x650] sm:$0xff] }
0x1310   : > { %v2976_v56 = vadd.f32 %v2975_v47, %v2968_v26  ;;  %v3085_v24 = vadd.f32 %v3084_v16, %v3077_v13  ;;  %v3191_v32 = vadd.f32 %v3190_v28, %v3183_v22  ;;  %v4815_v43 = vld [vmem:[#allocation2 + $0x530] ss:$0 sm:$0xff]  ;;  %v4817_v47 = vld [vmem:[#allocation2 + $0x5a0] ss:$0 sm:$0xff]  ;;  %v3652_v22 = vld [vmem:[#allocation2 + $0x658] sm:$0xff] }
0x1311   : > { %v2948_v53 = vpop.f32.mrf.mxu1 }
0x1312   : > { %v2969_v59 = vmul.f32 %v2960_v44, %v2948_v53  ;;  %v3078_v0 = vmul.f32 %v3069_v7, %v2948_v53  ;;  %v3192_v34 = vadd.f32 %v3191_v32, %v3184_v29  ;;  %v3186_v21 = vmul.f32 %v3177_v31, %v2948_v53  ;;  %v3650_v29 = vld [vmem:[#allocation2 + $0x648] sm:$0xff] }
0x1313   : > { %v5349_v52 = vpop.f32.mrf.mxu1 }
0x1314   : > { %v2977_v4 = vadd.f32 %v2976_v56, %v2969_v59  ;;  %v3086_v1 = vadd.f32 %v3085_v24, %v3078_v0  ;;  %v3193_v39 = vadd.f32 %v3192_v34, %v3185_v58 }
0x1316   : > { %5359 = vmatmul.mubr.msk.f32.vlgmr.msra.gmra.mxu0 %vm2987_vm13, %v2977_v4  ;;  %v3194_v26 = vadd.f32 %v3193_v39, %v3186_v21  ;;  %v3966_v21 = vld [vmem:[#allocation2 + $0x688] sm:$0xff]  ;;  %v3963_v39 = vld [vmem:[#allocation2 + $0x670] sm:$0xff] }
0x1317   : > { %5362 = vmatpush3.msra.mxu0 %v3090_v23  ;;  %5369 = vmatprep.mubr.msk.f32.mxu0 %vm5734_vm8, %v5733_v19  ;;  %v3646_v23 = vld [vmem:[#allocation2 + $0x628] sm:$0xff] }
0x1318   : > { %5363 = vmatprep.subr.mxu0 %v5733_v19 }
0x1319   : > { %5364 = vmatpush3.msra.mxu0 %v3089_v30 }
0x131a   : > { %5365 = vmatprep.subr.mxu0 %v5733_v19 }
0x131b   : > { %5366 = vmatpush3.msra.mxu0 %v3088_v10  ;;  %v3653_v10 = vld [vmem:[#allocation2 + $0x660] sm:$0xff] }
0x131c   : > { %5367 = vmatprep.subr.mxu0 %v5733_v19 }
0x131d   : > { %5368 = vmatpush3.msra.mxu0 %v3087_v25 }
0x131e   : > { %5370 = vmatmul.mubr.msk.f32.vlgmr.msra.gmra.mxu0 %vm2987_vm13, %v3086_v1  ;;  %5372 = vmatprep.subr.mxu0 %v5733_v19 }
0x131f   : > { %5373 = vmatpush3.msra.mxu0 %v3198_v62  ;;  %5380 = vmatprep.mubr.msk.f32.mxu0 %vm5734_vm8, %v5733_v19  ;;  %v3649_v62 = vld [vmem:[#allocation2 + $0x640] sm:$0xff] }
0x1320   : > { %5374 = vmatprep.subr.mxu0 %v5733_v19 }
0x1321   : > { %5375 = vmatpush3.msra.mxu0 %v3197_v6 }
0x1322   : > { %5376 = vmatprep.subr.mxu0 %v5733_v19 }
0x1323   : > { %5377 = vmatpush3.msra.mxu0 %v3196_v35  ;;  %v3965_v35 = vld [vmem:[#allocation2 + $0x680] sm:$0xff] }
0x1324   : > { %5378 = vmatprep.subr.mxu0 %v5733_v19 }
0x1325   : > { %5379 = vmatpush3.msra.mxu0 %v3195_v60  ;;  %v3962_v60 = vld [vmem:[#allocation2 + $0x668] sm:$0xff] }
0x1326   : > { %5381 = vmatmul.mubr.msk.f32.vlgmr.msra.gmra.mxu0 %vm2987_vm13, %v3194_v26  ;;  %5383 = vmatprep.subr.mxu0 %v5733_v19 }
0x1327   : > { %5384 = vmatpush3.msk.msra.mxu0 %vm2627_vm10, %v3279_v42  ;;  %5385 = vmatprep.mubr.msk.f32.mxu0 %vm5734_vm8, %v5733_v19 }
0x1328   : > { %5388 = vmatprep.subr.mxu0 %v5733_v19 }
0x132a   : > { %5386 = vmatmul.mubr.msk.f32.vlgmr.msra.gmra.mxu0 %vm2623_vm11, %v6040_v5 }
0x132b   : > { %5390 = vmatprep.mubr.msk.f32.mxu0 %vm5734_vm8, %v5733_v19 }
0x13d6   : > { %v3057_v44 = vpop.f32.mrf.mxu0 }
0x13d7   : > { %v3058_v45 = vadd.f32 %v4815_v43, %v3057_v44 }
0x13d8   : > { %v5360_v46 = vpop.f32.mrf.mxu0 }
0x13d9   : > { %5389 = vmatpush3.msk.msra.mxu0 %vm1463_vm4, %v3058_v45 }
0x13da   : > { %5393 = vmatprep.subr.mxu0 %v5733_v19  ;;  %5391 = vmatmul.mubr.msk.f32.vlgmr.msra.gmra.mxu0 %vm1456_vm5, %v6048_v17 }
0x13db   : > { %5394 = vmatpush3.msk.msra.mxu0 %vm2627_vm10, %v3425_v8  ;;  %5395 = vmatprep.mubr.msk.f32.mxu0 %vm5734_vm8, %v5733_v19 }
0x13dc   : > { %5403 = vmatprep.subr.mxu0 %v5733_v19 }
0x13de   : > { %v3165_v48 = vpop.f32.mrf.mxu0  ;;  %5396 = vmatmul.mubr.msk.f32.vlgmr.msra.gmra.mxu0 %vm2623_vm11, %v6040_v5 }
0x13df   : > { %v3166_v49 = vadd.f32 %v4817_v47, %v3165_v48  ;;  %5405 = vmatprep.mubr.msk.f32.mxu0 %vm5734_vm8, %v5733_v19 }
0x13e0   : > { %v5371_v38 = vpop.f32.mrf.mxu0 }
0x13e1   : > { %5399 = vmatpush3.msk.msra.mxu1 %vm1463_vm4, %v3166_v49 }
0x13e2   : > { %5401 = vmatmul.mubr.msk.f32.vlgmr.msra.gmra.mxu1 %vm1456_vm5, %v6048_v17  ;;  %5408 = vmatprep.subr.mxu1 %v5733_v19 }
0x13e3   : > { %5410 = vmatprep.mubr.msk.f32.mxu1 %vm5734_vm8, %v5733_v19 }
0x13e6   : > { %v3273_v53 = vpop.f32.mrf.mxu0 }
0x13e7   : > { %v3274_v54 = vadd.f32 %v4819_v51, %v3273_v53 }
0x13e8   : > { %v5382_v40 = vpop.f32.mrf.mxu0 }
0x13e9   : > { %5404 = vmatpush3.msk.msra.mxu0 %vm1463_vm4, %v3274_v54 }
0x13ea   : > { %5406 = vmatmul.mubr.msk.f32.vlgmr.msra.gmra.mxu0 %vm1456_vm5, %v6048_v17  ;;  %v6174_v5 = vpop.f32.mrf.mxu0  ;;  %5425 = vmatprep.subr.mxu0 %v5733_v19  ;;  %v3645_v17 = vld [vmem:[#allocation2 + $0x620] sm:$0xff]  ;;  %vm4519_vm5 = vcmask 258052  }
0x13eb   : > { %5427 = vmatprep.mubr.msk.f32.mxu0 %vm5734_vm8, %v5733_v19 }
0x13ec   : > { %v5387_v56 = vpop.f32.mrf.mxu0 }
0x149a   : > { %v6179_v59 = vpop.f32.mrf.mxu0 }
0x149b   : > { %v3422_v32 = vadd.f32 %v6179_v59, %v6174_v5 }
0x149c   : > { %v5392_v61 = vpop.f32.mrf.mxu0 }
0x149e   : > { %v3494_v63 = vpop.f32.mrf.mxu0 }
0x14a0   : > { %v5397_v50 = vpop.f32.mrf.mxu0 }
0x14a2   : > { %v3567_v52 = vpop.f32.mrf.mxu1 }
0x14a3   : > { %v3568_v2 = vadd.f32 %v3567_v52, %v3494_v63 }
0x14a4   : > { %v5402_v33 = vpop.f32.mrf.mxu1 }
0x14a5   : > { %5409 = vmatpush3.msk.msra.mxu1 %vm3670_vm14, %v3568_v2  ;;  %v4193_v33 = vld [vmem:[#allocation2 + $0x6a8] sm:$0xff] }
0x14a6   : > { %5411 = vmatmul.mubr.msk.f32.vlgmr.msra.gmra.mxu1 %vm3654_vm15, %v3644_v3  ;;  %5442 = vmatprep.subr.mxu1 %v5733_v19 }
0x14a7   : > { %5413 = vmatprep.mubr.msk.f32.mxu1 %vm5734_vm8, %v5733_v19 }
0x14aa   : > { %5414 = vmatmul.mubr.msk.f32.gmra.mxu1 %vm3654_vm15, %v3645_v17  ;;  %v3640_v4 = vpop.f32.mrf.mxu0 }
0x14ab   : > { %5416 = vmatprep.mubr.msk.f32.mxu1 %vm5734_vm8, %v5733_v19  ;;  %v3641_v37 = vadd.f32 %v3640_v4, %v3494_v63  ;;  %v4042_v63 = vld [vmem:[#allocation2 + $0x690] sm:$0xff] }
0x14ac   : > { %v5407_v7 = vpop.f32.mrf.mxu0 }
0x14ad   : > { %5426 = vmatpush3.msk.msra.mxu0 %vm3670_vm14, %v3641_v37  ;;  %v4191_v7 = vld [vmem:[#allocation2 + $0x698] sm:$0xff] }
0x14ae   : > { %5417 = vmatmul.mubr.msk.f32.gmra.mxu1 %vm3654_vm15, %v3646_v23  ;;  %5428 = vmatmul.mubr.msk.f32.vlgmr.msra.gmra.mxu0 %vm3654_vm15, %v3644_v3  ;;  %v4194_v3 = vld [vmem:[#allocation2 + $0x6b0] sm:$0xff] }
0x14af   : > { %5419 = vmatprep.mubr.msk.f32.mxu1 %vm5734_vm8, %v5733_v19  ;;  %5430 = vmatprep.mubr.msk.f32.mxu0 %vm5734_vm8, %v5733_v19 }
0x14b0   : > { %5455 = vmatprep.subr.mxu0 %v5733_v19 }
0x14b1   : > { %5456 = vmatpush3.msra.mxu0 %v3966_v21  ;;  %v4409_v21 = vld [vmem:[#allocation2 + $0x708] sm:$0xff] }
0x14b2   : > { %5420 = vmatmul.mubr.msk.f32.gmra.mxu1 %vm3654_vm15, %v3647_v11  ;;  %5431 = vmatmul.mubr.msk.f32.gmra.mxu0 %vm3654_vm15, %v3645_v17  ;;  %v4192_v17 = vld [vmem:[#allocation2 + $0x6a0] sm:$0xff] }
0x14b3   : > { %5422 = vmatprep.mubr.msk.f32.mxu1 %vm5734_vm8, %v5733_v19  ;;  %5433 = vmatprep.mubr.msk.f32.mxu0 %vm5734_vm8, %v5733_v19 }
0x14b4   : > { %5457 = vmatprep.subr.mxu0 %v5733_v19 }
0x14b5   : > { %5458 = vmatpush3.msra.mxu0 %v3965_v35  ;;  %v4408_v35 = vld [vmem:[#allocation2 + $0x700] sm:$0xff] }
0x14b6   : > { %5423 = vmatmul.mubr.msk.f32.gmra.mxu1 %vm3654_vm15, %v3648_v41  ;;  %5434 = vmatmul.mubr.msk.f32.gmra.mxu0 %vm3654_vm15, %v3646_v23 }
0x14b7   : > { %5452 = vmatprep.mubr.msk.f32.mxu1 %vm5734_vm8, %v5733_v19  ;;  %5436 = vmatprep.mubr.msk.f32.mxu0 %vm5734_vm8, %v5733_v19 }
0x14b8   : > { %5459 = vmatprep.subr.mxu0 %v5733_v19 }
0x14b9   : > { %5460 = vmatpush3.msra.mxu0 %v3964_v36  ;;  %v4407_v36 = vld [vmem:[#allocation2 + $0x6f8] sm:$0xff] }
0x14ba   : > { %5437 = vmatmul.mubr.msk.f32.gmra.mxu0 %vm3654_vm15, %v3647_v11  ;;  %5461 = vmatprep.subr.mxu0 %v5733_v19 }
0x14bb   : > { %5439 = vmatprep.mubr.msk.f32.mxu0 %vm5734_vm8, %v5733_v19  ;;  %5462 = vmatpush3.msra.mxu0 %v3963_v39  ;;  %v4856_v39 = vld [vmem:[#allocation2 + $0x6f0] ss:$0 sm:$0xff] }
0x14bc   : > { %5463 = vmatprep.subr.mxu0 %v5733_v19 }
0x14bd   : > { %5464 = vmatpush3.msra.mxu0 %v3962_v60 }
0x14be   : > { %5440 = vmatmul.mubr.msk.f32.gmra.mxu0 %vm3654_vm15, %v3648_v41  ;;  %5473 = vmatprep.subr.mxu0 %v5733_v19 }
0x14bf   : > { %5465 = vmatprep.mubr.msk.f32.mxu0 %vm5734_vm8, %v5733_v19 }
0x1566   : > { %v3740_v12 = vpop.f32.mrf.mxu1 }
0x1567   : > { %v3764_v31 = vmul.f32 %v3740_v12, %v3649_v62  ;;  %v4852_v12 = vld [vmem:[#allocation2 + $0x6b8] ss:$0 sm:$0xff] }
0x1568   : > { %v5412_v13 = vpop.f32.mrf.mxu1 }
0x156a   : > { %v3745_v30 = vpop.f32.mrf.mxu1 }
0x156b   : > { %v3765_v1 = vmul.f32 %v3745_v30, %v3650_v29 }
0x156c   : > { %v5415_v14 = vpop.f32.mrf.mxu1 }
0x156e   : > { %v3750_v55 = vpop.f32.mrf.mxu1  ;;  %v3838_v26 = vpop.f32.mrf.mxu0 }
0x156f   : > { %v3766_v28 = vmul.f32 %v3750_v55, %v3651_v27  ;;  %v3862_v61 = vmul.f32 %v3838_v26, %v3649_v62  ;;  %v4854_v62 = vld [vmem:[#allocation2 + $0x6c0] ss:$0 sm:$0xff] }
0x1570   : > { %v5418_v15 = vpop.f32.mrf.mxu1  ;;  %v5429_v42 = vpop.f32.mrf.mxu0 }
0x1572   : > { %v3755_v16 = vpop.f32.mrf.mxu1  ;;  %v3843_v43 = vpop.f32.mrf.mxu0 }
0x1573   : > { %v3767_v25 = vmul.f32 %v3755_v16, %v3652_v22  ;;  %v3863_v59 = vmul.f32 %v3843_v43, %v3650_v29 }
0x1574   : > { %v5421_v0 = vpop.f32.mrf.mxu1  ;;  %v5432_v44 = vpop.f32.mrf.mxu0 }
0x1576   : > { %v3760_v57 = vpop.f32.mrf.mxu1  ;;  %v3848_v45 = vpop.f32.mrf.mxu0 }
0x1577   : > { %v3768_v20 = vmul.f32 %v3760_v57, %v3653_v10  ;;  %v3864_v56 = vmul.f32 %v3848_v45, %v3651_v27 }
0x1578   : > { %v5424_v24 = vpop.f32.mrf.mxu1  ;;  %v5435_v46 = vpop.f32.mrf.mxu0 }
0x1579   : > { %5443 = vmatpush3.xpose.msk.msra.mxu1 %vm2987_vm13, %v3768_v20  ;;  %v4301_v24 = vld [vmem:[#allocation2 + $0x6e0] sm:$0xff] }
0x157a   : > { %5444 = vmatprep.subr.mxu1 %v5733_v19  ;;  %v3853_v8 = vpop.f32.mrf.mxu0 }
0x157b   : > { %v3865_v5 = vmul.f32 %v3853_v8, %v3652_v22  ;;  %v4302_v22 = vld [vmem:[#allocation2 + $0x6e8] sm:$0xff] }
0x157c   : > { %v5438_v47 = vpop.f32.mrf.mxu0 }
0x157d   : > { %5445 = vmatpush3.xpose.msk.msra.mxu1 %vm2987_vm13, %v3767_v25  ;;  %v4300_v25 = vld [vmem:[#allocation2 + $0x6d8] sm:$0xff] }
0x157e   : > { %5446 = vmatprep.subr.mxu1 %v5733_v19  ;;  %v3858_v48 = vpop.f32.mrf.mxu0 }
0x157f   : > { %v3866_v54 = vmul.f32 %v3858_v48, %v3653_v10 }
0x1580   : > { %v5441_v49 = vpop.f32.mrf.mxu0 }
0x1581   : > { %5447 = vmatpush3.xpose.msk.msra.mxu1 %vm2987_vm13, %v3766_v28 }
0x1582   : > { %5448 = vmatprep.subr.mxu1 %v5733_v19 }
0x1585   : > { %5449 = vmatpush3.xpose.msk.msra.mxu1 %vm2987_vm13, %v3765_v1 }
0x1586   : > { %5450 = vmatprep.subr.mxu1 %v5733_v19 }
0x1589   : > { %5451 = vmatpush3.xpose.msk.msra.mxu1 %vm2987_vm13, %v3764_v31 }
0x158a   : > { %5468 = vmatprep.subr.mxu1 %v5733_v19 }
0x158c   : > { %5453 = vmatmul.mubr.msk.f32.vlgmr.msra.gmra.mxu1 %vm2987_vm13, %v3422_v32  ;;  %v4855_v32 = vld [vmem:[#allocation2 + $0x6c8] ss:$0 sm:$0xff] }
0x158d   : > { %5470 = vmatprep.mubr.msk.f32.mxu1 %vm5734_vm8, %v5733_v19  ;;  %5469 = vmatpush3.msra.mxu1 %v4042_v63 }
0x158e   : > { %5486 = vmatprep.subr.mxu1 %v5733_v19 }
0x164c   : > { %v3951_v58 = vpop.f32.mrf.mxu1 }
0x164d   : > { %v3956_v6 = vsel %vm3955_vm0, %v3951_v58, -inf }
0x164e   : > { %3957 = vmax.xlane.f32.xlu0 %v3956_v6  ;;  %v5454_v34 = vpop.f32.mrf.mxu1 }
0x164f   : > { %v4410_v34 = vld [vmem:[#allocation2 + $0x710] sm:$0xff] }
0x16d7   : > { %v3958_v38 = vpop.xlane.xlu0 %3957 }
0x16d8   : > { %v3959_v51 = vsub.f32 %v3951_v58, %v3958_v38 }
0x16da   : > { %v3960_v53 = vmul.f32 1.442695, %v3959_v51 }
0x16dc   : > { %5621 = vpow2.f32 %v3960_v53 }
0x16e9   : > { %v5622_v40 = vpop.eup %5621 }
0x16ea   : > { %5466 = vmatmul.mubr.msk.f32.vlgmr.msra.gmra.mxu0 %vm3967_vm1, %v5622_v40 }
0x16eb   : > { %5474 = vmatpush3.msra.mxu0 %v3866_v54  ;;  %5483 = vmatprep.mubr.msk.f32.mxu0 %vm5734_vm8, %v5733_v19 }
0x16ec   : > { %5475 = vmatprep.subr.mxu0 %v5733_v19 }
0x16ed   : > { %5476 = vmatpush3.msra.mxu0 %v3865_v5 }
0x16ee   : > { %5477 = vmatprep.subr.mxu0 %v5733_v19 }
0x16ef   : > { %5478 = vmatpush3.msra.mxu0 %v3864_v56 }
0x16f0   : > { %5479 = vmatprep.subr.mxu0 %v5733_v19 }
0x16f1   : > { %5480 = vmatpush3.msra.mxu0 %v3863_v59 }
0x16f2   : > { %5481 = vmatprep.subr.mxu0 %v5733_v19 }
0x16f3   : > { %5482 = vmatpush3.msra.mxu0 %v3862_v61 }
0x16f4   : > { %5508 = vmatprep.subr.mxu0 %v5733_v19 }
0x17aa   : > { %v4037_v50 = vpop.f32.mrf.mxu0 }
0x17ab   : > { %5623 = vrcp.f32 %v4037_v50 }
0x17ac   : > { %v5467_v52 = vpop.f32.mrf.mxu0 }
0x17b8   : > { %v5624_v2 = vpop.eup %5623 }
0x17b9   : > { %5471 = vmatmul.mubr.msk.f32.vlgmr.msra.gmra.mxu1 %vm4043_vm2, %v5624_v2 }
0x17ba   : > { %5494 = vmatprep.mubr.msk.f32.mxu1 %vm5734_vm8, %v5733_v19  ;;  %5487 = vmatpush3.msra.mxu1 %v4194_v3 }
0x17bb   : > { %5488 = vmatprep.subr.mxu1 %v5733_v19 }
0x17bc   : > { %5489 = vmatpush3.msra.mxu1 %v4193_v33 }
0x17bd   : > { %5490 = vmatprep.subr.mxu1 %v5733_v19 }
0x17be   : > { %5491 = vmatpush3.msra.mxu1 %v4192_v17 }
0x17bf   : > { %5492 = vmatprep.subr.mxu1 %v5733_v19 }
0x17c0   : > { %5493 = vmatpush3.msra.mxu1 %v4191_v7 }
0x17c1   : > { %5497 = vmatprep.subr.mxu1 %v5733_v19 }
0x1879   : > { %v4113_v4 = vpop.f32.mrf.mxu1 }
0x187a   : > { %v4117_v23 = vmul.f32 %v5622_v40, %v4113_v4 }
0x187b   : > { %v5472_v37 = vpop.f32.mrf.mxu1 }
0x187c   : > { %5484 = vmatmul.mubr.msk.f32.vlgmr.msra.gmra.mxu0 %vm3967_vm1, %v4117_v23  ;;  %v4859_v37 = vld [vmem:[#allocation2 + $0x718] ss:$0 sm:$0xff] }
0x187d   : > { %5516 = vmatprep.mubr.msk.f32.mxu0 %vm5734_vm8, %v5733_v19  ;;  %5509 = vmatpush3.msra.mxu0 %v4410_v34 }
0x187e   : > { %5510 = vmatprep.subr.mxu0 %v5733_v19 }
0x187f   : > { %5511 = vmatpush3.msra.mxu0 %v4409_v21 }
0x1880   : > { %5512 = vmatprep.subr.mxu0 %v5733_v19 }
0x1881   : > { %5513 = vmatpush3.msra.mxu0 %v4408_v35 }
0x1882   : > { %5514 = vmatprep.subr.mxu0 %v5733_v19 }
0x1883   : > { %5515 = vmatpush3.msra.mxu0 %v4407_v36 }
0x193c   : > { %v4187_v11 = vpop.f32.mrf.mxu0 }
0x193d   : > { %5495 = vmatmul.mubr.msk.f32.vlgmr.msra.gmra.mxu1 %vm2987_vm13, %v4187_v11 }
0x193e   : > { %v5485_v41 = vpop.f32.mrf.mxu0  ;;  %5505 = vmatprep.mubr.msk.f32.mxu1 %vm5734_vm8, %v5733_v19  ;;  %5498 = vmatpush3.msra.mxu1 %v4302_v22 }
0x193f   : > { %5499 = vmatprep.subr.mxu1 %v5733_v19 }
0x1940   : > { %5500 = vmatpush3.msra.mxu1 %v4301_v24 }
0x1941   : > { %5501 = vmatprep.subr.mxu1 %v5733_v19 }
0x1942   : > { %5502 = vmatpush3.msra.mxu1 %v4300_v25 }
0x1943   : > { %5503 = vmatprep.subr.mxu1 %v5733_v19 }
0x19fd   : > { %v4269_v13 = vpop.f32.mrf.mxu1 }
0x19fe   : > { %v4270_v30 = vadd.f32 %v4852_v12, %v4269_v13 }
0x19ff   : > { %v5496_v14 = vpop.f32.mrf.mxu1 }
0x1a00   : > { %v6257_v55 = vadd.f32 %v4270_v30, %v6056_v18  ;;  %v4299_v18 = vld [vmem:[#allocation2 + $0x6d0] sm:$0xff] }
0x1a01   : > { %5504 = vmatpush3.msra.mxu1 %v4299_v18 }
0x1a02   : > { %v4276_v15 = vsel %vm2779_vm12, %v6257_v55, 0.0  ;;  %5519 = vmatprep.subr.mxu1 %v5733_v19 }
0x1a03   : > { %4277 = vadd.xlane.f32.xlu1 %v4276_v15 }
0x1a8c   : > { %v4278_v16 = vpop.xlane.xlu1 %4277 }
0x1a8d   : > { %v4279_v0 = vmul.f32 0.03125, %v4278_v16 }
0x1a8f   : > { %v4280_v10 = vsub.f32 %v6257_v55, %v4279_v0 }
0x1a91   : > { %v4281_v57 = vmul.f32 %v4280_v10, %v4280_v10 }
0x1a93   : > { %v4282_v20 = vsel %vm2779_vm12, %v4281_v57, 0.0 }
0x1a94   : > { %4283 = vadd.xlane.f32.xlu0 %v4282_v20 }
0x1b1d   : > { %v4284_v27 = vpop.xlane.xlu0 %4283 }
0x1b1e   : > { %v4285_v28 = vmul.f32 0.03125, %v4284_v27 }
0x1b20   : > { %v4286_v29 = vadd.f32 1e-05, %v4285_v28 }
0x1b22   : > { %5625 = vrsqrt.f32 %v4286_v29 }
0x1b2f   : > { %v5626_v1 = vpop.eup %5625 }
0x1b30   : > { %v4288_v31 = vmul.f32 %v5626_v1, %v4280_v10 }
0x1b32   : > { %v4293_v58 = vmul.f32 %v4854_v62, %v4288_v31 }
0x1b34   : > { %v4298_v6 = vadd.f32 %v4855_v32, %v4293_v58 }
0x1b36   : > { %5506 = vmatmul.mubr.msk.f32.vlgmr.msra.gmra.mxu1 %vm2987_vm13, %v4298_v6 }
0x1b37   : > { %5527 = vmatprep.mubr.msk.f32.mxu1 %vm5734_vm8, %v5733_v19 }
0x1bf6   : > { %v4377_v60 = vpop.f32.mrf.mxu1 }
0x1bf7   : > { %v4378_v26 = vadd.f32 %v4856_v39, %v4377_v60 }
0x1bf8   : > { %v5507_v42 = vpop.f32.mrf.mxu1 }
0x1bf9   : > { %v4382_v43 = vmul.f32 0.70710677, %v4378_v26  ;;  %v4381_v33 = vmul.f32 0.5, %v4378_v26  ;;  %v4544_v42 = vld [vmem:[#allocation2 + $0x748] sm:$0xff] }
0x1bfa   : > { %5520 = vmatpush3.msra.mxu1 %v4544_v42 }
0x1bfb   : > { %v4385_v44 = vand.u32 2147483647, %v4382_v43  ;;  %vm4383_vm3 = vcmp.ge.f32.partialorder %v4382_v43, 0.0  ;;  %v4543_v43 = vld [vmem:[#allocation2 + $0x740] sm:$0xff]  ;;  %5521 = vmatprep.subr.mxu1 %v5733_v19 }
0x1bfc   : > { %v4384_v2 = vsel %vm4383_vm3, 1.0, %v5732_v9  ;;  %5522 = vmatpush3.msra.mxu1 %v4543_v43 }
0x1bfd   : > { %v4386_v45 = vmul.f32 0.3275911, %v4385_v44  ;;  %v4398_v8 = vsub.f32 0.0, %v4385_v44  ;;  %5523 = vmatprep.subr.mxu1 %v5733_v19 }
0x1bff   : > { %v4387_v46 = vadd.f32 1.0, %v4386_v45  ;;  %v4399_v47 = vmul.f32 %v4398_v8, %v4385_v44  ;;  %v4542_v44 = vld [vmem:[#allocation2 + $0x738] sm:$0xff] }
0x1c00   : > { %5524 = vmatpush3.msra.mxu1 %v4542_v44 }
0x1c01   : > { %5627 = vrcp.f32 %v4387_v46  ;;  %v4400_v38 = vmul.f32 1.442695, %v4399_v47  ;;  %5525 = vmatprep.subr.mxu1 %v5733_v19  ;;  %v4517_v47 = vld [vmem:[#allocation2 + $0x720] sm:$0x1]  ;;  %v4545_v19 = vld [vmem:[#allocation2 + $0x750] sm:$0x1] }
0x1c03   : > { %5629 = vpow2.f32 %v4400_v38 }
0x1c0e   : > { %v5628_v48 = vpop.eup %5627 }
0x1c0f   : > { %v4389_v49 = vmul.f32 1.0614054, %v5628_v48 }
0x1c10   : > { %v5630_v63 = vpop.eup %5629 }
0x1c11   : > { %v4390_v51 = vadd.f32 -1.4531521, %v4389_v49  ;;  %v4534_v49 = vrot.slane %v4517_v47, 4 }
0x1c13   : > { %v4391_v53 = vmul.f32 %v5628_v48, %v4390_v51 }
0x1c15   : > { %v4392_v54 = vadd.f32 1.4214138, %v4391_v53 }
0x1c17   : > { %v4393_v40 = vmul.f32 %v5628_v48, %v4392_v54 }
0x1c19   : > { %v4394_v5 = vadd.f32 -0.28449672, %v4393_v40 }
0x1c1b   : > { %v4395_v56 = vmul.f32 %v5628_v48, %v4394_v5 }
0x1c1d   : > { %v4396_v59 = vadd.f32 0.2548296, %v4395_v56 }
0x1c1f   : > { %v4397_v61 = vmul.f32 %v5628_v48, %v4396_v59  ;;  %v4518_v48 = vld [vmem:[#allocation2 + $0x728] sm:$0x1] }
0x1c20   : > { %v4538_v53 = vrot.slane %v4518_v48, 4 }
0x1c21   : > { %v4402_v50 = vmul.f32 %v5630_v63, %v4397_v61 }
0x1c23   : > { %v4403_v52 = vsub.f32 1.0, %v4402_v50 }
0x1c25   : > { %v4404_v3 = vmul.f32 %v4403_v52, %v4384_v2 }
0x1c27   : > { %v4405_v17 = vadd.f32 1.0, %v4404_v3 }
0x1c29   : > { %v4406_v4 = vmul.f32 %v4405_v17, %v4381_v33 }
0x1c2b   : > { %5517 = vmatmul.mubr.msk.f32.vlgmr.msra.gmra.mxu0 %vm2987_vm13, %v4406_v4 }
0x1ceb   : > { %v4480_v23 = vpop.f32.mrf.mxu0 }
0x1cec   : > { %v4484_v7 = vadd.f32 %v4480_v23, %v6257_v55 }
0x1ced   : > { %v5518_v11 = vpop.f32.mrf.mxu0 }
0x1cee   : > { %v4490_v41 = vadd.f32 %v4859_v37, %v4484_v7 }
0x1cf0   : > { %v4492_v12 = vmul.f32 0.70710677, %v4490_v41  ;;  %v4491_v58 = vmul.f32 0.5, %v4490_v41 }
0x1cf2   : > { %v4495_v13 = vand.u32 2147483647, %v4492_v12  ;;  %vm4493_vm4 = vcmp.ge.f32.partialorder %v4492_v12, 0.0 }
0x1cf3   : > { %v4494_v31 = vsel %vm4493_vm4, 1.0, %v5732_v9  ;;  %v4541_v9 = vld [vmem:[#allocation2 + $0x730] sm:$0xff] }
0x1cf4   : > { %v4496_v30 = vmul.f32 0.3275911, %v4495_v13  ;;  %v4508_v15 = vsub.f32 0.0, %v4495_v13  ;;  %5526 = vmatpush3.msra.mxu1 %v4541_v9 }
0x1cf6   : > { %v4497_v14 = vadd.f32 1.0, %v4496_v30  ;;  %v4509_v16 = vmul.f32 %v4508_v15, %v4495_v13 }
0x1cf8   : > { %5631 = vrcp.f32 %v4497_v14  ;;  %v4510_v10 = vmul.f32 1.442695, %v4509_v16 }
0x1cfa   : > { %5633 = vpow2.f32 %v4510_v10 }
0x1d05   : > { %v5632_v0 = vpop.eup %5631 }
0x1d06   : > { %v4499_v57 = vmul.f32 1.0614054, %v5632_v0 }
0x1d07   : > { %v5634_v29 = vpop.eup %5633 }
0x1d08   : > { %v4500_v20 = vadd.f32 -1.4531521, %v4499_v57 }
0x1d0a   : > { %v4501_v22 = vmul.f32 %v5632_v0, %v4500_v20 }
0x1d0c   : > { %v4502_v24 = vadd.f32 1.4214138, %v4501_v22 }
0x1d0e   : > { %v4503_v25 = vmul.f32 %v5632_v0, %v4502_v24 }
0x1d10   : > { %v4504_v18 = vadd.f32 -0.28449672, %v4503_v25 }
0x1d12   : > { %v4505_v27 = vmul.f32 %v5632_v0, %v4504_v18 }
0x1d14   : > { %v4506_v55 = vadd.f32 0.2548296, %v4505_v27 }
0x1d16   : > { %v4507_v28 = vmul.f32 %v5632_v0, %v4506_v55 }
0x1d18   : > { %v4512_v1 = vmul.f32 %v5634_v29, %v4507_v28 }
0x1d1a   : > { %v4513_v62 = vsub.f32 1.0, %v4512_v1 }
0x1d1c   : > { %v4514_v32 = vmul.f32 %v4513_v62, %v4494_v31 }
0x1d1e   : > { %v4515_v6 = vadd.f32 1.0, %v4514_v32 }
0x1d20   : > { %v4516_v34 = vmul.f32 %v4515_v6, %v4491_v58 }
0x1d22   : > { %v4520_v21 = vsel %vm4519_vm5, %v4516_v34, 0.0 }
0x1d23   : > { %4521 = vadd.xlane.f32.xlu1 %v4520_v21 }
0x1dac   : > { %v4522_v35 = vpop.xlane.xlu1 %4521 }
0x1dad   : > { %v4523_v36 = vmul.f32 0.03125, %v4522_v35 }
0x1daf   : > { %v4524_v39 = vsub.f32 %v4516_v34, %v4523_v36 }
0x1db1   : > { %v4525_v60 = vmul.f32 %v4524_v39, %v4524_v39 }
0x1db3   : > { %v4526_v26 = vsel %vm4519_vm5, %v4525_v60, 0.0 }
0x1db4   : > { %4527 = vadd.xlane.f32.xlu0 %v4526_v26 }
0x1e3d   : > { %v4528_v45 = vpop.xlane.xlu0 %4527 }
0x1e3e   : > { %v4529_v46 = vmul.f32 0.03125, %v4528_v45 }
0x1e40   : > { %v4530_v8 = vadd.f32 1e-05, %v4529_v46 }
0x1e42   : > { %5635 = vrsqrt.f32 %v4530_v8 }
0x1e4f   : > { %v5636_v38 = vpop.eup %5635 }
0x1e50   : > { %v4532_v51 = vmul.f32 %v5636_v38, %v4524_v39 }
0x1e52   : > { %v4536_v54 = vmul.f32 %v4534_v49, %v4532_v51 }
0x1e54   : > { %v4540_v40 = vadd.f32 %v4538_v53, %v4536_v54 }
0x1e56   : > { %v4547_v5 = vrot.slane %v4540_v40, 4 }
0x1e58   : > { %5528 = vmatmul.mubr.msk.f32.vlgmr.msra.gmra.mxu1 %vm2987_vm13, %v4547_v5 }
0x1f18   : > { %v4616_v56 = vpop.f32.mrf.mxu1 }
0x1f19   : > { %v4617_v59 = vadd.f32 %v4616_v56, %v4545_v19 }
0x1f1a   : > { %v5529_v61 = vpop.f32.mrf.mxu1 }
0x1f1b   : > { %4620 = vst [vmem:[%s150_s8] sm:$0x1] %v4617_v59 }
0x1f1c   : > { %5676 = shalt.err (!%p5673_p0)
}
0x1f1d   : > { %s5677_s26 = scalar_lea.hbm %s6286_s21, 16  ;;  %s5681_s29 = scalar_lea.hbm %s6323_s2, 32 }
0x1f1e   : > { %p5678_p1 = scmp.ne.s32.totalorder %s6286_s21, %s5677_s26  ;;  %p5682_p4 = scmp.lt.s32.totalorder %s6286_s21, %s6323_s2 }
0x1f1f   : > { %p5683_p7 = scmp.lt.s32.totalorder %s5681_s29, %s5677_s26 }
0x1f20   : > { %p5679_p2 = pnand %p5678_p1, %p5789_p5 }
0x1f21   : > { %p5684_p8 = por %p5683_p7, %p5682_p4 }
0x1f22   : > { %p5680_p3 = pneg %p5679_p2 }
0x1f24   : > { %p5685_p6 = pnand %p5684_p8, %p5680_p3 }
0x1f26   : > { %5688 = shalt.err (!%p5685_p6)
}
0x1f27   : > { %5538 = dma.vmem_to_hbm [thread:$0]  (%p5789_p5), %s4635_s14, 16, %s6286_s21, %s4622_s22  }
0x1f28 PF: > { %p5550_p9 = scmp.ge.s32.totalorder %s5727_s12, 2  ;;  %s4646_s4 = sand.u32 1, %s5715_s9  }
0x1f29   : > { %p6327_p10 = scmp.ne.s32.totalorder %s6325_s20, 0  ;;  %s4647_s5 = scalar_lea.sflag [#allocation4], %s4646_s4 }
0x1f2b   : > { %p5545_p11 = pnand %p5550_p9, %p6327_p10 }
0x1f2d   : > { %p5546_p12 = pneg %p5545_p11 }
0x1f2f   : > { %5710 = dma.done.wait (%p5546_p12), %s4647_s5, 16  }
0x1f30   : > { %5712 = vsyncadd (%p5546_p12), %s4647_s5, 4294967280  ;;  %p13_p13 = scmp.ge.s32.totalorder %s5776_s15, 4   ;;  %s6328_s9 = smov %s5719_s10 }
0x1f31   : > { %s6329_s10 = smov %s5723_s11  ;;  %s6330_s11 = smov %s5787_s18 }
0x1f32   : > { %s6331_s12 = smov %s5776_s15  ;;  %15 = sbr.rel (!%p13_p13) target bundleno = 4 (0x4), region = 68 }
0x1f37   :  { %4651 = vsyncpa [#allocation3], 1 }
0x1f38   :  { %4653 = vsyncpa [#allocation3 + $0x1], 1 }
0x1f39   :  { %4654 = vsyncpa [#allocation4], 1 }
0x1f3a   :  { %4656 = vsyncpa [#allocation4 + $0x1], 1 }

</bundles_post_ra>
